<compile_context>
chip_gen: v7x
topology: tpu7x:2x2x1
jax: 0.10.0
libtpu: 0.0.40
codegen_flags: <defaults>
</compile_context>

<pallas_src>
import math
from functools import partial

import jax
import jax.numpy as jnp
from jax import lax
from jax.experimental import pallas as pl
from jax.experimental.pallas import tpu as pltpu


# --------------------------------------------------------------------------
# In-kernel helpers
# --------------------------------------------------------------------------

def _layer_norm(s, gamma, beta, eps=1e-6):
    mean = jnp.mean(s, axis=-1, keepdims=True)
    var = jnp.mean(jnp.square(s - mean), axis=-1, keepdims=True)
    return gamma * (s - mean) * lax.rsqrt(var + eps) + beta


def _attend(q, k, v, neg_mask, wo, bo, attn_ref, num_heads):
    """Scaled dot-product attention over already-projected q, k, v.

    q: (Sq, D), k/v: (Skv, D), wo: (D, D), bo: (1, D).
    attn_ref block: (1, H, Sq, Skv) -- written every layer, but its block index
    is constant across the layer grid axis, so HBM writeback happens only once
    per batch element (after the last layer).
    Returns the attention output (Sq, D) in f32.
    """
    Sq, D = q.shape
    dk = D // num_heads
    scale = 1.0 / math.sqrt(dk)

    # Output-projection bias, hoisted out of the head loop.
    out = jnp.broadcast_to(bo, (Sq, D)).astype(jnp.float32)

    # Static unroll over heads; kept as 2-D matmuls for robust lowering at
    # these tiny head sizes (dk = 8).
    for h in range(num_heads):
        qh = q[:, h * dk:(h + 1) * dk]           # (Sq, dk)
        kh = k[:, h * dk:(h + 1) * dk]           # (Skv, dk)
        vh = v[:, h * dk:(h + 1) * dk]           # (Skv, dk)

        scores = lax.dot_general(qh, kh, (((1,), (1,)), ((), ())),
                                 preferred_element_type=jnp.float32) * scale
        scores = scores + neg_mask               # hoisted (-1e9 * mask)
        m = jnp.max(scores, axis=-1, keepdims=True)
        e = jnp.exp(scores - m)
        p = e * pl.reciprocal(jnp.sum(e, axis=-1, keepdims=True), approx=True)
        attn_ref[0, h] = p.astype(attn_ref.dtype)

        ctx_h = jnp.dot(p, vh, preferred_element_type=jnp.float32)   # (Sq, dk)
        # ctx @ Wo == sum over per-head row-slices of Wo (avoids lane concat)
        out = out + jnp.dot(ctx_h, wo[h * dk:(h + 1) * dk, :],
                            preferred_element_type=jnp.float32)
    return out


# --------------------------------------------------------------------------
# Fused decoder-stack kernel: one grid step == (batch b, layer l)
# --------------------------------------------------------------------------

def decoder_stack_kernel(x0_ref, enc_ref, la_ref, pad_ref,
                         a1_wqkv_ref, a1_bqkv_ref, a1_wo_ref, a1_bo_ref,
                         a2_wq_ref, a2_bq_ref, a2_wkv_ref, a2_bkv_ref,
                         a2_wo_ref, a2_bo_ref,
                         w1_ref, b1_ref, w2_ref, b2_ref,
                         lng_ref, lnb_ref, fw_ref, fb_ref,
                         logits_ref, attn1_ref, attn2_ref,
                         x_scr, *, num_heads):
    l = pl.program_id(1)

    # Layer 0: load the embedded+pos-encoded input into the VMEM-resident carry.
    @pl.when(l == 0)
    def _():
        x_scr[...] = x0_ref[0].astype(jnp.float32)

    x = x_scr[...]                     # (S, D) running activation
    enc = enc_ref[0]                   # (S_enc, D)
    D = x.shape[-1]
    neg_la = la_ref[0, 0] * (-1e9)     # (S, S)      hoisted mask scaling
    neg_pad = pad_ref[0, 0] * (-1e9)   # (S, S_enc)

    lng = lng_ref[0]                   # (3, D)
    lnb = lnb_ref[0]                   # (3, D)

    # Sublayer 1: masked self-attention (fused QKV projection) + add&norm
    qkv = (jnp.dot(x, a1_wqkv_ref[0], preferred_element_type=jnp.float32)
           + a1_bqkv_ref[0])           # (S, 3D)
    attn1 = _attend(qkv[:, :D], qkv[:, D:2 * D], qkv[:, 2 * D:],
                    neg_la, a1_wo_ref[0], a1_bo_ref[0], attn1_ref, num_heads)
    out1 = _layer_norm(x + attn1, lng[0:1], lnb[0:1])

    # Sublayer 2: cross-attention over encoder output (fused KV) + add&norm
    q2 = (jnp.dot(out1, a2_wq_ref[0], preferred_element_type=jnp.float32)
          + a2_bq_ref[0])              # (S, D)
    kv = (jnp.dot(enc, a2_wkv_ref[0], preferred_element_type=jnp.float32)
          + a2_bkv_ref[0])             # (S_enc, 2D)
    attn2 = _attend(q2, kv[:, :D], kv[:, D:],
                    neg_pad, a2_wo_ref[0], a2_bo_ref[0], attn2_ref, num_heads)
    out2 = _layer_norm(out1 + attn2, lng[1:2], lnb[1:2])

    # Sublayer 3: position-wise feed-forward + add&norm
    h = jnp.maximum(
        jnp.dot(out2, w1_ref[0], preferred_element_type=jnp.float32)
        + b1_ref[0], 0.0)
    ffn = jnp.dot(h, w2_ref[0], preferred_element_type=jnp.float32) + b2_ref[0]
    out3 = _layer_norm(out2 + ffn, lng[2:3], lnb[2:3])

    x_scr[...] = out3

    # Final vocab projection fused into the last layer (lane-padded vocab dim).
    @pl.when(l == pl.num_programs(1) - 1)
    def _():
        logits_ref[0] = (
            jnp.dot(out3, fw_ref[...], preferred_element_type=jnp.float32)
            + fb_ref[...]).astype(logits_ref.dtype)


# --------------------------------------------------------------------------
# Parameters / positional encoding (deterministic synthetic init)
# --------------------------------------------------------------------------

def position_encoding(max_pos, d_model):
    pos = jnp.arange(max_pos, dtype=jnp.float32)[:, None]
    i = jnp.arange(d_model)[None, :]
    angle_rates = 1.0 / jnp.power(
        10000.0, (2 * (i // 2)).astype(jnp.float32) / d_model)
    angles = pos * angle_rates
    pe = jnp.where(i % 2 == 0, jnp.sin(angles), jnp.cos(angles))
    return pe[None, :, :].astype(jnp.float32)   # (1, max_pos, d_model)


def init_params(key, num_layers, num_heads, d_model, dff, vocab, max_pos):
    lane = 128
    vpad = ((vocab + lane - 1) // lane) * lane

    keys = jax.random.split(key, num_layers * 10 + 2)
    kit = iter(keys)

    def dense(fin, fout):
        k1, k2 = jax.random.split(next(kit))
        w = jax.random.normal(k1, (fin, fout), jnp.float32) * 0.02
        b = jax.random.normal(k2, (fout,), jnp.float32) * 0.02
        return w, b

    a1_wqkv, a1_bqkv, a1_wo, a1_bo = [], [], [], []
    a2_wq, a2_bq, a2_wkv, a2_bkv, a2_wo, a2_bo = [], [], [], [], [], []
    w1s, b1s, w2s, b2s = [], [], [], []
    for _ in range(num_layers):
        # self-attention: fuse Q,K,V along the output (lane) dimension
        wq, bq = dense(d_model, d_model)
        wk, bk = dense(d_model, d_model)
        wv, bv = dense(d_model, d_model)
        wo, bo = dense(d_model, d_model)
        a1_wqkv.append(jnp.concatenate([wq, wk, wv], axis=1))     # (D, 3D)
        a1_bqkv.append(jnp.concatenate([bq, bk, bv])[None, :])    # (1, 3D)
        a1_wo.append(wo)
        a1_bo.append(bo[None, :])                                  # (1, D)
        # cross-attention: Q separate (queries come from x), fuse K,V
        wq, bq = dense(d_model, d_model)
        wk, bk = dense(d_model, d_model)
        wv, bv = dense(d_model, d_model)
        wo, bo = dense(d_model, d_model)
        a2_wq.append(wq)
        a2_bq.append(bq[None, :])
        a2_wkv.append(jnp.concatenate([wk, wv], axis=1))           # (D, 2D)
        a2_bkv.append(jnp.concatenate([bk, bv])[None, :])          # (1, 2D)
        a2_wo.append(wo)
        a2_bo.append(bo[None, :])
        # feed-forward
        w1, b1 = dense(d_model, dff)
        w2, b2 = dense(dff, d_model)
        w1s.append(w1)
        b1s.append(b1[None, :])                                    # (1, dff)
        w2s.append(w2)
        b2s.append(b2[None, :])                                    # (1, D)

    fw, fb = dense(d_model, vocab)
    fw_pad = jnp.zeros((d_model, vpad), jnp.float32).at[:, :vocab].set(fw)
    fb_pad = jnp.zeros((1, vpad), jnp.float32).at[:, :vocab].set(fb[None, :])

    return dict(
        embedding=jax.random.normal(next(kit), (vocab, d_model),
                                    jnp.float32) * 0.02,
        pos_encoding=position_encoding(max_pos, d_model),
        a1_wqkv=jnp.stack(a1_wqkv), a1_bqkv=jnp.stack(a1_bqkv),
        a1_wo=jnp.stack(a1_wo), a1_bo=jnp.stack(a1_bo),
        a2_wq=jnp.stack(a2_wq), a2_bq=jnp.stack(a2_bq),
        a2_wkv=jnp.stack(a2_wkv), a2_bkv=jnp.stack(a2_bkv),
        a2_wo=jnp.stack(a2_wo), a2_bo=jnp.stack(a2_bo),
        ffn_w1=jnp.stack(w1s), ffn_b1=jnp.stack(b1s),
        ffn_w2=jnp.stack(w2s), ffn_b2=jnp.stack(b2s),
        ln_g=jnp.ones((num_layers, 3, d_model), jnp.float32),
        ln_b=jnp.zeros((num_layers, 3, d_model), jnp.float32),
        final_w=fw_pad, final_b=fb_pad,
        vocab_size=vocab,
    )


# --------------------------------------------------------------------------
# SemanticDecoder forward
# --------------------------------------------------------------------------

def semantic_decoder_forward(params, tokens, enc_output, look_ahead_mask,
                             padding_mask, *, num_heads):
    emb = params["embedding"]
    D = emb.shape[1]
    B, S = tokens.shape
    S_enc = enc_output.shape[1]
    L = params["a1_wqkv"].shape[0]
    dff = params["ffn_w1"].shape[-1]
    Vpad = params["final_w"].shape[1]
    V = params["vocab_size"]
    H = num_heads

    # Glue: embedding lookup, sqrt(d_model) scale, positional encoding
    # (dropout == identity in inference mode).
    x0 = emb[tokens] * math.sqrt(D) + params["pos_encoding"][:, :S, :]

    kernel = partial(decoder_stack_kernel, num_heads=num_heads)

    per_batch3 = lambda b, l: (b, 0, 0)
    per_batch4 = lambda b, l: (b, 0, 0, 0)
    per_layer3 = lambda b, l: (l, 0, 0)
    const2 = lambda b, l: (0, 0)

    logits_pad, attn1, attn2 = pl.pallas_call(
        kernel,
        out_shape=(jax.ShapeDtypeStruct((B, S, Vpad), jnp.float32),
                   jax.ShapeDtypeStruct((B, H, S, S), jnp.float32),
                   jax.ShapeDtypeStruct((B, H, S, S_enc), jnp.float32)),
        grid=(B, L),
        in_specs=[
            pl.BlockSpec((1, S, D), per_batch3),            # x0 (embedded input)
            pl.BlockSpec((1, S_enc, D), per_batch3),        # encoder output
            pl.BlockSpec((1, 1, S, S), per_batch4),         # look-ahead mask
            pl.BlockSpec((1, 1, S, S_enc), per_batch4),     # padding mask
            pl.BlockSpec((1, D, 3 * D), per_layer3),        # attn1 fused W_qkv
            pl.BlockSpec((1, 1, 3 * D), per_layer3),        # attn1 fused b_qkv
            pl.BlockSpec((1, D, D), per_layer3),            # attn1 W_o
            pl.BlockSpec((1, 1, D), per_layer3),            # attn1 b_o
            pl.BlockSpec((1, D, D), per_layer3),            # attn2 W_q
            pl.BlockSpec((1, 1, D), per_layer3),            # attn2 b_q
            pl.BlockSpec((1, D, 2 * D), per_layer3),        # attn2 fused W_kv
            pl.BlockSpec((1, 1, 2 * D), per_layer3),        # attn2 fused b_kv
            pl.BlockSpec((1, D, D), per_layer3),            # attn2 W_o
            pl.BlockSpec((1, 1, D), per_layer3),            # attn2 b_o
            pl.BlockSpec((1, D, dff), per_layer3),          # ffn W1
            pl.BlockSpec((1, 1, dff), per_layer3),          # ffn b1
            pl.BlockSpec((1, dff, D), per_layer3),          # ffn W2
            pl.BlockSpec((1, 1, D), per_layer3),            # ffn b2
            pl.BlockSpec((1, 3, D), per_layer3),            # LayerNorm gammas
            pl.BlockSpec((1, 3, D), per_layer3),            # LayerNorm betas
            pl.BlockSpec((D, Vpad), const2),                # final W (lane-padded)
            pl.BlockSpec((1, Vpad), const2),                # final b
        ],
        out_specs=(pl.BlockSpec((1, S, Vpad), per_batch3),
                   pl.BlockSpec((1, H, S, S), per_batch4),
                   pl.BlockSpec((1, H, S, S_enc), per_batch4)),
        scratch_shapes=[pltpu.VMEM((S, D), jnp.float32)],
        compiler_params=pltpu.CompilerParams(
            dimension_semantics=("parallel", "arbitrary")),
    )(x0, enc_output, look_ahead_mask, padding_mask,
      params["a1_wqkv"], params["a1_bqkv"], params["a1_wo"], params["a1_bo"],
      params["a2_wq"], params["a2_bq"], params["a2_wkv"], params["a2_bkv"],
      params["a2_wo"], params["a2_bo"],
      params["ffn_w1"], params["ffn_b1"], params["ffn_w2"], params["ffn_b2"],
      params["ln_g"], params["ln_b"], params["final_w"], params["final_b"])

    # Matches the PyTorch reference: only the LAST layer's weights are recorded.
    attention_weights = {
        "decoder_layer{}_block1".format(L): attn1,
        "decoder_layer{}_block2".format(L): attn2,
    }
    return logits_pad[:, :, :V], attention_weights


# --------------------------------------------------------------------------
# main
# --------------------------------------------------------------------------

if __name__ == "__main__":
    NUM_LAYERS, NUM_HEADS, D_MODEL, DFF = 2, 4, 32, 64
    VOCAB, MAX_POS = 50, 128
    B, S, S_ENC = 2, 8, 8

    root = jax.random.PRNGKey(0)
    k_par, k_tok, k_enc = jax.random.split(root, 3)

    params = init_params(k_par, NUM_LAYERS, NUM_HEADS, D_MODEL, DFF, VOCAB,
                         MAX_POS)
    tokens = jax.random.randint(k_tok, (B, S), 0, VOCAB, dtype=jnp.int32)
    enc_output = jax.random.normal(k_enc, (B, S_ENC, D_MODEL), jnp.float32)

    # look-ahead mask: 1.0 on future positions (masked), broadcast over heads
    la = jnp.triu(jnp.ones((S, S), jnp.float32), k=1)
    look_ahead_mask = jnp.broadcast_to(la[None, None, :, :], (B, 1, S, S))
    # padding mask: nothing masked
    padding_mask = jnp.zeros((B, 1, S, S_ENC), jnp.float32)

    logits, attn_w = semantic_decoder_forward(
        params, tokens, enc_output, look_ahead_mask, padding_mask,
        num_heads=NUM_HEADS)
    logits = jax.block_until_ready(logits)
    for v in attn_w.values():
        jax.block_until_ready(v)

    assert logits.shape == (B, S, VOCAB)
    assert attn_w["decoder_layer2_block1"].shape == (B, NUM_HEADS, S, S)
    assert attn_w["decoder_layer2_block2"].shape == (B, NUM_HEADS, S, S_ENC)
    assert bool(jnp.all(jnp.isfinite(logits)))
    print("KERNEL_OK")
</pallas_src>

<mosaic_0001>
module attributes {stable_mosaic.version = 11 : i64} {
  func.func @decoder_stack_kernel(%arg0: i32, %arg1: i32, %arg2: memref<1x8x32xf32, #tpu.memory_space<vmem>>, %arg3: memref<1x8x32xf32, #tpu.memory_space<vmem>>, %arg4: memref<1x1x8x8xf32, #tpu.memory_space<vmem>>, %arg5: memref<1x1x8x8xf32, #tpu.memory_space<vmem>>, %arg6: memref<1x32x96xf32, #tpu.memory_space<vmem>>, %arg7: memref<1x1x96xf32, #tpu.memory_space<vmem>>, %arg8: memref<1x32x32xf32, #tpu.memory_space<vmem>>, %arg9: memref<1x1x32xf32, #tpu.memory_space<vmem>>, %arg10: memref<1x32x32xf32, #tpu.memory_space<vmem>>, %arg11: memref<1x1x32xf32, #tpu.memory_space<vmem>>, %arg12: memref<1x32x64xf32, #tpu.memory_space<vmem>>, %arg13: memref<1x1x64xf32, #tpu.memory_space<vmem>>, %arg14: memref<1x32x32xf32, #tpu.memory_space<vmem>>, %arg15: memref<1x1x32xf32, #tpu.memory_space<vmem>>, %arg16: memref<1x32x64xf32, #tpu.memory_space<vmem>>, %arg17: memref<1x1x64xf32, #tpu.memory_space<vmem>>, %arg18: memref<1x64x32xf32, #tpu.memory_space<vmem>>, %arg19: memref<1x1x32xf32, #tpu.memory_space<vmem>>, %arg20: memref<1x3x32xf32, #tpu.memory_space<vmem>>, %arg21: memref<1x3x32xf32, #tpu.memory_space<vmem>>, %arg22: memref<32x128xf32, #tpu.memory_space<vmem>>, %arg23: memref<1x128xf32, #tpu.memory_space<vmem>>, %arg24: memref<1x8x128xf32, #tpu.memory_space<vmem>>, %arg25: memref<1x4x8x8xf32, #tpu.memory_space<vmem>>, %arg26: memref<1x4x8x8xf32, #tpu.memory_space<vmem>>, %arg27: memref<8x32xf32, #tpu.memory_space<vmem>>) attributes {dimension_semantics = [#tpu.dimension_semantics<parallel>, #tpu.dimension_semantics<arbitrary>], iteration_bounds = array<i64: 2, 2>, scalar_prefetch = 0 : i64, scratch_operands = 1 : i64, tpu.core_type = #tpu.core_type<tc>, window_params = [{transform_indices = @transform_0, window_bounds = array<i64: 1, 8, 32>}, {transform_indices = @transform_1, window_bounds = array<i64: 1, 8, 32>}, {transform_indices = @transform_2, window_bounds = array<i64: 1, 1, 8, 8>}, {transform_indices = @transform_3, window_bounds = array<i64: 1, 1, 8, 8>}, {transform_indices = @transform_4, window_bounds = array<i64: 1, 32, 96>}, {transform_indices = @transform_5, window_bounds = array<i64: 1, 1, 96>}, {transform_indices = @transform_6, window_bounds = array<i64: 1, 32, 32>}, {transform_indices = @transform_7, window_bounds = array<i64: 1, 1, 32>}, {transform_indices = @transform_8, window_bounds = array<i64: 1, 32, 32>}, {transform_indices = @transform_9, window_bounds = array<i64: 1, 1, 32>}, {transform_indices = @transform_10, window_bounds = array<i64: 1, 32, 64>}, {transform_indices = @transform_11, window_bounds = array<i64: 1, 1, 64>}, {transform_indices = @transform_12, window_bounds = array<i64: 1, 32, 32>}, {transform_indices = @transform_13, window_bounds = array<i64: 1, 1, 32>}, {transform_indices = @transform_14, window_bounds = array<i64: 1, 32, 64>}, {transform_indices = @transform_15, window_bounds = array<i64: 1, 1, 64>}, {transform_indices = @transform_16, window_bounds = array<i64: 1, 64, 32>}, {transform_indices = @transform_17, window_bounds = array<i64: 1, 1, 32>}, {transform_indices = @transform_18, window_bounds = array<i64: 1, 3, 32>}, {transform_indices = @transform_19, window_bounds = array<i64: 1, 3, 32>}, {pipeline_mode = #tpu.pipeline_mode<synchronous>, transform_indices = @transform_20, window_bounds = array<i64: 32, 128>}, {pipeline_mode = #tpu.pipeline_mode<synchronous>, transform_indices = @transform_21, window_bounds = array<i64: 1, 128>}, {transform_indices = @transform_22, window_bounds = array<i64: 1, 8, 128>}, {transform_indices = @transform_23, window_bounds = array<i64: 1, 4, 8, 8>}, {transform_indices = @transform_24, window_bounds = array<i64: 1, 4, 8, 8>}]} {
    %c0_i32 = arith.constant 0 : i32
    %0 = arith.cmpi eq, %arg1, %c0_i32 : i32
    %1 = arith.extui %0 : i1 to i32
    %c0_i32_0 = arith.constant 0 : i32
    %2 = arith.cmpi ne, %1, %c0_i32_0 : i32
    scf.if %2 {
      %c0_163 = arith.constant 0 : index
      %c0_164 = arith.constant 0 : index
      %c0_165 = arith.constant 0 : index
      %343 = vector.load %arg2[%c0_163, %c0_164, %c0_165] : memref<1x8x32xf32, #tpu.memory_space<vmem>>, vector<1x8x32xf32>
      %344 = vector.shape_cast %343 : vector<1x8x32xf32> to vector<8x32xf32>
      %c0_166 = arith.constant 0 : index
      %c0_167 = arith.constant 0 : index
      %345 = vector.load %arg27[%c0_166, %c0_167] : memref<8x32xf32, #tpu.memory_space<vmem>>, vector<8x32xf32>
      tpu.vector_store %arg27[%c0_166, %c0_167], %344 {strides = array<i32>} : memref<8x32xf32, #tpu.memory_space<vmem>>, vector<8x32xf32>,
    } else {
    }
    %c0 = arith.constant 0 : index
    %c0_1 = arith.constant 0 : index
    %3 = vector.load %arg27[%c0, %c0_1] : memref<8x32xf32, #tpu.memory_space<vmem>>, vector<8x32xf32>
    %c0_2 = arith.constant 0 : index
    %c0_3 = arith.constant 0 : index
    %c0_4 = arith.constant 0 : index
    %4 = vector.load %arg3[%c0_2, %c0_3, %c0_4] : memref<1x8x32xf32, #tpu.memory_space<vmem>>, vector<1x8x32xf32>
    %5 = vector.shape_cast %4 : vector<1x8x32xf32> to vector<8x32xf32>
    %c0_5 = arith.constant 0 : index
    %c0_6 = arith.constant 0 : index
    %c0_7 = arith.constant 0 : index
    %c0_8 = arith.constant 0 : index
    %6 = vector.load %arg4[%c0_5, %c0_6, %c0_7, %c0_8] : memref<1x1x8x8xf32, #tpu.memory_space<vmem>>, vector<1x1x8x8xf32>
    %7 = vector.shape_cast %6 : vector<1x1x8x8xf32> to vector<8x8xf32>
    %cst = arith.constant -1.000000e+09 : f32
    %8 = vector.broadcast %cst : f32 to vector<8x8xf32>
    %9 = arith.mulf %7, %8 : vector<8x8xf32>
    %c0_9 = arith.constant 0 : index
    %c0_10 = arith.constant 0 : index
    %c0_11 = arith.constant 0 : index
    %c0_12 = arith.constant 0 : index
    %10 = vector.load %arg5[%c0_9, %c0_10, %c0_11, %c0_12] : memref<1x1x8x8xf32, #tpu.memory_space<vmem>>, vector<1x1x8x8xf32>
    %11 = vector.shape_cast %10 : vector<1x1x8x8xf32> to vector<8x8xf32>
    %cst_13 = arith.constant -1.000000e+09 : f32
    %12 = vector.broadcast %cst_13 : f32 to vector<8x8xf32>
    %13 = arith.mulf %11, %12 : vector<8x8xf32>
    %c0_14 = arith.constant 0 : index
    %c0_15 = arith.constant 0 : index
    %c0_16 = arith.constant 0 : index
    %14 = vector.load %arg20[%c0_14, %c0_15, %c0_16] : memref<1x3x32xf32, #tpu.memory_space<vmem>>, vector<1x3x32xf32>
    %15 = vector.shape_cast %14 : vector<1x3x32xf32> to vector<3x32xf32>
    %c0_17 = arith.constant 0 : index
    %c0_18 = arith.constant 0 : index
    %c0_19 = arith.constant 0 : index
    %16 = vector.load %arg21[%c0_17, %c0_18, %c0_19] : memref<1x3x32xf32, #tpu.memory_space<vmem>>, vector<1x3x32xf32>
    %17 = vector.shape_cast %16 : vector<1x3x32xf32> to vector<3x32xf32>
    %c0_20 = arith.constant 0 : index
    %c0_21 = arith.constant 0 : index
    %c0_22 = arith.constant 0 : index
    %18 = vector.load %arg6[%c0_20, %c0_21, %c0_22] : memref<1x32x96xf32, #tpu.memory_space<vmem>>, vector<1x32x96xf32>
    %19 = vector.shape_cast %18 : vector<1x32x96xf32> to vector<32x96xf32>
    %cst_23 = arith.constant dense<0.000000e+00> : vector<8x96xf32>
    %20 = tpu.matmul %3, %19, %cst_23 {dimension_numbers = #tpu.dot_dimension_numbers<[1], [0], [0], [1], [0, 0, 1, 1], [], []>} : vector<8x32xf32>, vector<32x96xf32>, vector<8x96xf32> -> vector<8x96xf32>
    %c0_24 = arith.constant 0 : index
    %c0_25 = arith.constant 0 : index
    %c0_26 = arith.constant 0 : index
    %21 = vector.load %arg7[%c0_24, %c0_25, %c0_26] : memref<1x1x96xf32, #tpu.memory_space<vmem>>, vector<1x1x96xf32>
    %22 = vector.shape_cast %21 : vector<1x1x96xf32> to vector<1x96xf32>
    %23 = vector.broadcast %22 : vector<1x96xf32> to vector<8x96xf32>
    %24 = arith.addf %20, %23 : vector<8x96xf32>
    %25 = vector.extract_strided_slice %24 {offsets = [0, 0], sizes = [8, 32], strides = [1, 1]} : vector<8x96xf32> to vector<8x32xf32>
    %26 = vector.extract_strided_slice %24 {offsets = [0, 32], sizes = [8, 32], strides = [1, 1]} : vector<8x96xf32> to vector<8x32xf32>
    %27 = vector.extract_strided_slice %24 {offsets = [0, 64], sizes = [8, 32], strides = [1, 1]} : vector<8x96xf32> to vector<8x32xf32>
    %c0_27 = arith.constant 0 : index
    %c0_28 = arith.constant 0 : index
    %c0_29 = arith.constant 0 : index
    %28 = vector.load %arg8[%c0_27, %c0_28, %c0_29] : memref<1x32x32xf32, #tpu.memory_space<vmem>>, vector<1x32x32xf32>
    %29 = vector.shape_cast %28 : vector<1x32x32xf32> to vector<32x32xf32>
    %c0_30 = arith.constant 0 : index
    %c0_31 = arith.constant 0 : index
    %c0_32 = arith.constant 0 : index
    %30 = vector.load %arg9[%c0_30, %c0_31, %c0_32] : memref<1x1x32xf32, #tpu.memory_space<vmem>>, vector<1x1x32xf32>
    %31 = vector.shape_cast %30 : vector<1x1x32xf32> to vector<1x32xf32>
    %32 = vector.shape_cast %31 : vector<1x32xf32> to vector<1x32xf32>
    %33 = vector.broadcast %32 : vector<1x32xf32> to vector<8x32xf32>
    %34 = vector.extract_strided_slice %25 {offsets = [0, 0], sizes = [8, 8], strides = [1, 1]} : vector<8x32xf32> to vector<8x8xf32>
    %35 = vector.extract_strided_slice %26 {offsets = [0, 0], sizes = [8, 8], strides = [1, 1]} : vector<8x32xf32> to vector<8x8xf32>
    %36 = vector.extract_strided_slice %27 {offsets = [0, 0], sizes = [8, 8], strides = [1, 1]} : vector<8x32xf32> to vector<8x8xf32>
    %cst_33 = arith.constant dense<0.000000e+00> : vector<8x8xf32>
    %37 = tpu.matmul %34, %35, %cst_33 {dimension_numbers = #tpu.dot_dimension_numbers<[1], [1], [0], [0], [0, 0, 1, 0], [], []>} : vector<8x8xf32>, vector<8x8xf32>, vector<8x8xf32> -> vector<8x8xf32>
    %cst_34 = arith.constant 0.353553385 : f32
    %38 = vector.broadcast %cst_34 : f32 to vector<8x8xf32>
    %39 = arith.mulf %37, %38 : vector<8x8xf32>
    %40 = arith.addf %39, %9 : vector<8x8xf32>
    %cst_35 = arith.constant dense<0xFF800000> : vector<8xf32>
    %41 = vector.multi_reduction <maximumf>, %40, %cst_35 [1] : vector<8x8xf32> to vector<8xf32>
    %42 = vector.shape_cast %41 : vector<8xf32> to vector<8x1xf32>
    %43 = vector.broadcast %42 : vector<8x1xf32> to vector<8x8xf32>
    %44 = arith.subf %40, %43 : vector<8x8xf32>
    %45 = math.exp %44 : vector<8x8xf32>
    %cst_36 = arith.constant dense<0.000000e+00> : vector<8xf32>
    %46 = vector.multi_reduction <add>, %45, %cst_36 [1] : vector<8x8xf32> to vector<8xf32>
    %47 = vector.shape_cast %46 : vector<8xf32> to vector<8x1xf32>
    %48 = tpu.reciprocal %47 {approx = true} : vector<8x1xf32> -> vector<8x1xf32>
    %49 = vector.broadcast %48 : vector<8x1xf32> to vector<8x8xf32>
    %50 = arith.mulf %45, %49 : vector<8x8xf32>
    %c0_37 = arith.constant 0 : index
    %c0_38 = arith.constant 0 : index
    %c0_39 = arith.constant 0 : index
    %c0_40 = arith.constant 0 : index
    %51 = vector.load %arg25[%c0_37, %c0_38, %c0_39, %c0_40] : memref<1x4x8x8xf32, #tpu.memory_space<vmem>>, vector<1x1x8x8xf32>
    %52 = vector.shape_cast %51 : vector<1x1x8x8xf32> to vector<8x8xf32>
    %53 = vector.shape_cast %50 : vector<8x8xf32> to vector<1x1x8x8xf32>
    tpu.vector_store %arg25[%c0_37, %c0_38, %c0_39, %c0_40], %53 {strides = array<i32>} : memref<1x4x8x8xf32, #tpu.memory_space<vmem>>, vector<1x1x8x8xf32>,
    %cst_41 = arith.constant dense<0.000000e+00> : vector<8x8xf32>
    %54 = tpu.matmul %50, %36, %cst_41 {dimension_numbers = #tpu.dot_dimension_numbers<[1], [0], [0], [1], [0, 0, 1, 1], [], []>} : vector<8x8xf32>, vector<8x8xf32>, vector<8x8xf32> -> vector<8x8xf32>
    %55 = vector.extract_strided_slice %29 {offsets = [0, 0], sizes = [8, 32], strides = [1, 1]} : vector<32x32xf32> to vector<8x32xf32>
    %cst_42 = arith.constant dense<0.000000e+00> : vector<8x32xf32>
    %56 = tpu.matmul %54, %55, %cst_42 {dimension_numbers = #tpu.dot_dimension_numbers<[1], [0], [0], [1], [0, 0, 1, 1], [], []>} : vector<8x8xf32>, vector<8x32xf32>, vector<8x32xf32> -> vector<8x32xf32>
    %57 = arith.addf %33, %56 : vector<8x32xf32>
    %58 = vector.extract_strided_slice %25 {offsets = [0, 8], sizes = [8, 8], strides = [1, 1]} : vector<8x32xf32> to vector<8x8xf32>
    %59 = vector.extract_strided_slice %26 {offsets = [0, 8], sizes = [8, 8], strides = [1, 1]} : vector<8x32xf32> to vector<8x8xf32>
    %60 = vector.extract_strided_slice %27 {offsets = [0, 8], sizes = [8, 8], strides = [1, 1]} : vector<8x32xf32> to vector<8x8xf32>
    %cst_43 = arith.constant dense<0.000000e+00> : vector<8x8xf32>
    %61 = tpu.matmul %58, %59, %cst_43 {dimension_numbers = #tpu.dot_dimension_numbers<[1], [1], [0], [0], [0, 0, 1, 0], [], []>} : vector<8x8xf32>, vector<8x8xf32>, vector<8x8xf32> -> vector<8x8xf32>
    %cst_44 = arith.constant 0.353553385 : f32
    %62 = vector.broadcast %cst_44 : f32 to vector<8x8xf32>
    %63 = arith.mulf %61, %62 : vector<8x8xf32>
    %64 = arith.addf %63, %9 : vector<8x8xf32>
    %cst_45 = arith.constant dense<0xFF800000> : vector<8xf32>
    %65 = vector.multi_reduction <maximumf>, %64, %cst_45 [1] : vector<8x8xf32> to vector<8xf32>
    %66 = vector.shape_cast %65 : vector<8xf32> to vector<8x1xf32>
    %67 = vector.broadcast %66 : vector<8x1xf32> to vector<8x8xf32>
    %68 = arith.subf %64, %67 : vector<8x8xf32>
    %69 = math.exp %68 : vector<8x8xf32>
    %cst_46 = arith.constant dense<0.000000e+00> : vector<8xf32>
    %70 = vector.multi_reduction <add>, %69, %cst_46 [1] : vector<8x8xf32> to vector<8xf32>
    %71 = vector.shape_cast %70 : vector<8xf32> to vector<8x1xf32>
    %72 = tpu.reciprocal %71 {approx = true} : vector<8x1xf32> -> vector<8x1xf32>
    %73 = vector.broadcast %72 : vector<8x1xf32> to vector<8x8xf32>
    %74 = arith.mulf %69, %73 : vector<8x8xf32>
    %c0_47 = arith.constant 0 : index
    %c1 = arith.constant 1 : index
    %c0_48 = arith.constant 0 : index
    %c0_49 = arith.constant 0 : index
    %75 = vector.load %arg25[%c0_47, %c1, %c0_48, %c0_49] : memref<1x4x8x8xf32, #tpu.memory_space<vmem>>, vector<1x1x8x8xf32>
    %76 = vector.shape_cast %75 : vector<1x1x8x8xf32> to vector<8x8xf32>
    %77 = vector.shape_cast %74 : vector<8x8xf32> to vector<1x1x8x8xf32>
    tpu.vector_store %arg25[%c0_47, %c1, %c0_48, %c0_49], %77 {strides = array<i32>} : memref<1x4x8x8xf32, #tpu.memory_space<vmem>>, vector<1x1x8x8xf32>,
    %cst_50 = arith.constant dense<0.000000e+00> : vector<8x8xf32>
    %78 = tpu.matmul %74, %60, %cst_50 {dimension_numbers = #tpu.dot_dimension_numbers<[1], [0], [0], [1], [0, 0, 1, 1], [], []>} : vector<8x8xf32>, vector<8x8xf32>, vector<8x8xf32> -> vector<8x8xf32>
    %79 = vector.extract_strided_slice %29 {offsets = [8, 0], sizes = [8, 32], strides = [1, 1]} : vector<32x32xf32> to vector<8x32xf32>
    %cst_51 = arith.constant dense<0.000000e+00> : vector<8x32xf32>
    %80 = tpu.matmul %78, %79, %cst_51 {dimension_numbers = #tpu.dot_dimension_numbers<[1], [0], [0], [1], [0, 0, 1, 1], [], []>} : vector<8x8xf32>, vector<8x32xf32>, vector<8x32xf32> -> vector<8x32xf32>
    %81 = arith.addf %57, %80 : vector<8x32xf32>
    %82 = vector.extract_strided_slice %25 {offsets = [0, 16], sizes = [8, 8], strides = [1, 1]} : vector<8x32xf32> to vector<8x8xf32>
    %83 = vector.extract_strided_slice %26 {offsets = [0, 16], sizes = [8, 8], strides = [1, 1]} : vector<8x32xf32> to vector<8x8xf32>
    %84 = vector.extract_strided_slice %27 {offsets = [0, 16], sizes = [8, 8], strides = [1, 1]} : vector<8x32xf32> to vector<8x8xf32>
    %cst_52 = arith.constant dense<0.000000e+00> : vector<8x8xf32>
    %85 = tpu.matmul %82, %83, %cst_52 {dimension_numbers = #tpu.dot_dimension_numbers<[1], [1], [0], [0], [0, 0, 1, 0], [], []>} : vector<8x8xf32>, vector<8x8xf32>, vector<8x8xf32> -> vector<8x8xf32>
    %cst_53 = arith.constant 0.353553385 : f32
    %86 = vector.broadcast %cst_53 : f32 to vector<8x8xf32>
    %87 = arith.mulf %85, %86 : vector<8x8xf32>
    %88 = arith.addf %87, %9 : vector<8x8xf32>
    %cst_54 = arith.constant dense<0xFF800000> : vector<8xf32>
    %89 = vector.multi_reduction <maximumf>, %88, %cst_54 [1] : vector<8x8xf32> to vector<8xf32>
    %90 = vector.shape_cast %89 : vector<8xf32> to vector<8x1xf32>
    %91 = vector.broadcast %90 : vector<8x1xf32> to vector<8x8xf32>
    %92 = arith.subf %88, %91 : vector<8x8xf32>
    %93 = math.exp %92 : vector<8x8xf32>
    %cst_55 = arith.constant dense<0.000000e+00> : vector<8xf32>
    %94 = vector.multi_reduction <add>, %93, %cst_55 [1] : vector<8x8xf32> to vector<8xf32>
    %95 = vector.shape_cast %94 : vector<8xf32> to vector<8x1xf32>
    %96 = tpu.reciprocal %95 {approx = true} : vector<8x1xf32> -> vector<8x1xf32>
    %97 = vector.broadcast %96 : vector<8x1xf32> to vector<8x8xf32>
    %98 = arith.mulf %93, %97 : vector<8x8xf32>
    %c0_56 = arith.constant 0 : index
    %c2 = arith.constant 2 : index
    %c0_57 = arith.constant 0 : index
    %c0_58 = arith.constant 0 : index
    %99 = vector.load %arg25[%c0_56, %c2, %c0_57, %c0_58] : memref<1x4x8x8xf32, #tpu.memory_space<vmem>>, vector<1x1x8x8xf32>
    %100 = vector.shape_cast %99 : vector<1x1x8x8xf32> to vector<8x8xf32>
    %101 = vector.shape_cast %98 : vector<8x8xf32> to vector<1x1x8x8xf32>
    tpu.vector_store %arg25[%c0_56, %c2, %c0_57, %c0_58], %101 {strides = array<i32>} : memref<1x4x8x8xf32, #tpu.memory_space<vmem>>, vector<1x1x8x8xf32>,
    %cst_59 = arith.constant dense<0.000000e+00> : vector<8x8xf32>
    %102 = tpu.matmul %98, %84, %cst_59 {dimension_numbers = #tpu.dot_dimension_numbers<[1], [0], [0], [1], [0, 0, 1, 1], [], []>} : vector<8x8xf32>, vector<8x8xf32>, vector<8x8xf32> -> vector<8x8xf32>
    %103 = vector.extract_strided_slice %29 {offsets = [16, 0], sizes = [8, 32], strides = [1, 1]} : vector<32x32xf32> to vector<8x32xf32>
    %cst_60 = arith.constant dense<0.000000e+00> : vector<8x32xf32>
    %104 = tpu.matmul %102, %103, %cst_60 {dimension_numbers = #tpu.dot_dimension_numbers<[1], [0], [0], [1], [0, 0, 1, 1], [], []>} : vector<8x8xf32>, vector<8x32xf32>, vector<8x32xf32> -> vector<8x32xf32>
    %105 = arith.addf %81, %104 : vector<8x32xf32>
    %106 = vector.extract_strided_slice %25 {offsets = [0, 24], sizes = [8, 8], strides = [1, 1]} : vector<8x32xf32> to vector<8x8xf32>
    %107 = vector.extract_strided_slice %26 {offsets = [0, 24], sizes = [8, 8], strides = [1, 1]} : vector<8x32xf32> to vector<8x8xf32>
    %108 = vector.extract_strided_slice %27 {offsets = [0, 24], sizes = [8, 8], strides = [1, 1]} : vector<8x32xf32> to vector<8x8xf32>
    %cst_61 = arith.constant dense<0.000000e+00> : vector<8x8xf32>
    %109 = tpu.matmul %106, %107, %cst_61 {dimension_numbers = #tpu.dot_dimension_numbers<[1], [1], [0], [0], [0, 0, 1, 0], [], []>} : vector<8x8xf32>, vector<8x8xf32>, vector<8x8xf32> -> vector<8x8xf32>
    %cst_62 = arith.constant 0.353553385 : f32
    %110 = vector.broadcast %cst_62 : f32 to vector<8x8xf32>
    %111 = arith.mulf %109, %110 : vector<8x8xf32>
    %112 = arith.addf %111, %9 : vector<8x8xf32>
    %cst_63 = arith.constant dense<0xFF800000> : vector<8xf32>
    %113 = vector.multi_reduction <maximumf>, %112, %cst_63 [1] : vector<8x8xf32> to vector<8xf32>
    %114 = vector.shape_cast %113 : vector<8xf32> to vector<8x1xf32>
    %115 = vector.broadcast %114 : vector<8x1xf32> to vector<8x8xf32>
    %116 = arith.subf %112, %115 : vector<8x8xf32>
    %117 = math.exp %116 : vector<8x8xf32>
    %cst_64 = arith.constant dense<0.000000e+00> : vector<8xf32>
    %118 = vector.multi_reduction <add>, %117, %cst_64 [1] : vector<8x8xf32> to vector<8xf32>
    %119 = vector.shape_cast %118 : vector<8xf32> to vector<8x1xf32>
    %120 = tpu.reciprocal %119 {approx = true} : vector<8x1xf32> -> vector<8x1xf32>
    %121 = vector.broadcast %120 : vector<8x1xf32> to vector<8x8xf32>
    %122 = arith.mulf %117, %121 : vector<8x8xf32>
    %c0_65 = arith.constant 0 : index
    %c3 = arith.constant 3 : index
    %c0_66 = arith.constant 0 : index
    %c0_67 = arith.constant 0 : index
    %123 = vector.load %arg25[%c0_65, %c3, %c0_66, %c0_67] : memref<1x4x8x8xf32, #tpu.memory_space<vmem>>, vector<1x1x8x8xf32>
    %124 = vector.shape_cast %123 : vector<1x1x8x8xf32> to vector<8x8xf32>
    %125 = vector.shape_cast %122 : vector<8x8xf32> to vector<1x1x8x8xf32>
    tpu.vector_store %arg25[%c0_65, %c3, %c0_66, %c0_67], %125 {strides = array<i32>} : memref<1x4x8x8xf32, #tpu.memory_space<vmem>>, vector<1x1x8x8xf32>,
    %cst_68 = arith.constant dense<0.000000e+00> : vector<8x8xf32>
    %126 = tpu.matmul %122, %108, %cst_68 {dimension_numbers = #tpu.dot_dimension_numbers<[1], [0], [0], [1], [0, 0, 1, 1], [], []>} : vector<8x8xf32>, vector<8x8xf32>, vector<8x8xf32> -> vector<8x8xf32>
    %127 = vector.extract_strided_slice %29 {offsets = [24, 0], sizes = [8, 32], strides = [1, 1]} : vector<32x32xf32> to vector<8x32xf32>
    %cst_69 = arith.constant dense<0.000000e+00> : vector<8x32xf32>
    %128 = tpu.matmul %126, %127, %cst_69 {dimension_numbers = #tpu.dot_dimension_numbers<[1], [0], [0], [1], [0, 0, 1, 1], [], []>} : vector<8x8xf32>, vector<8x32xf32>, vector<8x32xf32> -> vector<8x32xf32>
    %129 = arith.addf %105, %128 : vector<8x32xf32>
    %130 = arith.addf %3, %129 : vector<8x32xf32>
    %131 = vector.extract_strided_slice %15 {offsets = [0, 0], sizes = [1, 32], strides = [1, 1]} : vector<3x32xf32> to vector<1x32xf32>
    %132 = vector.extract_strided_slice %17 {offsets = [0, 0], sizes = [1, 32], strides = [1, 1]} : vector<3x32xf32> to vector<1x32xf32>
    %cst_70 = arith.constant dense<0.000000e+00> : vector<8xf32>
    %133 = vector.multi_reduction <add>, %130, %cst_70 [1] : vector<8x32xf32> to vector<8xf32>
    %134 = vector.shape_cast %133 : vector<8xf32> to vector<8x1xf32>
    %cst_71 = arith.constant 3.200000e+01 : f32
    %135 = vector.broadcast %cst_71 : f32 to vector<8x1xf32>
    %136 = arith.divf %134, %135 : vector<8x1xf32>
    %137 = vector.broadcast %136 : vector<8x1xf32> to vector<8x32xf32>
    %138 = arith.subf %130, %137 : vector<8x32xf32>
    %139 = arith.mulf %138, %138 : vector<8x32xf32>
    %cst_72 = arith.constant dense<0.000000e+00> : vector<8xf32>
    %140 = vector.multi_reduction <add>, %139, %cst_72 [1] : vector<8x32xf32> to vector<8xf32>
    %141 = vector.shape_cast %140 : vector<8xf32> to vector<8x1xf32>
    %cst_73 = arith.constant 3.200000e+01 : f32
    %142 = vector.broadcast %cst_73 : f32 to vector<8x1xf32>
    %143 = arith.divf %141, %142 : vector<8x1xf32>
    %144 = vector.broadcast %136 : vector<8x1xf32> to vector<8x32xf32>
    %145 = arith.subf %130, %144 : vector<8x32xf32>
    %146 = vector.broadcast %131 : vector<1x32xf32> to vector<8x32xf32>
    %147 = arith.mulf %146, %145 : vector<8x32xf32>
    %cst_74 = arith.constant 9.99999997E-7 : f32
    %148 = vector.broadcast %cst_74 : f32 to vector<8x1xf32>
    %149 = arith.addf %143, %148 : vector<8x1xf32>
    %150 = math.rsqrt %149 : vector<8x1xf32>
    %151 = vector.broadcast %150 : vector<8x1xf32> to vector<8x32xf32>
    %152 = arith.mulf %147, %151 : vector<8x32xf32>
    %153 = vector.broadcast %132 : vector<1x32xf32> to vector<8x32xf32>
    %154 = arith.addf %152, %153 : vector<8x32xf32>
    %c0_75 = arith.constant 0 : index
    %c0_76 = arith.constant 0 : index
    %c0_77 = arith.constant 0 : index
    %155 = vector.load %arg10[%c0_75, %c0_76, %c0_77] : memref<1x32x32xf32, #tpu.memory_space<vmem>>, vector<1x32x32xf32>
    %156 = vector.shape_cast %155 : vector<1x32x32xf32> to vector<32x32xf32>
    %cst_78 = arith.constant dense<0.000000e+00> : vector<8x32xf32>
    %157 = tpu.matmul %154, %156, %cst_78 {dimension_numbers = #tpu.dot_dimension_numbers<[1], [0], [0], [1], [0, 0, 1, 1], [], []>} : vector<8x32xf32>, vector<32x32xf32>, vector<8x32xf32> -> vector<8x32xf32>
    %c0_79 = arith.constant 0 : index
    %c0_80 = arith.constant 0 : index
    %c0_81 = arith.constant 0 : index
    %158 = vector.load %arg11[%c0_79, %c0_80, %c0_81] : memref<1x1x32xf32, #tpu.memory_space<vmem>>, vector<1x1x32xf32>
    %159 = vector.shape_cast %158 : vector<1x1x32xf32> to vector<1x32xf32>
    %160 = vector.broadcast %159 : vector<1x32xf32> to vector<8x32xf32>
    %161 = arith.addf %157, %160 : vector<8x32xf32>
    %c0_82 = arith.constant 0 : index
    %c0_83 = arith.constant 0 : index
    %c0_84 = arith.constant 0 : index
    %162 = vector.load %arg12[%c0_82, %c0_83, %c0_84] : memref<1x32x64xf32, #tpu.memory_space<vmem>>, vector<1x32x64xf32>
    %163 = vector.shape_cast %162 : vector<1x32x64xf32> to vector<32x64xf32>
    %cst_85 = arith.constant dense<0.000000e+00> : vector<8x64xf32>
    %164 = tpu.matmul %5, %163, %cst_85 {dimension_numbers = #tpu.dot_dimension_numbers<[1], [0], [0], [1], [0, 0, 1, 1], [], []>} : vector<8x32xf32>, vector<32x64xf32>, vector<8x64xf32> -> vector<8x64xf32>
    %c0_86 = arith.constant 0 : index
    %c0_87 = arith.constant 0 : index
    %c0_88 = arith.constant 0 : index
    %165 = vector.load %arg13[%c0_86, %c0_87, %c0_88] : memref<1x1x64xf32, #tpu.memory_space<vmem>>, vector<1x1x64xf32>
    %166 = vector.shape_cast %165 : vector<1x1x64xf32> to vector<1x64xf32>
    %167 = vector.broadcast %166 : vector<1x64xf32> to vector<8x64xf32>
    %168 = arith.addf %164, %167 : vector<8x64xf32>
    %169 = vector.extract_strided_slice %168 {offsets = [0, 0], sizes = [8, 32], strides = [1, 1]} : vector<8x64xf32> to vector<8x32xf32>
    %170 = vector.extract_strided_slice %168 {offsets = [0, 32], sizes = [8, 32], strides = [1, 1]} : vector<8x64xf32> to vector<8x32xf32>
    %c0_89 = arith.constant 0 : index
    %c0_90 = arith.constant 0 : index
    %c0_91 = arith.constant 0 : index
    %171 = vector.load %arg14[%c0_89, %c0_90, %c0_91] : memref<1x32x32xf32, #tpu.memory_space<vmem>>, vector<1x32x32xf32>
    %172 = vector.shape_cast %171 : vector<1x32x32xf32> to vector<32x32xf32>
    %c0_92 = arith.constant 0 : index
    %c0_93 = arith.constant 0 : index
    %c0_94 = arith.constant 0 : index
    %173 = vector.load %arg15[%c0_92, %c0_93, %c0_94] : memref<1x1x32xf32, #tpu.memory_space<vmem>>, vector<1x1x32xf32>
    %174 = vector.shape_cast %173 : vector<1x1x32xf32> to vector<1x32xf32>
    %175 = vector.shape_cast %174 : vector<1x32xf32> to vector<1x32xf32>
    %176 = vector.broadcast %175 : vector<1x32xf32> to vector<8x32xf32>
    %177 = vector.extract_strided_slice %161 {offsets = [0, 0], sizes = [8, 8], strides = [1, 1]} : vector<8x32xf32> to vector<8x8xf32>
    %178 = vector.extract_strided_slice %169 {offsets = [0, 0], sizes = [8, 8], strides = [1, 1]} : vector<8x32xf32> to vector<8x8xf32>
    %179 = vector.extract_strided_slice %170 {offsets = [0, 0], sizes = [8, 8], strides = [1, 1]} : vector<8x32xf32> to vector<8x8xf32>
    %cst_95 = arith.constant dense<0.000000e+00> : vector<8x8xf32>
    %180 = tpu.matmul %177, %178, %cst_95 {dimension_numbers = #tpu.dot_dimension_numbers<[1], [1], [0], [0], [0, 0, 1, 0], [], []>} : vector<8x8xf32>, vector<8x8xf32>, vector<8x8xf32> -> vector<8x8xf32>
    %cst_96 = arith.constant 0.353553385 : f32
    %181 = vector.broadcast %cst_96 : f32 to vector<8x8xf32>
    %182 = arith.mulf %180, %181 : vector<8x8xf32>
    %183 = arith.addf %182, %13 : vector<8x8xf32>
    %cst_97 = arith.constant dense<0xFF800000> : vector<8xf32>
    %184 = vector.multi_reduction <maximumf>, %183, %cst_97 [1] : vector<8x8xf32> to vector<8xf32>
    %185 = vector.shape_cast %184 : vector<8xf32> to vector<8x1xf32>
    %186 = vector.broadcast %185 : vector<8x1xf32> to vector<8x8xf32>
    %187 = arith.subf %183, %186 : vector<8x8xf32>
    %188 = math.exp %187 : vector<8x8xf32>
    %cst_98 = arith.constant dense<0.000000e+00> : vector<8xf32>
    %189 = vector.multi_reduction <add>, %188, %cst_98 [1] : vector<8x8xf32> to vector<8xf32>
    %190 = vector.shape_cast %189 : vector<8xf32> to vector<8x1xf32>
    %191 = tpu.reciprocal %190 {approx = true} : vector<8x1xf32> -> vector<8x1xf32>
    %192 = vector.broadcast %191 : vector<8x1xf32> to vector<8x8xf32>
    %193 = arith.mulf %188, %192 : vector<8x8xf32>
    %c0_99 = arith.constant 0 : index
    %c0_100 = arith.constant 0 : index
    %c0_101 = arith.constant 0 : index
    %c0_102 = arith.constant 0 : index
    %194 = vector.load %arg26[%c0_99, %c0_100, %c0_101, %c0_102] : memref<1x4x8x8xf32, #tpu.memory_space<vmem>>, vector<1x1x8x8xf32>
    %195 = vector.shape_cast %194 : vector<1x1x8x8xf32> to vector<8x8xf32>
    %196 = vector.shape_cast %193 : vector<8x8xf32> to vector<1x1x8x8xf32>
    tpu.vector_store %arg26[%c0_99, %c0_100, %c0_101, %c0_102], %196 {strides = array<i32>} : memref<1x4x8x8xf32, #tpu.memory_space<vmem>>, vector<1x1x8x8xf32>,
    %cst_103 = arith.constant dense<0.000000e+00> : vector<8x8xf32>
    %197 = tpu.matmul %193, %179, %cst_103 {dimension_numbers = #tpu.dot_dimension_numbers<[1], [0], [0], [1], [0, 0, 1, 1], [], []>} : vector<8x8xf32>, vector<8x8xf32>, vector<8x8xf32> -> vector<8x8xf32>
    %198 = vector.extract_strided_slice %172 {offsets = [0, 0], sizes = [8, 32], strides = [1, 1]} : vector<32x32xf32> to vector<8x32xf32>
    %cst_104 = arith.constant dense<0.000000e+00> : vector<8x32xf32>
    %199 = tpu.matmul %197, %198, %cst_104 {dimension_numbers = #tpu.dot_dimension_numbers<[1], [0], [0], [1], [0, 0, 1, 1], [], []>} : vector<8x8xf32>, vector<8x32xf32>, vector<8x32xf32> -> vector<8x32xf32>
    %200 = arith.addf %176, %199 : vector<8x32xf32>
    %201 = vector.extract_strided_slice %161 {offsets = [0, 8], sizes = [8, 8], strides = [1, 1]} : vector<8x32xf32> to vector<8x8xf32>
    %202 = vector.extract_strided_slice %169 {offsets = [0, 8], sizes = [8, 8], strides = [1, 1]} : vector<8x32xf32> to vector<8x8xf32>
    %203 = vector.extract_strided_slice %170 {offsets = [0, 8], sizes = [8, 8], strides = [1, 1]} : vector<8x32xf32> to vector<8x8xf32>
    %cst_105 = arith.constant dense<0.000000e+00> : vector<8x8xf32>
    %204 = tpu.matmul %201, %202, %cst_105 {dimension_numbers = #tpu.dot_dimension_numbers<[1], [1], [0], [0], [0, 0, 1, 0], [], []>} : vector<8x8xf32>, vector<8x8xf32>, vector<8x8xf32> -> vector<8x8xf32>
    %cst_106 = arith.constant 0.353553385 : f32
    %205 = vector.broadcast %cst_106 : f32 to vector<8x8xf32>
    %206 = arith.mulf %204, %205 : vector<8x8xf32>
    %207 = arith.addf %206, %13 : vector<8x8xf32>
    %cst_107 = arith.constant dense<0xFF800000> : vector<8xf32>
    %208 = vector.multi_reduction <maximumf>, %207, %cst_107 [1] : vector<8x8xf32> to vector<8xf32>
    %209 = vector.shape_cast %208 : vector<8xf32> to vector<8x1xf32>
    %210 = vector.broadcast %209 : vector<8x1xf32> to vector<8x8xf32>
    %211 = arith.subf %207, %210 : vector<8x8xf32>
    %212 = math.exp %211 : vector<8x8xf32>
    %cst_108 = arith.constant dense<0.000000e+00> : vector<8xf32>
    %213 = vector.multi_reduction <add>, %212, %cst_108 [1] : vector<8x8xf32> to vector<8xf32>
    %214 = vector.shape_cast %213 : vector<8xf32> to vector<8x1xf32>
    %215 = tpu.reciprocal %214 {approx = true} : vector<8x1xf32> -> vector<8x1xf32>
    %216 = vector.broadcast %215 : vector<8x1xf32> to vector<8x8xf32>
    %217 = arith.mulf %212, %216 : vector<8x8xf32>
    %c0_109 = arith.constant 0 : index
    %c1_110 = arith.constant 1 : index
    %c0_111 = arith.constant 0 : index
    %c0_112 = arith.constant 0 : index
    %218 = vector.load %arg26[%c0_109, %c1_110, %c0_111, %c0_112] : memref<1x4x8x8xf32, #tpu.memory_space<vmem>>, vector<1x1x8x8xf32>
    %219 = vector.shape_cast %218 : vector<1x1x8x8xf32> to vector<8x8xf32>
    %220 = vector.shape_cast %217 : vector<8x8xf32> to vector<1x1x8x8xf32>
    tpu.vector_store %arg26[%c0_109, %c1_110, %c0_111, %c0_112], %220 {strides = array<i32>} : memref<1x4x8x8xf32, #tpu.memory_space<vmem>>, vector<1x1x8x8xf32>,
    %cst_113 = arith.constant dense<0.000000e+00> : vector<8x8xf32>
    %221 = tpu.matmul %217, %203, %cst_113 {dimension_numbers = #tpu.dot_dimension_numbers<[1], [0], [0], [1], [0, 0, 1, 1], [], []>} : vector<8x8xf32>, vector<8x8xf32>, vector<8x8xf32> -> vector<8x8xf32>
    %222 = vector.extract_strided_slice %172 {offsets = [8, 0], sizes = [8, 32], strides = [1, 1]} : vector<32x32xf32> to vector<8x32xf32>
    %cst_114 = arith.constant dense<0.000000e+00> : vector<8x32xf32>
    %223 = tpu.matmul %221, %222, %cst_114 {dimension_numbers = #tpu.dot_dimension_numbers<[1], [0], [0], [1], [0, 0, 1, 1], [], []>} : vector<8x8xf32>, vector<8x32xf32>, vector<8x32xf32> -> vector<8x32xf32>
    %224 = arith.addf %200, %223 : vector<8x32xf32>
    %225 = vector.extract_strided_slice %161 {offsets = [0, 16], sizes = [8, 8], strides = [1, 1]} : vector<8x32xf32> to vector<8x8xf32>
    %226 = vector.extract_strided_slice %169 {offsets = [0, 16], sizes = [8, 8], strides = [1, 1]} : vector<8x32xf32> to vector<8x8xf32>
    %227 = vector.extract_strided_slice %170 {offsets = [0, 16], sizes = [8, 8], strides = [1, 1]} : vector<8x32xf32> to vector<8x8xf32>
    %cst_115 = arith.constant dense<0.000000e+00> : vector<8x8xf32>
    %228 = tpu.matmul %225, %226, %cst_115 {dimension_numbers = #tpu.dot_dimension_numbers<[1], [1], [0], [0], [0, 0, 1, 0], [], []>} : vector<8x8xf32>, vector<8x8xf32>, vector<8x8xf32> -> vector<8x8xf32>
    %cst_116 = arith.constant 0.353553385 : f32
    %229 = vector.broadcast %cst_116 : f32 to vector<8x8xf32>
    %230 = arith.mulf %228, %229 : vector<8x8xf32>
    %231 = arith.addf %230, %13 : vector<8x8xf32>
    %cst_117 = arith.constant dense<0xFF800000> : vector<8xf32>
    %232 = vector.multi_reduction <maximumf>, %231, %cst_117 [1] : vector<8x8xf32> to vector<8xf32>
    %233 = vector.shape_cast %232 : vector<8xf32> to vector<8x1xf32>
    %234 = vector.broadcast %233 : vector<8x1xf32> to vector<8x8xf32>
    %235 = arith.subf %231, %234 : vector<8x8xf32>
    %236 = math.exp %235 : vector<8x8xf32>
    %cst_118 = arith.constant dense<0.000000e+00> : vector<8xf32>
    %237 = vector.multi_reduction <add>, %236, %cst_118 [1] : vector<8x8xf32> to vector<8xf32>
    %238 = vector.shape_cast %237 : vector<8xf32> to vector<8x1xf32>
    %239 = tpu.reciprocal %238 {approx = true} : vector<8x1xf32> -> vector<8x1xf32>
    %240 = vector.broadcast %239 : vector<8x1xf32> to vector<8x8xf32>
    %241 = arith.mulf %236, %240 : vector<8x8xf32>
    %c0_119 = arith.constant 0 : index
    %c2_120 = arith.constant 2 : index
    %c0_121 = arith.constant 0 : index
    %c0_122 = arith.constant 0 : index
    %242 = vector.load %arg26[%c0_119, %c2_120, %c0_121, %c0_122] : memref<1x4x8x8xf32, #tpu.memory_space<vmem>>, vector<1x1x8x8xf32>
    %243 = vector.shape_cast %242 : vector<1x1x8x8xf32> to vector<8x8xf32>
    %244 = vector.shape_cast %241 : vector<8x8xf32> to vector<1x1x8x8xf32>
    tpu.vector_store %arg26[%c0_119, %c2_120, %c0_121, %c0_122], %244 {strides = array<i32>} : memref<1x4x8x8xf32, #tpu.memory_space<vmem>>, vector<1x1x8x8xf32>,
    %cst_123 = arith.constant dense<0.000000e+00> : vector<8x8xf32>
    %245 = tpu.matmul %241, %227, %cst_123 {dimension_numbers = #tpu.dot_dimension_numbers<[1], [0], [0], [1], [0, 0, 1, 1], [], []>} : vector<8x8xf32>, vector<8x8xf32>, vector<8x8xf32> -> vector<8x8xf32>
    %246 = vector.extract_strided_slice %172 {offsets = [16, 0], sizes = [8, 32], strides = [1, 1]} : vector<32x32xf32> to vector<8x32xf32>
    %cst_124 = arith.constant dense<0.000000e+00> : vector<8x32xf32>
    %247 = tpu.matmul %245, %246, %cst_124 {dimension_numbers = #tpu.dot_dimension_numbers<[1], [0], [0], [1], [0, 0, 1, 1], [], []>} : vector<8x8xf32>, vector<8x32xf32>, vector<8x32xf32> -> vector<8x32xf32>
    %248 = arith.addf %224, %247 : vector<8x32xf32>
    %249 = vector.extract_strided_slice %161 {offsets = [0, 24], sizes = [8, 8], strides = [1, 1]} : vector<8x32xf32> to vector<8x8xf32>
    %250 = vector.extract_strided_slice %169 {offsets = [0, 24], sizes = [8, 8], strides = [1, 1]} : vector<8x32xf32> to vector<8x8xf32>
    %251 = vector.extract_strided_slice %170 {offsets = [0, 24], sizes = [8, 8], strides = [1, 1]} : vector<8x32xf32> to vector<8x8xf32>
    %cst_125 = arith.constant dense<0.000000e+00> : vector<8x8xf32>
    %252 = tpu.matmul %249, %250, %cst_125 {dimension_numbers = #tpu.dot_dimension_numbers<[1], [1], [0], [0], [0, 0, 1, 0], [], []>} : vector<8x8xf32>, vector<8x8xf32>, vector<8x8xf32> -> vector<8x8xf32>
    %cst_126 = arith.constant 0.353553385 : f32
    %253 = vector.broadcast %cst_126 : f32 to vector<8x8xf32>
    %254 = arith.mulf %252, %253 : vector<8x8xf32>
    %255 = arith.addf %254, %13 : vector<8x8xf32>
    %cst_127 = arith.constant dense<0xFF800000> : vector<8xf32>
    %256 = vector.multi_reduction <maximumf>, %255, %cst_127 [1] : vector<8x8xf32> to vector<8xf32>
    %257 = vector.shape_cast %256 : vector<8xf32> to vector<8x1xf32>
    %258 = vector.broadcast %257 : vector<8x1xf32> to vector<8x8xf32>
    %259 = arith.subf %255, %258 : vector<8x8xf32>
    %260 = math.exp %259 : vector<8x8xf32>
    %cst_128 = arith.constant dense<0.000000e+00> : vector<8xf32>
    %261 = vector.multi_reduction <add>, %260, %cst_128 [1] : vector<8x8xf32> to vector<8xf32>
    %262 = vector.shape_cast %261 : vector<8xf32> to vector<8x1xf32>
    %263 = tpu.reciprocal %262 {approx = true} : vector<8x1xf32> -> vector<8x1xf32>
    %264 = vector.broadcast %263 : vector<8x1xf32> to vector<8x8xf32>
    %265 = arith.mulf %260, %264 : vector<8x8xf32>
    %c0_129 = arith.constant 0 : index
    %c3_130 = arith.constant 3 : index
    %c0_131 = arith.constant 0 : index
    %c0_132 = arith.constant 0 : index
    %266 = vector.load %arg26[%c0_129, %c3_130, %c0_131, %c0_132] : memref<1x4x8x8xf32, #tpu.memory_space<vmem>>, vector<1x1x8x8xf32>
    %267 = vector.shape_cast %266 : vector<1x1x8x8xf32> to vector<8x8xf32>
    %268 = vector.shape_cast %265 : vector<8x8xf32> to vector<1x1x8x8xf32>
    tpu.vector_store %arg26[%c0_129, %c3_130, %c0_131, %c0_132], %268 {strides = array<i32>} : memref<1x4x8x8xf32, #tpu.memory_space<vmem>>, vector<1x1x8x8xf32>,
    %cst_133 = arith.constant dense<0.000000e+00> : vector<8x8xf32>
    %269 = tpu.matmul %265, %251, %cst_133 {dimension_numbers = #tpu.dot_dimension_numbers<[1], [0], [0], [1], [0, 0, 1, 1], [], []>} : vector<8x8xf32>, vector<8x8xf32>, vector<8x8xf32> -> vector<8x8xf32>
    %270 = vector.extract_strided_slice %172 {offsets = [24, 0], sizes = [8, 32], strides = [1, 1]} : vector<32x32xf32> to vector<8x32xf32>
    %cst_134 = arith.constant dense<0.000000e+00> : vector<8x32xf32>
    %271 = tpu.matmul %269, %270, %cst_134 {dimension_numbers = #tpu.dot_dimension_numbers<[1], [0], [0], [1], [0, 0, 1, 1], [], []>} : vector<8x8xf32>, vector<8x32xf32>, vector<8x32xf32> -> vector<8x32xf32>
    %272 = arith.addf %248, %271 : vector<8x32xf32>
    %273 = arith.addf %154, %272 : vector<8x32xf32>
    %274 = vector.extract_strided_slice %15 {offsets = [1, 0], sizes = [1, 32], strides = [1, 1]} : vector<3x32xf32> to vector<1x32xf32>
    %275 = vector.extract_strided_slice %17 {offsets = [1, 0], sizes = [1, 32], strides = [1, 1]} : vector<3x32xf32> to vector<1x32xf32>
    %cst_135 = arith.constant dense<0.000000e+00> : vector<8xf32>
    %276 = vector.multi_reduction <add>, %273, %cst_135 [1] : vector<8x32xf32> to vector<8xf32>
    %277 = vector.shape_cast %276 : vector<8xf32> to vector<8x1xf32>
    %cst_136 = arith.constant 3.200000e+01 : f32
    %278 = vector.broadcast %cst_136 : f32 to vector<8x1xf32>
    %279 = arith.divf %277, %278 : vector<8x1xf32>
    %280 = vector.broadcast %279 : vector<8x1xf32> to vector<8x32xf32>
    %281 = arith.subf %273, %280 : vector<8x32xf32>
    %282 = arith.mulf %281, %281 : vector<8x32xf32>
    %cst_137 = arith.constant dense<0.000000e+00> : vector<8xf32>
    %283 = vector.multi_reduction <add>, %282, %cst_137 [1] : vector<8x32xf32> to vector<8xf32>
    %284 = vector.shape_cast %283 : vector<8xf32> to vector<8x1xf32>
    %cst_138 = arith.constant 3.200000e+01 : f32
    %285 = vector.broadcast %cst_138 : f32 to vector<8x1xf32>
    %286 = arith.divf %284, %285 : vector<8x1xf32>
    %287 = vector.broadcast %279 : vector<8x1xf32> to vector<8x32xf32>
    %288 = arith.subf %273, %287 : vector<8x32xf32>
    %289 = vector.broadcast %274 : vector<1x32xf32> to vector<8x32xf32>
    %290 = arith.mulf %289, %288 : vector<8x32xf32>
    %cst_139 = arith.constant 9.99999997E-7 : f32
    %291 = vector.broadcast %cst_139 : f32 to vector<8x1xf32>
    %292 = arith.addf %286, %291 : vector<8x1xf32>
    %293 = math.rsqrt %292 : vector<8x1xf32>
    %294 = vector.broadcast %293 : vector<8x1xf32> to vector<8x32xf32>
    %295 = arith.mulf %290, %294 : vector<8x32xf32>
    %296 = vector.broadcast %275 : vector<1x32xf32> to vector<8x32xf32>
    %297 = arith.addf %295, %296 : vector<8x32xf32>
    %c0_140 = arith.constant 0 : index
    %c0_141 = arith.constant 0 : index
    %c0_142 = arith.constant 0 : index
    %298 = vector.load %arg16[%c0_140, %c0_141, %c0_142] : memref<1x32x64xf32, #tpu.memory_space<vmem>>, vector<1x32x64xf32>
    %299 = vector.shape_cast %298 : vector<1x32x64xf32> to vector<32x64xf32>
    %cst_143 = arith.constant dense<0.000000e+00> : vector<8x64xf32>
    %300 = tpu.matmul %297, %299, %cst_143 {dimension_numbers = #tpu.dot_dimension_numbers<[1], [0], [0], [1], [0, 0, 1, 1], [], []>} : vector<8x32xf32>, vector<32x64xf32>, vector<8x64xf32> -> vector<8x64xf32>
    %c0_144 = arith.constant 0 : index
    %c0_145 = arith.constant 0 : index
    %c0_146 = arith.constant 0 : index
    %301 = vector.load %arg17[%c0_144, %c0_145, %c0_146] : memref<1x1x64xf32, #tpu.memory_space<vmem>>, vector<1x1x64xf32>
    %302 = vector.shape_cast %301 : vector<1x1x64xf32> to vector<1x64xf32>
    %303 = vector.broadcast %302 : vector<1x64xf32> to vector<8x64xf32>
    %304 = arith.addf %300, %303 : vector<8x64xf32>
    %cst_147 = arith.constant 0.000000e+00 : f32
    %305 = vector.broadcast %cst_147 : f32 to vector<8x64xf32>
    %306 = arith.maximumf %304, %305 : vector<8x64xf32>
    %c0_148 = arith.constant 0 : index
    %c0_149 = arith.constant 0 : index
    %c0_150 = arith.constant 0 : index
    %307 = vector.load %arg18[%c0_148, %c0_149, %c0_150] : memref<1x64x32xf32, #tpu.memory_space<vmem>>, vector<1x64x32xf32>
    %308 = vector.shape_cast %307 : vector<1x64x32xf32> to vector<64x32xf32>
    %cst_151 = arith.constant dense<0.000000e+00> : vector<8x32xf32>
    %309 = tpu.matmul %306, %308, %cst_151 {dimension_numbers = #tpu.dot_dimension_numbers<[1], [0], [0], [1], [0, 0, 1, 1], [], []>} : vector<8x64xf32>, vector<64x32xf32>, vector<8x32xf32> -> vector<8x32xf32>
    %c0_152 = arith.constant 0 : index
    %c0_153 = arith.constant 0 : index
    %c0_154 = arith.constant 0 : index
    %310 = vector.load %arg19[%c0_152, %c0_153, %c0_154] : memref<1x1x32xf32, #tpu.memory_space<vmem>>, vector<1x1x32xf32>
    %311 = vector.shape_cast %310 : vector<1x1x32xf32> to vector<1x32xf32>
    %312 = vector.broadcast %311 : vector<1x32xf32> to vector<8x32xf32>
    %313 = arith.addf %309, %312 : vector<8x32xf32>
    %314 = arith.addf %297, %313 : vector<8x32xf32>
    %315 = vector.extract_strided_slice %15 {offsets = [2, 0], sizes = [1, 32], strides = [1, 1]} : vector<3x32xf32> to vector<1x32xf32>
    %316 = vector.extract_strided_slice %17 {offsets = [2, 0], sizes = [1, 32], strides = [1, 1]} : vector<3x32xf32> to vector<1x32xf32>
    %cst_155 = arith.constant dense<0.000000e+00> : vector<8xf32>
    %317 = vector.multi_reduction <add>, %314, %cst_155 [1] : vector<8x32xf32> to vector<8xf32>
    %318 = vector.shape_cast %317 : vector<8xf32> to vector<8x1xf32>
    %cst_156 = arith.constant 3.200000e+01 : f32
    %319 = vector.broadcast %cst_156 : f32 to vector<8x1xf32>
    %320 = arith.divf %318, %319 : vector<8x1xf32>
    %321 = vector.broadcast %320 : vector<8x1xf32> to vector<8x32xf32>
    %322 = arith.subf %314, %321 : vector<8x32xf32>
    %323 = arith.mulf %322, %322 : vector<8x32xf32>
    %cst_157 = arith.constant dense<0.000000e+00> : vector<8xf32>
    %324 = vector.multi_reduction <add>, %323, %cst_157 [1] : vector<8x32xf32> to vector<8xf32>
    %325 = vector.shape_cast %324 : vector<8xf32> to vector<8x1xf32>
    %cst_158 = arith.constant 3.200000e+01 : f32
    %326 = vector.broadcast %cst_158 : f32 to vector<8x1xf32>
    %327 = arith.divf %325, %326 : vector<8x1xf32>
    %328 = vector.broadcast %320 : vector<8x1xf32> to vector<8x32xf32>
    %329 = arith.subf %314, %328 : vector<8x32xf32>
    %330 = vector.broadcast %315 : vector<1x32xf32> to vector<8x32xf32>
    %331 = arith.mulf %330, %329 : vector<8x32xf32>
    %cst_159 = arith.constant 9.99999997E-7 : f32
    %332 = vector.broadcast %cst_159 : f32 to vector<8x1xf32>
    %333 = arith.addf %327, %332 : vector<8x1xf32>
    %334 = math.rsqrt %333 : vector<8x1xf32>
    %335 = vector.broadcast %334 : vector<8x1xf32> to vector<8x32xf32>
    %336 = arith.mulf %331, %335 : vector<8x32xf32>
    %337 = vector.broadcast %316 : vector<1x32xf32> to vector<8x32xf32>
    %338 = arith.addf %336, %337 : vector<8x32xf32>
    %c0_160 = arith.constant 0 : index
    %c0_161 = arith.constant 0 : index
    %339 = vector.load %arg27[%c0_160, %c0_161] : memref<8x32xf32, #tpu.memory_space<vmem>>, vector<8x32xf32>
    tpu.vector_store %arg27[%c0_160, %c0_161], %338 {strides = array<i32>} : memref<8x32xf32, #tpu.memory_space<vmem>>, vector<8x32xf32>,
    %c1_i32 = arith.constant 1 : i32
    %340 = arith.cmpi eq, %arg1, %c1_i32 : i32
    %341 = arith.extui %340 : i1 to i32
    %c0_i32_162 = arith.constant 0 : i32
    %342 = arith.cmpi ne, %341, %c0_i32_162 : i32
    scf.if %342 {
      %c0_163 = arith.constant 0 : index
      %c0_164 = arith.constant 0 : index
      %343 = vector.load %arg22[%c0_163, %c0_164] : memref<32x128xf32, #tpu.memory_space<vmem>>, vector<32x128xf32>
      %cst_165 = arith.constant dense<0.000000e+00> : vector<8x128xf32>
      %344 = tpu.matmul %338, %343, %cst_165 {dimension_numbers = #tpu.dot_dimension_numbers<[1], [0], [0], [1], [0, 0, 1, 1], [], []>} : vector<8x32xf32>, vector<32x128xf32>, vector<8x128xf32> -> vector<8x128xf32>
      %c0_166 = arith.constant 0 : index
      %c0_167 = arith.constant 0 : index
      %345 = vector.load %arg23[%c0_166, %c0_167] : memref<1x128xf32, #tpu.memory_space<vmem>>, vector<1x128xf32>
      %346 = vector.broadcast %345 : vector<1x128xf32> to vector<8x128xf32>
      %347 = arith.addf %344, %346 : vector<8x128xf32>
      %c0_168 = arith.constant 0 : index
      %c0_169 = arith.constant 0 : index
      %c0_170 = arith.constant 0 : index
      %348 = vector.load %arg24[%c0_168, %c0_169, %c0_170] : memref<1x8x128xf32, #tpu.memory_space<vmem>>, vector<1x8x128xf32>
      %349 = vector.shape_cast %348 : vector<1x8x128xf32> to vector<8x128xf32>
      %350 = vector.shape_cast %347 : vector<8x128xf32> to vector<1x8x128xf32>
      tpu.vector_store %arg24[%c0_168, %c0_169, %c0_170], %350 {strides = array<i32>} : memref<1x8x128xf32, #tpu.memory_space<vmem>>, vector<1x8x128xf32>,
    } else {
    }
    return
  }
  func.func @transform_0(%arg0: i32, %arg1: i32) -> (i32, i32, i32) {
    %c0_i32 = arith.constant 0 : i32
    %c0_i32_0 = arith.constant 0 : i32
    %c0_i32_1 = arith.constant 0 : i32
    return %arg0, %c0_i32, %c0_i32_0 : i32, i32, i32
  }
  func.func @transform_1(%arg0: i32, %arg1: i32) -> (i32, i32, i32) {
    %c0_i32 = arith.constant 0 : i32
    %c0_i32_0 = arith.constant 0 : i32
    %c0_i32_1 = arith.constant 0 : i32
    return %arg0, %c0_i32, %c0_i32_0 : i32, i32, i32
  }
  func.func @transform_2(%arg0: i32, %arg1: i32) -> (i32, i32, i32, i32) {
    %c0_i32 = arith.constant 0 : i32
    %c0_i32_0 = arith.constant 0 : i32
    %c0_i32_1 = arith.constant 0 : i32
    %c0_i32_2 = arith.constant 0 : i32
    return %arg0, %c0_i32, %c0_i32_0, %c0_i32_1 : i32, i32, i32, i32
  }
  func.func @transform_3(%arg0: i32, %arg1: i32) -> (i32, i32, i32, i32) {
    %c0_i32 = arith.constant 0 : i32
    %c0_i32_0 = arith.constant 0 : i32
    %c0_i32_1 = arith.constant 0 : i32
    %c0_i32_2 = arith.constant 0 : i32
    return %arg0, %c0_i32, %c0_i32_0, %c0_i32_1 : i32, i32, i32, i32
  }
  func.func @transform_4(%arg0: i32, %arg1: i32) -> (i32, i32, i32) {
    %c0_i32 = arith.constant 0 : i32
    %c0_i32_0 = arith.constant 0 : i32
    %c0_i32_1 = arith.constant 0 : i32
    return %arg1, %c0_i32, %c0_i32_0 : i32, i32, i32
  }
  func.func @transform_5(%arg0: i32, %arg1: i32) -> (i32, i32, i32) {
    %c0_i32 = arith.constant 0 : i32
    %c0_i32_0 = arith.constant 0 : i32
    %c0_i32_1 = arith.constant 0 : i32
    return %arg1, %c0_i32, %c0_i32_0 : i32, i32, i32
  }
  func.func @transform_6(%arg0: i32, %arg1: i32) -> (i32, i32, i32) {
    %c0_i32 = arith.constant 0 : i32
    %c0_i32_0 = arith.constant 0 : i32
    %c0_i32_1 = arith.constant 0 : i32
    return %arg1, %c0_i32, %c0_i32_0 : i32, i32, i32
  }
  func.func @transform_7(%arg0: i32, %arg1: i32) -> (i32, i32, i32) {
    %c0_i32 = arith.constant 0 : i32
    %c0_i32_0 = arith.constant 0 : i32
    %c0_i32_1 = arith.constant 0 : i32
    return %arg1, %c0_i32, %c0_i32_0 : i32, i32, i32
  }
  func.func @transform_8(%arg0: i32, %arg1: i32) -> (i32, i32, i32) {
    %c0_i32 = arith.constant 0 : i32
    %c0_i32_0 = arith.constant 0 : i32
    %c0_i32_1 = arith.constant 0 : i32
    return %arg1, %c0_i32, %c0_i32_0 : i32, i32, i32
  }
  func.func @transform_9(%arg0: i32, %arg1: i32) -> (i32, i32, i32) {
    %c0_i32 = arith.constant 0 : i32
    %c0_i32_0 = arith.constant 0 : i32
    %c0_i32_1 = arith.constant 0 : i32
    return %arg1, %c0_i32, %c0_i32_0 : i32, i32, i32
  }
  func.func @transform_10(%arg0: i32, %arg1: i32) -> (i32, i32, i32) {
    %c0_i32 = arith.constant 0 : i32
    %c0_i32_0 = arith.constant 0 : i32
    %c0_i32_1 = arith.constant 0 : i32
    return %arg1, %c0_i32, %c0_i32_0 : i32, i32, i32
  }
  func.func @transform_11(%arg0: i32, %arg1: i32) -> (i32, i32, i32) {
    %c0_i32 = arith.constant 0 : i32
    %c0_i32_0 = arith.constant 0 : i32
    %c0_i32_1 = arith.constant 0 : i32
    return %arg1, %c0_i32, %c0_i32_0 : i32, i32, i32
  }
  func.func @transform_12(%arg0: i32, %arg1: i32) -> (i32, i32, i32) {
    %c0_i32 = arith.constant 0 : i32
    %c0_i32_0 = arith.constant 0 : i32
    %c0_i32_1 = arith.constant 0 : i32
    return %arg1, %c0_i32, %c0_i32_0 : i32, i32, i32
  }
  func.func @transform_13(%arg0: i32, %arg1: i32) -> (i32, i32, i32) {
    %c0_i32 = arith.constant 0 : i32
    %c0_i32_0 = arith.constant 0 : i32
    %c0_i32_1 = arith.constant 0 : i32
    return %arg1, %c0_i32, %c0_i32_0 : i32, i32, i32
  }
  func.func @transform_14(%arg0: i32, %arg1: i32) -> (i32, i32, i32) {
    %c0_i32 = arith.constant 0 : i32
    %c0_i32_0 = arith.constant 0 : i32
    %c0_i32_1 = arith.constant 0 : i32
    return %arg1, %c0_i32, %c0_i32_0 : i32, i32, i32
  }
  func.func @transform_15(%arg0: i32, %arg1: i32) -> (i32, i32, i32) {
    %c0_i32 = arith.constant 0 : i32
    %c0_i32_0 = arith.constant 0 : i32
    %c0_i32_1 = arith.constant 0 : i32
    return %arg1, %c0_i32, %c0_i32_0 : i32, i32, i32
  }
  func.func @transform_16(%arg0: i32, %arg1: i32) -> (i32, i32, i32) {
    %c0_i32 = arith.constant 0 : i32
    %c0_i32_0 = arith.constant 0 : i32
    %c0_i32_1 = arith.constant 0 : i32
    return %arg1, %c0_i32, %c0_i32_0 : i32, i32, i32
  }
  func.func @transform_17(%arg0: i32, %arg1: i32) -> (i32, i32, i32) {
    %c0_i32 = arith.constant 0 : i32
    %c0_i32_0 = arith.constant 0 : i32
    %c0_i32_1 = arith.constant 0 : i32
    return %arg1, %c0_i32, %c0_i32_0 : i32, i32, i32
  }
  func.func @transform_18(%arg0: i32, %arg1: i32) -> (i32, i32, i32) {
    %c0_i32 = arith.constant 0 : i32
    %c0_i32_0 = arith.constant 0 : i32
    %c0_i32_1 = arith.constant 0 : i32
    return %arg1, %c0_i32, %c0_i32_0 : i32, i32, i32
  }
  func.func @transform_19(%arg0: i32, %arg1: i32) -> (i32, i32, i32) {
    %c0_i32 = arith.constant 0 : i32
    %c0_i32_0 = arith.constant 0 : i32
    %c0_i32_1 = arith.constant 0 : i32
    return %arg1, %c0_i32, %c0_i32_0 : i32, i32, i32
  }
  func.func @transform_20(%arg0: i32, %arg1: i32) -> (i32, i32) {
    %c0_i32 = arith.constant 0 : i32
    %c0_i32_0 = arith.constant 0 : i32
    %c0_i32_1 = arith.constant 0 : i32
    return %c0_i32, %c0_i32_0 : i32, i32
  }
  func.func @transform_21(%arg0: i32, %arg1: i32) -> (i32, i32) {
    %c0_i32 = arith.constant 0 : i32
    %c0_i32_0 = arith.constant 0 : i32
    %c0_i32_1 = arith.constant 0 : i32
    return %c0_i32, %c0_i32_0 : i32, i32
  }
  func.func @transform_22(%arg0: i32, %arg1: i32) -> (i32, i32, i32) {
    %c0_i32 = arith.constant 0 : i32
    %c0_i32_0 = arith.constant 0 : i32
    %c0_i32_1 = arith.constant 0 : i32
    return %arg0, %c0_i32, %c0_i32_0 : i32, i32, i32
  }
  func.func @transform_23(%arg0: i32, %arg1: i32) -> (i32, i32, i32, i32) {
    %c0_i32 = arith.constant 0 : i32
    %c0_i32_0 = arith.constant 0 : i32
    %c0_i32_1 = arith.constant 0 : i32
    %c0_i32_2 = arith.constant 0 : i32
    return %arg0, %c0_i32, %c0_i32_0, %c0_i32_1 : i32, i32, i32, i32
  }
  func.func @transform_24(%arg0: i32, %arg1: i32) -> (i32, i32, i32, i32) {
    %c0_i32 = arith.constant 0 : i32
    %c0_i32_0 = arith.constant 0 : i32
    %c0_i32_1 = arith.constant 0 : i32
    %c0_i32_2 = arith.constant 0 : i32
    return %arg0, %c0_i32, %c0_i32_0, %c0_i32_1 : i32, i32, i32, i32
  }
}

</mosaic_0001>

<bundles_post_ra>
// kernel: tpu_custom_call.1
= control target key start
LH: loop header
LB: loop body
LE: loop exit
PB: predicated region body
PF: predicated region fallthrough
CT: control target
= control target key end

     0   :  { %s6987_s0 = inlined_call_operand.hbm [shape: f32[2,8,32], index: 0, kind: input, shape index: {}]   ;;  %s6988_s1 = inlined_call_operand.hbm [shape: f32[2,8,32], index: 1, kind: input, shape index: {}]   ;;  %s6989_s2 = inlined_call_operand.hbm [shape: f32[2,1,8,8], index: 2, kind: input, shape index: {}]   ;;  %s6990_s3 = inlined_call_operand.hbm [shape: f32[2,1,8,8], index: 3, kind: input, shape index: {}]   ;;  %s6991_s4 = inlined_call_operand.vmem [shape: f32[2,32,96], index: 4, kind: input, shape index: {}]   ;;  %s6992_s5 = inlined_call_operand.hbm [shape: f32[2,1,96], index: 5, kind: input, shape index: {}]   ;;  %s6993_s6 = inlined_call_operand.vmem [shape: f32[2,32,32], index: 6, kind: input, shape index: {}]   ;;  %s6994_s7 = inlined_call_operand.hbm [shape: f32[2,1,32], index: 7, kind: input, shape index: {}]   ;;  %s6995_s8 = inlined_call_operand.vmem [shape: f32[2,32,32], index: 8, kind: input, shape index: {}]   ;;  %s6996_s9 = inlined_call_operand.hbm [shape: f32[2,1,32], index: 9, kind: input, shape index: {}]   ;;  %s6997_s10 = inlined_call_operand.hbm [shape: f32[2,32,64], index: 10, kind: input, shape index: {}]   ;;  %s6998_s11 = inlined_call_operand.hbm [shape: f32[2,1,64], index: 11, kind: input, shape index: {}]   ;;  %s6999_s12 = inlined_call_operand.hbm [shape: f32[2,32,32], index: 12, kind: input, shape index: {}]   ;;  %s7000_s13 = inlined_call_operand.hbm [shape: f32[2,1,32], index: 13, kind: input, shape index: {}]   ;;  %s7001_s14 = inlined_call_operand.hbm [shape: f32[2,32,64], index: 14, kind: input, shape index: {}]   ;;  %s7002_s15 = inlined_call_operand.hbm [shape: f32[2,1,64], index: 15, kind: input, shape index: {}]   ;;  %s7003_s16 = inlined_call_operand.vmem [shape: f32[2,64,32], index: 16, kind: input, shape index: {}]   ;;  %s7004_s17 = inlined_call_operand.hbm [shape: f32[2,1,32], index: 17, kind: input, shape index: {}]   ;;  %s7005_s18 = inlined_call_operand.vmem [shape: f32[2,3,32], index: 18, kind: input, shape index: {}]   ;;  %s7006_s19 = inlined_call_operand.vmem [shape: f32[2,3,32], index: 19, kind: input, shape index: {}]   ;;  %s7007_s20 = inlined_call_operand.vmem [shape: f32[32,128], index: 20, kind: input, shape index: {}]   ;;  %s7008_s21 = inlined_call_operand.vmem [shape: f32[1,128], index: 21, kind: input, shape index: {}]   ;;  %s7009_s22 = inlined_call_operand.hbm [shape: f32[2,8,128], index: 22, kind: output, shape index: {0}]   ;;  %s7010_s23 = inlined_call_operand.hbm [shape: f32[2,4,8,8], index: 23, kind: output, shape index: {1}]   ;;  %s7011_s24 = inlined_call_operand.hbm [shape: f32[2,4,8,8], index: 24, kind: output, shape index: {2}]  }
   0x1   :  { %7064 = sst [smem:[#allocation61_spill]] %s6987_s0 }
   0x2   :  { %7065 = sst [smem:[#allocation62_spill]] %s6988_s1 }
   0x3   :  { %7066 = sst [smem:[#allocation63_spill]] %s6989_s2 }
   0x4   :  { %7067 = sst [smem:[#allocation64_spill]] %s6990_s3 }
   0x5   :  { %7068 = sst [smem:[#allocation65_spill]] %s6991_s4 }
   0x6   :  { %7069 = sst [smem:[#allocation66_spill]] %s6992_s5 }
   0x7   :  { %7070 = sst [smem:[#allocation67_spill]] %s6993_s6 }
   0x8   :  { %7071 = sst [smem:[#allocation68_spill]] %s6994_s7 }
   0x9   :  { %7072 = sst [smem:[#allocation69_spill]] %s6995_s8 }
   0xa   :  { %7073 = sst [smem:[#allocation70_spill]] %s6996_s9 }
   0xb   :  { %7074 = sst [smem:[#allocation71_spill]] %s6997_s10 }
   0xc   :  { %7075 = sst [smem:[#allocation72_spill]] %s6998_s11 }
   0xd   :  { %7076 = sst [smem:[#allocation73_spill]] %s6999_s12 }
   0xe   :  { %7077 = sst [smem:[#allocation74_spill]] %s7000_s13 }
   0xf   :  { %7078 = sst [smem:[#allocation75_spill]] %s7001_s14 }
  0x10   :  { %7079 = sst [smem:[#allocation76_spill]] %s7002_s15 }
  0x11   :  { %7080 = sst [smem:[#allocation77_spill]] %s7003_s16 }
  0x12   :  { %7081 = sst [smem:[#allocation78_spill]] %s7004_s17 }
  0x13   :  { %7082 = sst [smem:[#allocation79_spill]] %s7005_s18 }
  0x14   :  { %7083 = sst [smem:[#allocation80_spill]] %s7006_s19 }
  0x15   :  { %7084 = sst [smem:[#allocation81_spill]] %s7007_s20 }
  0x16   :  { %7085 = sst [smem:[#allocation82_spill]] %s7008_s21 }
  0x17   :  { %7086 = sst [smem:[#allocation83_spill]] %s7009_s22 }
  0x18   :  { %7087 = sst [smem:[#allocation84_spill]] %s7010_s23 }
  0x19   :  { %7088 = sst [smem:[#allocation85_spill]] %s7011_s24 }
  0x1a   :  { %30 = vsyncpa [#allocation4], 0 }
  0x1b   :  { %32 = vsyncpa [#allocation4 + $0x1], 0 }
  0x1c   :  { %33 = vsyncpa [#allocation7], 0 }
  0x1d   :  { %35 = vsyncpa [#allocation7 + $0x1], 0 }
  0x1e   :  { %36 = vsyncpa [#allocation10], 0 }
  0x1f   :  { %38 = vsyncpa [#allocation10 + $0x1], 0 }
  0x20   :  { %39 = vsyncpa [#allocation13], 0 }
  0x21   :  { %41 = vsyncpa [#allocation13 + $0x1], 0 }
  0x22   :  { %42 = vsyncpa [#allocation16], 0 }
  0x23   :  { %44 = vsyncpa [#allocation16 + $0x1], 0 }
  0x24   :  { %45 = vsyncpa [#allocation19], 0 }
  0x25   :  { %47 = vsyncpa [#allocation19 + $0x1], 0 }
  0x26   :  { %48 = vsyncpa [#allocation22], 0 }
  0x27   :  { %50 = vsyncpa [#allocation22 + $0x1], 0 }
  0x28   :  { %51 = vsyncpa [#allocation25], 0 }
  0x29   :  { %53 = vsyncpa [#allocation25 + $0x1], 0 }
  0x2a   :  { %54 = vsyncpa [#allocation5], 0 }
  0x2b   :  { %56 = vsyncpa [#allocation5 + $0x1], 0 }
  0x2c   :  { %57 = vsyncpa [#allocation28], 0 }
  0x2d   :  { %59 = vsyncpa [#allocation28 + $0x1], 0  ;;  %s5848_s5 = smov 0   ;;  %s5850_s26 = smov 0  }
  0x2e   :  { %s5852_s27 = smov 0   ;;  %s5854_s28 = smov 0  }
  0x2f   :  { %s5856_s6 = smov 0   ;;  %s5858_s2 = smov 0  }
  0x30   :  { %s5860_s29 = smov 0   ;;  %s5862_s0 = smov 0  }
  0x31   :  { %7089 = sst [smem:[#allocation41_spill]] %s5860_s29  ;;  %s5864_s7 = smov 0  }
  0x32   :  { %s5866_s30 = smov 0   ;;  %s5868_s3 = smov 0  }
  0x33 LB: > { %s7091_s29 = sld [smem:[#allocation41_spill]]  ;;  %7093 = sst [smem:[#allocation42_spill]] %s5651_s27  ;;  %s5683_s3 = sphi %s5868_s3, %s65_s3   ;;  %s5679_s30 = sphi %s5866_s30, %s7198_s30   ;;  %s5675_s7 = sphi %s5864_s7, %s7197_s7   ;;  %s5671_s0 = sphi %s5862_s0, %s7196_s0   ;;  %s5663_s2 = sphi %s5858_s2, %s7194_s2   ;;  %s5659_s6 = sphi %s5856_s6, %s7193_s6   ;;  %s5655_s28 = sphi %s5854_s28, %s7192_s28   ;;  %s5651_s27 = sphi %s5852_s27, %s7191_s27   ;;  %s5647_s26 = sphi %s5850_s26, %s7190_s26   ;;  %s5643_s5 = sphi %s5848_s5, %s7189_s5  }
  0x34   : > { %7092 = sst [smem:[#allocation41_spill]] %s5647_s26  ;;  %s5904_s25 = sadd.s32 4294967295, %s5683_s3  }
  0x35   : > { %7094 = sst [smem:[#allocation43_spill]] %s5655_s28  ;;  %s74_s4 = sadd.s32 1, %s5675_s7 }
  0x36   : > { %7095 = sst [smem:[#allocation44_spill]] %s5659_s6  ;;  %s77_s1 = sadd.s32 1, %s5679_s30 }
  0x37   : > { %7096 = sst [smem:[#allocation45_spill]] %s5663_s2  ;;  %p75_p0 = scmp.ge.s32.totalorder %s74_s4, 2 }
  0x38   : > { %7098 = sst [smem:[#allocation47_spill]] %s5671_s0  ;;  %s84_s22 = sadd.s32 1, %s5663_s2 }
  0x39   : > { %7097 = sst [smem:[#allocation46_spill]] %s7091_s29  ;;  %p91_p1 = scmp.ne.s32.totalorder %s5663_s2, %s5659_s6 }
  0x3a   : > { %7099 = sst [smem:[#allocation48_spill]] %s5675_s7  ;;  %p92_p2 = scmp.eq.s32.totalorder %s5683_s3, 0 }
  0x3b   : > { %7100 = sst [smem:[#allocation49_spill]] %s5679_s30  ;;  %s7201_s4 = smov (%p75_p0, %s74_s4), 0 }
  0x3c   : > { %7101 = sst [smem:[#allocation50_spill]] %s5683_s3  ;;  %s7203_s1 = smov (!%p75_p0, %s77_s1), %s5679_s30 }
  0x3d   : > { %7102 = sst [smem:[#allocation51_spill]] %s5904_s25  ;;  %p5921_p3 = por %p92_p2, %p91_p1 }
  0x3e   : > { %7103 = sst [smem:[#allocation52_spill]] %s7201_s4  ;;  %p7024_p4 = scmp.ne.s32.totalorder %s5659_s6, %s5655_s28 }
  0x3f   : > { %s7104_s8 = scalar_select %p5921_p3, 1, 0 }
  0x40   : > { %p79_p5 = scmp.ge.s32.totalorder %s7203_s1, 2  ;;  %p98_p6 = scmp.eq.s32.totalorder %s5904_s25, 0 }
  0x41   : > { %s211_s24 = ssub.s32 %s5675_s7, %s7201_s4  ;;  %s214_s23 = sadd.s32 1, %s5651_s27 }
  0x42   : > { %s7205_s1 = smov (%p79_p5, %s7203_s1), 0  ;;  %p5938_p7 = por %p98_p6, %p7024_p4 }
  0x43   : > { %7105 = sst [smem:[#allocation53_spill]] %s7205_s1  ;;  %p212_p8 = scmp.eq.s32.totalorder %s211_s24, 0 }
  0x44   : > { %s7106_s0 = scalar_select %p5938_p7, 1, 0 }
  0x45   : > { %s81_s21 = ssub.s32 %s5679_s30, %s7205_s1  ;;  %p221_p9 = scmp.ne.s32.totalorder %s5651_s27, %s5647_s26 }
  0x46   : > { %7107 = sst [smem:[#allocation54_spill]] %s7106_s0  ;;  %p82_p10 = scmp.eq.s32.totalorder %s81_s21, 0 }
  0x47   : > { %p227_p11 = scmp.ne.s32.totalorder %s5647_s26, %s5643_s5  ;;  %p5956_p12 = por %p221_p9, %p92_p2 }
  0x48   : > { %s5949_s20 = scalar_select %p212_p8, %s5651_s27, %s214_s23  }
  0x49   : > { %s5952_s4 = scalar_select %p82_p10, %s5663_s2, %s84_s22  }
  0x4a   : > { %7108 = sst [smem:[#allocation55_spill]] %s5949_s20  ;;  %p5962_p13 = por %p227_p11, %p98_p6 }
  0x4b   : > { %7109 = sst [smem:[#allocation56_spill]] %s5952_s4  ;;  %p657_p0 = scmp.eq.s32.totalorder %s5904_s25, 3 }
  0x4c   : > { %s7110_s19 = scalar_select %p5956_p12, 1, 0 }
  0x4d   : > { %s7111_s18 = scalar_select %p5962_p13, 1, 0 }
  0x4e   : > { %s7113_s24 = sadd.s32 4294967294, %s5683_s3   ;;  %p5972_p4 = por %p657_p0, %p91_p1 }
  0x4f   : > { %7112 = sst [smem:[#allocation57_spill]] %s7111_s18  ;;  %p663_p5 = scmp.eq.s32.totalorder %s7113_s24, 3 }
  0x50   : > { %s7114_s21 = scalar_select %p5972_p4, 1, 0 }
  0x51   : > { %p7116_p8 = scmp.ne.s32.totalorder %s5659_s6, %s5655_s28  ;;  %p4448_p2 = scmp.ge.s32.totalorder %s5683_s3, 4 }
  0x52   : > { %7115 = sst [smem:[#allocation58_spill]] %s7114_s21  ;;  %s7032_s23 = sand.u32 (!%p4448_p2), 1, %s5663_s2  }
  0x53   : > { %p5979_p10 = por %p663_p5, %p7116_p8  ;;  %737 = sbr.rel (%p4448_p2) target bundleno = 476 (0x1dc), region = 24 }
  0x54   : > { %s5986_s5 = sshll.u32 (!%p4448_p2), %s5679_s30, 7  ;;  %s5990_s24 = sshll.u32 (!%p4448_p2), %s7032_s23, 3 }
  0x55   : > { %s7117_s22 = scalar_select %p5979_p10, 1, 0 }
  0x56   : > { %s5993_s1 = sand.u32 (!%p4448_p2), 1, %s5683_s3   ;;  %s763_s21 = scalar_lea.vmem (!%p4448_p2), [#allocation6], %s5990_s24 }
  0x57   : > { %7118 = sst [smem:[#allocation59_spill]] %s7117_s22  ;;  %s7119_s22 = sld [smem:[#allocation62_spill]] (!%p4448_p2) }
  0x58   : > { %s770_s30 = sshll.u32 (!%p4448_p2), %s763_s21, 4  ;;  %s771_s30 = int_to_ptr.vmem [resolvable:$true] %s770_s30 }
  0x5d   : > { %s5999_s28 = scalar_lea.hbm %s7119_s22, %s5986_s5  ;;  %s5081_s20 = scalar_lea.hbm %s7119_s22, 256 }
  0x5e   : > { %s5077_s29 = scalar_lea.hbm %s5999_s28, 128  ;;  %p5082_p11 = scmp.lt.u32.totalorder %s5999_s28, %s7119_s22 }
  0x5f   : > { %p5078_p1 = scmp.ne.s32.totalorder %s5999_s28, %s5077_s29  ;;  %p5083_p0 = scmp.lt.u32.totalorder %s5081_s20, %s5077_s29 }
  0x60   : > { %p5085_p8 = scmp.lt.u32.totalorder %s5077_s29, %s5999_s28 }
  0x61   : > { %p5079_p6 = pnand %p5078_p1, %p5921_p3  ;;  %p5084_p5 = por %p5083_p0, %p5082_p11 }
  0x63   : > { %p5080_p9 = pneg %p5079_p6  ;;  %p5086_p2 = por %p5085_p8, %p5084_p5 }
  0x65   : > { %p5087_p10 = pnand %p5086_p2, %p5080_p9 }
  0x67   : > { %5090 = shalt.err (!%p5087_p10)
}
  0x68   : > { %s5091_s21 = scalar_lea.vmem %s771_s30, 128  ;;  %s5685_s16 = smov [#allocation6]  }
  0x69   : > { %p5092_p4 = scmp.ne.s32.totalorder %s771_s30, %s5091_s21  ;;  %s5095_s25 = sshll.u32 %s5685_s16, 4  ;;  %s5096_s25 = int_to_ptr.vmem [resolvable:$false] %s5095_s25 }
  0x6a   : > { %s5097_s18 = scalar_lea.vmem %s5096_s25, 256  ;;  %p5098_p13 = scmp.lt.s32.totalorder %s771_s30, %s5096_s25 }
  0x6b   : > { %p5093_p1 = pnand %p5092_p4, %p5921_p3  ;;  %p5099_p7 = scmp.lt.s32.totalorder %s5097_s18, %s5091_s21 }
  0x6d   : > { %p5094_p6 = pneg %p5093_p1  ;;  %p5100_p12 = por %p5099_p7, %p5098_p13 }
  0x6f   : > { %p5101_p0 = pnand %p5100_p12, %p5094_p6 }
  0x71   : > { %5104 = shalt.err (!%p5101_p0)
}
  0x72   : > { %s7120_s26 = scalar_lea.sflag [#allocation7], %s5993_s1  ;;  %s7121_s23 = sld [smem:[#allocation64_spill]] }
  0x73   : > { %4886 = dma.hbm_to_vmem [thread:$0]  (%p5921_p3), %s5999_s28, 128, %s771_s30, %s7120_s26  }
  0x74   : > { %s799_s20 = scalar_lea.vmem [#allocation9], %s5990_s24  ;;  %s6030_s21 = sand.u32 1, %s5651_s27  }
  0x75   : > { %s806_s4 = sshll.u32 %s799_s20, 4  ;;  %s6035_s18 = sshll.u32 %s5675_s7, 4  ;;  %s6032_s4 = int_to_ptr.vmem [resolvable:$true] %s806_s4 }
  0x76   : > { %s7047_s22 = scalar_lea.sflag [#allocation10], %s5993_s1 }
  0x78   : > { %s6026_s25 = scalar_lea.hbm %s7121_s23, %s5986_s5  ;;  %s5109_s26 = scalar_lea.hbm %s7121_s23, 256 }
  0x79   : > { %s5105_s0 = scalar_lea.hbm %s6026_s25, 128  ;;  %p5110_p13 = scmp.lt.u32.totalorder %s6026_s25, %s7121_s23 }
  0x7a   : > { %p5106_p4 = scmp.ne.s32.totalorder %s6026_s25, %s5105_s0  ;;  %p5111_p10 = scmp.lt.u32.totalorder %s5109_s26, %s5105_s0 }
  0x7b   : > { %p5113_p11 = scmp.lt.u32.totalorder %s5105_s0, %s6026_s25 }
  0x7c   : > { %p5107_p7 = pnand %p5106_p4, %p5921_p3  ;;  %p5112_p9 = por %p5111_p10, %p5110_p13 }
  0x7e   : > { %p5108_p12 = pneg %p5107_p7  ;;  %p5114_p5 = por %p5113_p11, %p5112_p9 }
  0x80   : > { %p5115_p8 = pnand %p5114_p5, %p5108_p12 }
  0x82   : > { %5118 = shalt.err (!%p5115_p8)
}
  0x83   : > { %s5119_s20 = scalar_lea.vmem %s6032_s4, 128  ;;  %s5686_s28 = smov [#allocation9]  }
  0x84   : > { %p5120_p2 = scmp.ne.s32.totalorder %s6032_s4, %s5119_s20  ;;  %s5123_s30 = sshll.u32 %s5686_s28, 4  ;;  %s5124_s30 = int_to_ptr.vmem [resolvable:$false] %s5123_s30 }
  0x85   : > { %s5125_s16 = scalar_lea.vmem %s5124_s30, 256  ;;  %p5126_p0 = scmp.lt.s32.totalorder %s6032_s4, %s5124_s30 }
  0x86   : > { %p5121_p1 = pnand %p5120_p2, %p5921_p3  ;;  %p5127_p4 = scmp.lt.s32.totalorder %s5125_s16, %s5119_s20 }
  0x88   : > { %p5122_p6 = pneg %p5121_p1  ;;  %p5128_p7 = por %p5127_p4, %p5126_p0 }
  0x8a   : > { %p5129_p13 = pnand %p5128_p7, %p5122_p6 }
  0x8c   : > { %5132 = shalt.err (!%p5129_p13)
}
  0x8d   : > { %4888 = dma.hbm_to_vmem [thread:$0]  (%p5921_p3), %s6026_s25, 128, %s6032_s4, %s7047_s22  }
  0x8e   : > { %s7122_s29 = sld [smem:[#allocation68_spill]]  ;;  %s849_s20 = scalar_lea.vmem [#allocation12], %s6030_s21 }
  0x8f   : > { %s856_s30 = sshll.u32 %s849_s20, 4  ;;  %s7050_s16 = scalar_lea.sflag [#allocation13], %s5993_s1  ;;  %s857_s30 = int_to_ptr.vmem [resolvable:$true] %s856_s30 }
  0x90   : > { %p7124_p10 = scmp.ne.s32.totalorder %s7110_s19, 0 }
  0x94   : > { %s7123_s23 = smov %s7122_s29  ;;  %s6065_s28 = scalar_lea.hbm %s7122_s29, %s6035_s18 }
  0x95   : > { %s5133_s27 = scalar_lea.hbm %s6065_s28, 16  ;;  %s5137_s4 = scalar_lea.hbm %s7123_s23, 32 }
  0x96   : > { %p5134_p12 = scmp.ne.s32.totalorder %s6065_s28, %s5133_s27  ;;  %p5138_p5 = scmp.lt.u32.totalorder %s6065_s28, %s7123_s23 }
  0x97   : > { %p5139_p8 = scmp.lt.u32.totalorder %s5137_s4, %s5133_s27  ;;  %p5141_p1 = scmp.lt.u32.totalorder %s5133_s27, %s6065_s28 }
  0x98   : > { %p5135_p9 = pnand %p5134_p12, %p7124_p10 }
  0x99   : > { %p5140_p2 = por %p5139_p8, %p5138_p5 }
  0x9a   : > { %p5136_p11 = pneg %p5135_p9 }
  0x9b   : > { %p5142_p6 = por %p5141_p1, %p5140_p2 }
  0x9d   : > { %p5143_p0 = pnand %p5142_p6, %p5136_p11 }
  0x9f   : > { %5146 = shalt.err (!%p5143_p0)
}
  0xa0   : > { %s5147_s29 = scalar_lea.vmem %s857_s30, 16  ;;  %s5687_s20 = smov [#allocation12]  }
  0xa1   : > { %p5148_p4 = scmp.ne.s32.totalorder %s857_s30, %s5147_s29  ;;  %s5151_s22 = sshll.u32 %s5687_s20, 4  ;;  %s5152_s22 = int_to_ptr.vmem [resolvable:$false] %s5151_s22 }
  0xa2   : > { %s5153_s6 = scalar_lea.vmem %s5152_s22, 32  ;;  %p5154_p12 = scmp.lt.s32.totalorder %s857_s30, %s5152_s22 }
  0xa3   : > { %p5149_p7 = pnand %p5148_p4, %p7124_p10  ;;  %p5155_p9 = scmp.lt.s32.totalorder %s5153_s6, %s5147_s29 }
  0xa5   : > { %p5150_p13 = pneg %p5149_p7  ;;  %p5156_p3 = por %p5155_p9, %p5154_p12 }
  0xa7   : > { %p5157_p5 = pnand %p5156_p3, %p5150_p13 }
  0xa9   : > { %5160 = shalt.err (!%p5157_p5)
}
  0xaa   : > { %4890 = dma.hbm_to_vmem [thread:$0]  (%p7124_p10), %s6065_s28, 16, %s857_s30, %s7050_s16  }
  0xab   : > { %s6089_s27 = sshll.u32 %s6030_s21, 5  ;;  %s6092_s25 = sshll.u32 %s5675_s7, 9 }
  0xac   : > { %s7125_s10 = sld [smem:[#allocation71_spill]]  ;;  %s892_s26 = scalar_lea.vmem [#allocation15], %s6089_s27 }
  0xad   : > { %s899_s29 = sshll.u32 %s892_s26, 4  ;;  %s7052_s28 = scalar_lea.sflag [#allocation16], %s5993_s1  ;;  %s6101_s29 = int_to_ptr.vmem [resolvable:$true] %s899_s29 }
  0xb2   : > { %s6098_s0 = scalar_lea.hbm %s7125_s10, %s6092_s25  ;;  %s5165_s22 = scalar_lea.hbm %s7125_s10, 1024 }
  0xb3   : > { %s5161_s30 = scalar_lea.hbm %s6098_s0, 512  ;;  %p5166_p2 = scmp.lt.u32.totalorder %s6098_s0, %s7125_s10 }
  0xb4   : > { %p5162_p3 = scmp.ne.s32.totalorder %s6098_s0, %s5161_s30  ;;  %p5167_p1 = scmp.lt.u32.totalorder %s5165_s22, %s5161_s30 }
  0xb5   : > { %p5169_p0 = scmp.lt.u32.totalorder %s5161_s30, %s6098_s0 }
  0xb6   : > { %p5163_p11 = pnand %p5162_p3, %p7124_p10  ;;  %p5168_p6 = por %p5167_p1, %p5166_p2 }
  0xb8   : > { %p5164_p8 = pneg %p5163_p11  ;;  %p5170_p4 = por %p5169_p0, %p5168_p6 }
  0xba   : > { %p5171_p7 = pnand %p5170_p4, %p5164_p8 }
  0xbc   : > { %5174 = shalt.err (!%p5171_p7)
}
  0xbd   : > { %s5175_s26 = scalar_lea.vmem %s6101_s29, 512  ;;  %s5688_s20 = smov [#allocation15]  }
  0xbe   : > { %p5176_p13 = scmp.ne.s32.totalorder %s6101_s29, %s5175_s26  ;;  %s5179_s6 = sshll.u32 %s5688_s20, 4  ;;  %s5180_s6 = int_to_ptr.vmem [resolvable:$false] %s5179_s6 }
  0xbf   : > { %s5181_s16 = scalar_lea.vmem %s5180_s6, 1024  ;;  %p5182_p5 = scmp.lt.s32.totalorder %s6101_s29, %s5180_s6 }
  0xc0   : > { %p5177_p12 = pnand %p5176_p13, %p7124_p10  ;;  %p5183_p3 = scmp.lt.s32.totalorder %s5181_s16, %s5175_s26 }
  0xc2   : > { %p5178_p9 = pneg %p5177_p12  ;;  %p5184_p11 = por %p5183_p3, %p5182_p5 }
  0xc4   : > { %p5185_p2 = pnand %p5184_p11, %p5178_p9 }
  0xc6   : > { %5188 = shalt.err (!%p5185_p2)
}
  0xc7   : > { %s5689_s30 = smov 128   ;;  %s5690_s22 = smov 8  }
  0xc8   : > { %4892 = dma.hbm_to_vmem [thread:$0]  (%p7124_p10), %s6098_s0, 512, %s6101_s29, %s7052_s28, %s5689_s30, %s5689_s30, %s5690_s22  }
  0xc9   : > { %s7126_s12 = sld [smem:[#allocation73_spill]]  ;;  %s930_s6 = scalar_lea.vmem [#allocation18], %s6089_s27 }
  0xca   : > { %s937_s16 = sshll.u32 %s930_s6, 4  ;;  %s7053_s10 = scalar_lea.sflag [#allocation19], %s5993_s1  ;;  %s6137_s16 = int_to_ptr.vmem [resolvable:$true] %s937_s16 }
  0xcf   : > { %s6134_s20 = scalar_lea.hbm %s7126_s12, %s6092_s25  ;;  %s5193_s4 = scalar_lea.hbm %s7126_s12, 1024 }
  0xd0   : > { %s5189_s23 = scalar_lea.hbm %s6134_s20, 512  ;;  %p5194_p0 = scmp.lt.u32.totalorder %s6134_s20, %s7126_s12 }
  0xd1   : > { %p5190_p8 = scmp.ne.s32.totalorder %s6134_s20, %s5189_s23  ;;  %p5195_p4 = scmp.lt.u32.totalorder %s5193_s4, %s5189_s23 }
  0xd2   : > { %p5197_p13 = scmp.lt.u32.totalorder %s5189_s23, %s6134_s20 }
  0xd3   : > { %p5191_p1 = pnand %p5190_p8, %p7124_p10  ;;  %p5196_p7 = por %p5195_p4, %p5194_p0 }
  0xd5   : > { %p5192_p6 = pneg %p5191_p1  ;;  %p5198_p12 = por %p5197_p13, %p5196_p7 }
  0xd7   : > { %p5199_p9 = pnand %p5198_p12, %p5192_p6 }
  0xd9   : > { %5202 = shalt.err (!%p5199_p9)
}
  0xda   : > { %s5203_s6 = scalar_lea.vmem %s6137_s16, 512  ;;  %s5691_s0 = smov [#allocation18]  }
  0xdb   : > { %p5204_p5 = scmp.ne.s32.totalorder %s6137_s16, %s5203_s6  ;;  %s5207_s29 = sshll.u32 %s5691_s0, 4  ;;  %s5208_s29 = int_to_ptr.vmem [resolvable:$false] %s5207_s29 }
  0xdc   : > { %s5209_s28 = scalar_lea.vmem %s5208_s29, 1024  ;;  %p5210_p2 = scmp.lt.s32.totalorder %s6137_s16, %s5208_s29 }
  0xdd   : > { %p5205_p3 = pnand %p5204_p5, %p7124_p10  ;;  %p5211_p8 = scmp.lt.s32.totalorder %s5209_s28, %s5203_s6 }
  0xdf   : > { %p5206_p11 = pneg %p5205_p3  ;;  %p5212_p1 = por %p5211_p8, %p5210_p2 }
  0xe1   : > { %p5213_p0 = pnand %p5212_p1, %p5206_p11 }
  0xe3   : > { %5216 = shalt.err (!%p5213_p0)
}
  0xe4   : > { %4894 = dma.hbm_to_vmem [thread:$0]  (%p7124_p10), %s6134_s20, 512, %s6137_s16, %s7053_s10, %s5689_s30, %s5689_s30, %s5690_s22  }
  0xe5   : > { %s7127_s14 = sld [smem:[#allocation75_spill]]  ;;  %s968_s6 = scalar_lea.vmem [#allocation21], %s6089_s27 }
  0xe6   : > { %s975_s0 = sshll.u32 %s968_s6, 4  ;;  %s7055_s29 = scalar_lea.sflag [#allocation22], %s5993_s1  ;;  %s6173_s0 = int_to_ptr.vmem [resolvable:$true] %s975_s0 }
  0xeb   : > { %s6170_s26 = scalar_lea.hbm %s7127_s14, %s6092_s25  ;;  %s5221_s23 = scalar_lea.hbm %s7127_s14, 1024 }
  0xec   : > { %s5217_s28 = scalar_lea.hbm %s6170_s26, 512  ;;  %p5222_p13 = scmp.lt.u32.totalorder %s6170_s26, %s7127_s14 }
  0xed   : > { %p5218_p6 = scmp.ne.s32.totalorder %s6170_s26, %s5217_s28  ;;  %p5223_p12 = scmp.lt.u32.totalorder %s5221_s23, %s5217_s28 }
  0xee   : > { %p5225_p5 = scmp.lt.u32.totalorder %s5217_s28, %s6170_s26 }
  0xef   : > { %p5219_p4 = pnand %p5218_p6, %p7124_p10  ;;  %p5224_p9 = por %p5223_p12, %p5222_p13 }
  0xf1   : > { %p5220_p7 = pneg %p5219_p4  ;;  %p5226_p3 = por %p5225_p5, %p5224_p9 }
  0xf3   : > { %p5227_p11 = pnand %p5226_p3, %p5220_p7 }
  0xf5   : > { %5230 = shalt.err (!%p5227_p11)
}
  0xf6   : > { %s5231_s27 = scalar_lea.vmem %s6173_s0, 512  ;;  %s5692_s6 = smov [#allocation21]  }
  0xf7   : > { %p5232_p2 = scmp.ne.s32.totalorder %s6173_s0, %s5231_s27  ;;  %s5235_s20 = sshll.u32 %s5692_s6, 4  ;;  %s5236_s20 = int_to_ptr.vmem [resolvable:$false] %s5235_s20 }
  0xf8   : > { %s5237_s16 = scalar_lea.vmem %s5236_s20, 1024  ;;  %p5238_p0 = scmp.lt.s32.totalorder %s6173_s0, %s5236_s20 }
  0xf9   : > { %p5233_p8 = pnand %p5232_p2, %p7124_p10  ;;  %p5239_p6 = scmp.lt.s32.totalorder %s5237_s16, %s5231_s27 }
  0xfb   : > { %p5234_p1 = pneg %p5233_p8  ;;  %p5240_p4 = por %p5239_p6, %p5238_p0 }
  0xfd   : > { %p5241_p13 = pnand %p5240_p4, %p5234_p1 }
  0xff   : > { %5244 = shalt.err (!%p5241_p13)
}
 0x100   : > { %4896 = dma.hbm_to_vmem [thread:$0]  (%p7124_p10), %s6170_s26, 512, %s6173_s0, %s7055_s29, %s5689_s30, %s5689_s30, %s5690_s22  }
 0x101   : > { %s7128_s25 = sld [smem:[#allocation61_spill]]  ;;  %s745_s27 = scalar_lea.vmem [#allocation3], %s5990_s24 }
 0x102   : > { %s752_s6 = sshll.u32 %s745_s27, 4  ;;  %s7129_s20 = sand.u32 1, %s5663_s2   ;;  %s753_s6 = int_to_ptr.vmem [resolvable:$true] %s752_s6 }
 0x103   : > { %s742_s16 = scalar_lea.sflag [#allocation4], %s7129_s20  ;;  %p7130_p12 = scmp.ne.s32.totalorder %s7104_s8, 0 }
 0x107   : > { %s6206_s4 = scalar_lea.hbm %s7128_s25, %s5986_s5  ;;  %s5249_s26 = scalar_lea.hbm %s7128_s25, 256 }
 0x108   : > { %s5245_s10 = scalar_lea.hbm %s6206_s4, 128  ;;  %p5250_p3 = scmp.lt.u32.totalorder %s6206_s4, %s7128_s25 }
 0x109   : > { %p5246_p7 = scmp.ne.s32.totalorder %s6206_s4, %s5245_s10  ;;  %p5251_p11 = scmp.lt.u32.totalorder %s5249_s26, %s5245_s10 }
 0x10a   : > { %p5253_p8 = scmp.lt.u32.totalorder %s5245_s10, %s6206_s4 }
 0x10b   : > { %p5247_p9 = pnand %p5246_p7, %p7130_p12  ;;  %p5252_p2 = por %p5251_p11, %p5250_p3 }
 0x10d   : > { %p5248_p5 = pneg %p5247_p9  ;;  %p5254_p1 = por %p5253_p8, %p5252_p2 }
 0x10f   : > { %p5255_p0 = pnand %p5254_p1, %p5248_p5 }
 0x111   : > { %5258 = shalt.err (!%p5255_p0)
}
 0x112   : > { %s5259_s23 = scalar_lea.vmem %s753_s6, 128  ;;  %s5693_s27 = smov [#allocation3]  }
 0x113   : > { %p5260_p6 = scmp.ne.s32.totalorder %s753_s6, %s5259_s23  ;;  %s5263_s20 = sshll.u32 %s5693_s27, 4  ;;  %s5264_s20 = int_to_ptr.vmem [resolvable:$false] %s5263_s20 }
 0x114   : > { %s5265_s30 = scalar_lea.vmem %s5264_s20, 256  ;;  %p5266_p7 = scmp.lt.s32.totalorder %s753_s6, %s5264_s20 }
 0x115   : > { %p5261_p4 = pnand %p5260_p6, %p7130_p12  ;;  %p5267_p9 = scmp.lt.s32.totalorder %s5265_s30, %s5259_s23 }
 0x117   : > { %p5262_p13 = pneg %p5261_p4  ;;  %p5268_p10 = por %p5267_p9, %p5266_p7 }
 0x119   : > { %p5269_p3 = pnand %p5268_p10, %p5262_p13 }
 0x11b   : > { %5272 = shalt.err (!%p5269_p3)
}
 0x11c   : > { %4885 = dma.hbm_to_vmem [thread:$0]  (%p7130_p12), %s6206_s4, 128, %s753_s6, %s742_s16  }
 0x11d   : > { %s7131_s26 = sld [smem:[#allocation63_spill]]  ;;  %s781_s28 = scalar_lea.vmem [#allocation8], %s5990_s24 }
 0x11e   : > { %s788_s23 = sshll.u32 %s781_s28, 4  ;;  %s789_s23 = int_to_ptr.vmem [resolvable:$true] %s788_s23 }
 0x123   : > { %s7132_s29 = smov %s7131_s26  ;;  %s6232_s0 = scalar_lea.hbm %s7131_s26, %s5986_s5 }
 0x124   : > { %s5273_s27 = scalar_lea.hbm %s6232_s0, 128  ;;  %s5277_s4 = scalar_lea.hbm %s7132_s29, 256 }
 0x125   : > { %p5274_p10 = scmp.ne.s32.totalorder %s6232_s0, %s5273_s27  ;;  %p5278_p2 = scmp.lt.u32.totalorder %s6232_s0, %s7132_s29 }
 0x126   : > { %p5279_p8 = scmp.lt.u32.totalorder %s5277_s4, %s5273_s27  ;;  %p5281_p0 = scmp.lt.u32.totalorder %s5273_s27, %s6232_s0 }
 0x127   : > { %p5275_p5 = pnand %p5274_p10, %p7130_p12 }
 0x128   : > { %p5280_p1 = por %p5279_p8, %p5278_p2 }
 0x129   : > { %p5276_p11 = pneg %p5275_p5 }
 0x12a   : > { %p5282_p6 = por %p5281_p0, %p5280_p1 }
 0x12c   : > { %p5283_p4 = pnand %p5282_p6, %p5276_p11 }
 0x12e   : > { %5286 = shalt.err (!%p5283_p4)
}
 0x12f   : > { %s5287_s5 = scalar_lea.vmem %s789_s23, 128  ;;  %s5694_s24 = smov [#allocation8]  }
 0x130   : > { %p5288_p13 = scmp.ne.s32.totalorder %s789_s23, %s5287_s5  ;;  %s5291_s10 = sshll.u32 %s5694_s24, 4  ;;  %s5292_s10 = int_to_ptr.vmem [resolvable:$false] %s5291_s10 }
 0x131   : > { %s5293_s22 = scalar_lea.vmem %s5292_s10, 256  ;;  %p5294_p3 = scmp.lt.s32.totalorder %s789_s23, %s5292_s10 }
 0x132   : > { %p5289_p7 = pnand %p5288_p13, %p7130_p12  ;;  %p5295_p10 = scmp.lt.s32.totalorder %s5293_s22, %s5287_s5 }
 0x134   : > { %p5290_p9 = pneg %p5289_p7  ;;  %p5296_p5 = por %p5295_p10, %p5294_p3 }
 0x136   : > { %p5297_p2 = pnand %p5296_p5, %p5290_p9 }
 0x138   : > { %5300 = shalt.err (!%p5297_p2)
}
 0x139   : > { %s7133_s26 = scalar_lea.sflag [#allocation7], %s5993_s1  ;;  %s7134_s20 = sld [smem:[#allocation66_spill]] }
 0x13a   : > { %4887 = dma.hbm_to_vmem [thread:$0]  (%p7130_p12), %s6232_s0, 128, %s789_s23, %s7133_s26  }
 0x13b   : > { %s824_s4 = scalar_lea.vmem [#allocation11], %s6030_s21  ;;  %p7135_p8 = scmp.ne.s32.totalorder %s7110_s19, 0 }
 0x13c   : > { %s831_s6 = sshll.u32 %s824_s4, 4  ;;  %s832_s6 = int_to_ptr.vmem [resolvable:$true] %s831_s6 }
 0x13f   : > { %s6258_s30 = scalar_lea.hbm %s7134_s20, %s6035_s18  ;;  %s5305_s0 = scalar_lea.hbm %s7134_s20, 32 }
 0x140   : > { %s5301_s8 = scalar_lea.hbm %s6258_s30, 16  ;;  %p5306_p12 = scmp.lt.u32.totalorder %s6258_s30, %s7134_s20 }
 0x141   : > { %p5302_p11 = scmp.ne.s32.totalorder %s6258_s30, %s5301_s8  ;;  %p5307_p6 = scmp.lt.u32.totalorder %s5305_s0, %s5301_s8 }
 0x142   : > { %p5309_p13 = scmp.lt.u32.totalorder %s5301_s8, %s6258_s30 }
 0x143   : > { %p5303_p1 = pnand %p5302_p11, %p7135_p8  ;;  %p5308_p4 = por %p5307_p6, %p5306_p12 }
 0x145   : > { %p5304_p0 = pneg %p5303_p1  ;;  %p5310_p7 = por %p5309_p13, %p5308_p4 }
 0x147   : > { %p5311_p9 = pnand %p5310_p7, %p5304_p0 }
 0x149   : > { %5314 = shalt.err (!%p5311_p9)
}
 0x14a   : > { %s5315_s10 = scalar_lea.vmem %s832_s6, 16  ;;  %s5695_s22 = smov [#allocation11]  }
 0x14b   : > { %p5316_p3 = scmp.ne.s32.totalorder %s832_s6, %s5315_s10  ;;  %s5319_s26 = sshll.u32 %s5695_s22, 4  ;;  %s5320_s26 = int_to_ptr.vmem [resolvable:$false] %s5319_s26 }
 0x14c   : > { %s5321_s28 = scalar_lea.vmem %s5320_s26, 32  ;;  %p5322_p2 = scmp.lt.s32.totalorder %s832_s6, %s5320_s26 }
 0x14d   : > { %p5317_p10 = pnand %p5316_p3, %p7135_p8  ;;  %p5323_p11 = scmp.lt.s32.totalorder %s5321_s28, %s5315_s10 }
 0x14f   : > { %p5318_p5 = pneg %p5317_p10  ;;  %p5324_p1 = por %p5323_p11, %p5322_p2 }
 0x151   : > { %p5325_p6 = pnand %p5324_p1, %p5318_p5 }
 0x153   : > { %5328 = shalt.err (!%p5325_p6)
}
 0x154   : > { %s7136_s27 = scalar_lea.sflag [#allocation10], %s5993_s1  ;;  %s7137_s9 = sld [smem:[#allocation70_spill]] }
 0x155   : > { %4889 = dma.hbm_to_vmem [thread:$0]  (%p7135_p8), %s6258_s30, 16, %s832_s6, %s7136_s27  }
 0x156   : > { %s874_s5 = scalar_lea.vmem [#allocation14], %s6030_s21 }
 0x157   : > { %s881_s0 = sshll.u32 %s874_s5, 4  ;;  %s882_s0 = int_to_ptr.vmem [resolvable:$true] %s881_s0 }
 0x15a   : > { %s6284_s16 = scalar_lea.hbm %s7137_s9, %s6035_s18  ;;  %s5333_s30 = scalar_lea.hbm %s7137_s9, 32 }
 0x15b   : > { %s5329_s23 = scalar_lea.hbm %s6284_s16, 16  ;;  %p5334_p13 = scmp.lt.u32.totalorder %s6284_s16, %s7137_s9 }
 0x15c   : > { %p5330_p0 = scmp.ne.s32.totalorder %s6284_s16, %s5329_s23  ;;  %p5335_p7 = scmp.lt.u32.totalorder %s5333_s30, %s5329_s23 }
 0x15d   : > { %p5337_p3 = scmp.lt.u32.totalorder %s5329_s23, %s6284_s16 }
 0x15e   : > { %p5331_p12 = pnand %p5330_p0, %p7135_p8  ;;  %p5336_p9 = por %p5335_p7, %p5334_p13 }
 0x160   : > { %p5332_p4 = pneg %p5331_p12  ;;  %p5338_p10 = por %p5337_p3, %p5336_p9 }
 0x162   : > { %p5339_p5 = pnand %p5338_p10, %p5332_p4 }
 0x164   : > { %5342 = shalt.err (!%p5339_p5)
}
 0x165   : > { %s5343_s26 = scalar_lea.vmem %s882_s0, 16  ;;  %s5696_s28 = smov [#allocation14]  }
 0x166   : > { %p5344_p2 = scmp.ne.s32.totalorder %s882_s0, %s5343_s26  ;;  %s5347_s27 = sshll.u32 %s5696_s28, 4  ;;  %s5348_s27 = int_to_ptr.vmem [resolvable:$false] %s5347_s27 }
 0x167   : > { %s5349_s4 = scalar_lea.vmem %s5348_s27, 32  ;;  %p5350_p6 = scmp.lt.s32.totalorder %s882_s0, %s5348_s27 }
 0x168   : > { %p5345_p11 = pnand %p5344_p2, %p7135_p8  ;;  %p5351_p0 = scmp.lt.s32.totalorder %s5349_s4, %s5343_s26 }
 0x16a   : > { %p5346_p1 = pneg %p5345_p11  ;;  %p5352_p12 = por %p5351_p0, %p5350_p6 }
 0x16c   : > { %p5353_p7 = pnand %p5352_p12, %p5346_p1 }
 0x16e   : > { %5356 = shalt.err (!%p5353_p7)
}
 0x16f   : > { %s7138_s8 = scalar_lea.sflag [#allocation13], %s5993_s1  ;;  %s7139_s11 = sld [smem:[#allocation72_spill]] }
 0x170   : > { %4891 = dma.hbm_to_vmem [thread:$0]  (%p7135_p8), %s6284_s16, 16, %s882_s0, %s7138_s8  }
 0x171   : > { %s912_s10 = scalar_lea.vmem [#allocation17], %s6030_s21 }
 0x172   : > { %s919_s30 = sshll.u32 %s912_s10, 4  ;;  %s920_s30 = int_to_ptr.vmem [resolvable:$true] %s919_s30 }
 0x175   : > { %s6310_s24 = scalar_lea.hbm %s7139_s11, %s6035_s18  ;;  %s5361_s16 = scalar_lea.hbm %s7139_s11, 32 }
 0x176   : > { %s5357_s6 = scalar_lea.hbm %s6310_s24, 16  ;;  %p5362_p3 = scmp.lt.u32.totalorder %s6310_s24, %s7139_s11 }
 0x177   : > { %p5358_p4 = scmp.ne.s32.totalorder %s6310_s24, %s5357_s6  ;;  %p5363_p10 = scmp.lt.u32.totalorder %s5361_s16, %s5357_s6 }
 0x178   : > { %p5365_p2 = scmp.lt.u32.totalorder %s5357_s6, %s6310_s24 }
 0x179   : > { %p5359_p13 = pnand %p5358_p4, %p7135_p8  ;;  %p5364_p5 = por %p5363_p10, %p5362_p3 }
 0x17b   : > { %p5360_p9 = pneg %p5359_p13  ;;  %p5366_p11 = por %p5365_p2, %p5364_p5 }
 0x17d   : > { %p5367_p1 = pnand %p5366_p11, %p5360_p9 }
 0x17f   : > { %5370 = shalt.err (!%p5367_p1)
}
 0x180   : > { %s5371_s27 = scalar_lea.vmem %s920_s30, 16  ;;  %s5697_s4 = smov [#allocation17]  }
 0x181   : > { %p5372_p6 = scmp.ne.s32.totalorder %s920_s30, %s5371_s27  ;;  %s5375_s8 = sshll.u32 %s5697_s4, 4  ;;  %s5376_s8 = int_to_ptr.vmem [resolvable:$false] %s5375_s8 }
 0x182   : > { %s5377_s5 = scalar_lea.vmem %s5376_s8, 32  ;;  %p5378_p7 = scmp.lt.s32.totalorder %s920_s30, %s5376_s8 }
 0x183   : > { %p5373_p0 = pnand %p5372_p6, %p7135_p8  ;;  %p5379_p4 = scmp.lt.s32.totalorder %s5377_s5, %s5371_s27 }
 0x185   : > { %p5374_p12 = pneg %p5373_p0  ;;  %p5380_p13 = por %p5379_p4, %p5378_p7 }
 0x187   : > { %p5381_p3 = pnand %p5380_p13, %p5374_p12 }
 0x189   : > { %5384 = shalt.err (!%p5381_p3)
}
 0x18a   : > { %s7140_s23 = scalar_lea.sflag [#allocation16], %s5993_s1  ;;  %s7141_s13 = sld [smem:[#allocation74_spill]] }
 0x18b   : > { %4893 = dma.hbm_to_vmem [thread:$0]  (%p7135_p8), %s6310_s24, 16, %s920_s30, %s7140_s23  }
 0x18c   : > { %s950_s26 = scalar_lea.vmem [#allocation20], %s6030_s21 }
 0x18d   : > { %s957_s16 = sshll.u32 %s950_s26, 4  ;;  %s958_s16 = int_to_ptr.vmem [resolvable:$true] %s957_s16 }
 0x190   : > { %s6336_s22 = scalar_lea.hbm %s7141_s13, %s6035_s18  ;;  %s5389_s24 = scalar_lea.hbm %s7141_s13, 32 }
 0x191   : > { %s5385_s0 = scalar_lea.hbm %s6336_s22, 16  ;;  %p5390_p2 = scmp.lt.u32.totalorder %s6336_s22, %s7141_s13 }
 0x192   : > { %p5386_p9 = scmp.ne.s32.totalorder %s6336_s22, %s5385_s0  ;;  %p5391_p11 = scmp.lt.u32.totalorder %s5389_s24, %s5385_s0 }
 0x193   : > { %p5393_p6 = scmp.lt.u32.totalorder %s5385_s0, %s6336_s22 }
 0x194   : > { %p5387_p10 = pnand %p5386_p9, %p7135_p8  ;;  %p5392_p1 = por %p5391_p11, %p5390_p2 }
 0x196   : > { %p5388_p5 = pneg %p5387_p10  ;;  %p5394_p0 = por %p5393_p6, %p5392_p1 }
 0x198   : > { %p5395_p12 = pnand %p5394_p0, %p5388_p5 }
 0x19a   : > { %5398 = shalt.err (!%p5395_p12)
}
 0x19b   : > { %s5399_s8 = scalar_lea.vmem %s958_s16, 16  ;;  %s5698_s5 = smov [#allocation20]  }
 0x19c   : > { %p5400_p7 = scmp.ne.s32.totalorder %s958_s16, %s5399_s8  ;;  %s5403_s23 = sshll.u32 %s5698_s5, 4  ;;  %s5404_s23 = int_to_ptr.vmem [resolvable:$false] %s5403_s23 }
 0x19d   : > { %s5405_s10 = scalar_lea.vmem %s5404_s23, 32  ;;  %p5406_p3 = scmp.lt.s32.totalorder %s958_s16, %s5404_s23 }
 0x19e   : > { %p5401_p4 = pnand %p5400_p7, %p7135_p8  ;;  %p5407_p9 = scmp.lt.s32.totalorder %s5405_s10, %s5399_s8 }
 0x1a0   : > { %p5402_p13 = pneg %p5401_p4  ;;  %p5408_p10 = por %p5407_p9, %p5406_p3 }
 0x1a2   : > { %p5409_p2 = pnand %p5408_p10, %p5402_p13 }
 0x1a4   : > { %5412 = shalt.err (!%p5409_p2)
}
 0x1a5   : > { %s7142_s6 = scalar_lea.sflag [#allocation19], %s5993_s1  ;;  %s7143_s15 = sld [smem:[#allocation76_spill]] }
 0x1a6   : > { %4895 = dma.hbm_to_vmem [thread:$0]  (%p7135_p8), %s6336_s22, 16, %s958_s16, %s7142_s6  }
 0x1a7   : > { %s988_s27 = scalar_lea.vmem [#allocation23], %s6030_s21 }
 0x1a8   : > { %s995_s24 = sshll.u32 %s988_s27, 4  ;;  %s996_s24 = int_to_ptr.vmem [resolvable:$true] %s995_s24 }
 0x1ab   : > { %s6362_s28 = scalar_lea.hbm %s7143_s15, %s6035_s18  ;;  %s5417_s22 = scalar_lea.hbm %s7143_s15, 32 }
 0x1ac   : > { %s5413_s30 = scalar_lea.hbm %s6362_s28, 16  ;;  %p5418_p6 = scmp.lt.u32.totalorder %s6362_s28, %s7143_s15 }
 0x1ad   : > { %p5414_p5 = scmp.ne.s32.totalorder %s6362_s28, %s5413_s30  ;;  %p5419_p0 = scmp.lt.u32.totalorder %s5417_s22, %s5413_s30 }
 0x1ae   : > { %p5421_p7 = scmp.lt.u32.totalorder %s5413_s30, %s6362_s28 }
 0x1af   : > { %p5415_p11 = pnand %p5414_p5, %p7135_p8  ;;  %p5420_p12 = por %p5419_p0, %p5418_p6 }
 0x1b1   : > { %p5416_p1 = pneg %p5415_p11  ;;  %p5422_p4 = por %p5421_p7, %p5420_p12 }
 0x1b3   : > { %p5423_p13 = pnand %p5422_p4, %p5416_p1 }
 0x1b5   : > { %5426 = shalt.err (!%p5423_p13)
}
 0x1b6   : > { %s5427_s23 = scalar_lea.vmem %s996_s24, 16  ;;  %s5699_s10 = smov [#allocation23]  }
 0x1b7   : > { %p5428_p3 = scmp.ne.s32.totalorder %s996_s24, %s5427_s23  ;;  %s5431_s6 = sshll.u32 %s5699_s10, 4  ;;  %s5432_s6 = int_to_ptr.vmem [resolvable:$false] %s5431_s6 }
 0x1b8   : > { %s5433_s26 = scalar_lea.vmem %s5432_s6, 32  ;;  %p5434_p2 = scmp.lt.s32.totalorder %s996_s24, %s5432_s6 }
 0x1b9   : > { %p5429_p9 = pnand %p5428_p3, %p7135_p8  ;;  %p5435_p5 = scmp.lt.s32.totalorder %s5433_s26, %s5427_s23 }
 0x1bb   : > { %p5430_p10 = pneg %p5429_p9  ;;  %p5436_p11 = por %p5435_p5, %p5434_p2 }
 0x1bd   : > { %p5437_p0 = pnand %p5436_p11, %p5430_p10 }
 0x1bf   : > { %5440 = shalt.err (!%p5437_p0)
}
 0x1c0   : > { %s7144_s0 = scalar_lea.sflag [#allocation22], %s5993_s1  ;;  %s7145_s17 = sld [smem:[#allocation78_spill]] }
 0x1c1   : > { %4897 = dma.hbm_to_vmem [thread:$0]  (%p7135_p8), %s6362_s28, 16, %s996_s24, %s7144_s0  }
 0x1c2   : > { %s1013_s8 = scalar_lea.vmem [#allocation24], %s6030_s21  ;;  %s1011_s16 = scalar_lea.sflag [#allocation25], %s6030_s21 }
 0x1c3   : > { %s1020_s22 = sshll.u32 %s1013_s8, 4  ;;  %s1021_s22 = int_to_ptr.vmem [resolvable:$true] %s1020_s22 }
 0x1c6   : > { %s6388_s4 = scalar_lea.hbm %s7145_s17, %s6035_s18  ;;  %s5445_s24 = scalar_lea.hbm %s7145_s17, 32 }
 0x1c7   : > { %s5441_s1 = scalar_lea.hbm %s6388_s4, 16  ;;  %p5446_p7 = scmp.lt.u32.totalorder %s6388_s4, %s7145_s17 }
 0x1c8   : > { %p5442_p1 = scmp.ne.s32.totalorder %s6388_s4, %s5441_s1  ;;  %p5447_p4 = scmp.lt.u32.totalorder %s5445_s24, %s5441_s1 }
 0x1c9   : > { %p5449_p3 = scmp.lt.u32.totalorder %s5441_s1, %s6388_s4 }
 0x1ca   : > { %p5443_p6 = pnand %p5442_p1, %p7135_p8  ;;  %p5448_p13 = por %p5447_p4, %p5446_p7 }
 0x1cc   : > { %p5444_p12 = pneg %p5443_p6  ;;  %p5450_p9 = por %p5449_p3, %p5448_p13 }
 0x1ce   : > { %p5451_p10 = pnand %p5450_p9, %p5444_p12 }
 0x1d0   : > { %5454 = shalt.err (!%p5451_p10)
}
 0x1d1   : > { %s5455_s21 = scalar_lea.vmem %s1021_s22, 16  ;;  %s5700_s10 = smov [#allocation24]  }
 0x1d2   : > { %p5456_p2 = scmp.ne.s32.totalorder %s1021_s22, %s5455_s21  ;;  %s5459_s6 = sshll.u32 %s5700_s10, 4  ;;  %s5460_s6 = int_to_ptr.vmem [resolvable:$false] %s5459_s6 }
 0x1d3   : > { %s5461_s26 = scalar_lea.vmem %s5460_s6, 32  ;;  %p5462_p0 = scmp.lt.s32.totalorder %s1021_s22, %s5460_s6 }
 0x1d4   : > { %p5457_p5 = pnand %p5456_p2, %p7135_p8  ;;  %p5463_p1 = scmp.lt.s32.totalorder %s5461_s26, %s5455_s21 }
 0x1d6   : > { %p5458_p11 = pneg %p5457_p5  ;;  %p5464_p6 = por %p5463_p1, %p5462_p0 }
 0x1d8   : > { %p5465_p4 = pnand %p5464_p6, %p5458_p11 }
 0x1da   : > { %5468 = shalt.err (!%p5465_p4)
}
 0x1db   : > { %4898 = dma.hbm_to_vmem [thread:$0]  (%p7135_p8), %s6388_s4, 16, %s1021_s22, %s1011_s16  }
 0x1dc PF: > { %p4473_p12 = scmp.ge.s32.totalorder %s5683_s3, 1  ;;  %p1039_p7 = scmp.lt.s32.totalorder %s5683_s3, 5 }
 0x1de   : > { %p1040_p13 = pnand %p4473_p12, %p1039_p7 }
 0x1e0   : > { %1043 = sbr.rel (%p1040_p13) target bundleno = 7883 (0x1ecb), region = 108 }
 0x1e7   : > { %s7146_s0 = sld [smem:[#allocation44_spill]]  ;;  %s7147_s27 = sld [smem:[#allocation54_spill]] }
 0x1ed   : > { %s6412_s30 = sand.u32 1, %s7146_s0   ;;  %p7149_p3 = scmp.ne.s32.totalorder %s7147_s27, 0 }
 0x1ee   : > { %7148 = sst [smem:[#allocation60_spill]] %s6412_s30  ;;  %s6415_s8 = sshll.u32 %s6412_s30, 3 }
 0x1ef   : > { %s1046_s1 = scalar_lea.sflag [#allocation4], %s6412_s30 }
 0x1f0   : > { %5598 = dma.done.wait (%p7149_p3), %s1046_s1, 128  }
 0x1f1   : > { %5600 = vsyncadd (%p7149_p3), %s1046_s1, 4294967168  ;;  %s7150_s4 = sld [smem:[#allocation51_spill]] }
 0x1f7   : > { %s6424_s22 = sand.u32 1, %s7150_s4  }
 0x1f8   : > { %s1055_s16 = scalar_lea.sflag [#allocation7], %s6424_s22 }
 0x1f9   : > { %5602 = dma.done.wait (%p7149_p3), %s1055_s16, 256  }
 0x1fa   : > { %5604 = vsyncadd (%p7149_p3), %s1055_s16, 4294967040  ;;  %s1073_s24 = scalar_lea.sflag [#allocation10], %s6424_s22 }
 0x1fb   : > { %5606 = dma.done.wait (%p7149_p3), %s1073_s24, 128  }
 0x1fc   : > { %5608 = vsyncadd (%p7149_p3), %s1073_s24, 4294967168  ;;  %s7151_s18 = sld [smem:[#allocation41_spill]] }
 0x1fd   : > { %s7152_s21 = sld [smem:[#allocation57_spill]] }
 0x202   : > { %s6440_s10 = sand.u32 1, %s7151_s18  }
 0x203   : > { %p7153_p8 = scmp.ne.s32.totalorder %s7152_s21, 0 }
 0x205   : > { %5610 = dma.done.wait (%p7153_p8), %s1073_s24, 16  }
 0x206   : > { %5612 = vsyncadd (%p7153_p8), %s1073_s24, 4294967280  ;;  %s1090_s26 = scalar_lea.sflag [#allocation13], %s6424_s22 }
 0x207   : > { %5614 = dma.done.wait (%p7153_p8), %s1090_s26, 32  }
 0x208   : > { %5616 = vsyncadd (%p7153_p8), %s1090_s26, 4294967264  ;;  %s4478_s27 = sshll.u32 %s6440_s10, 5  ;;  %s1106_s4 = scalar_lea.sflag [#allocation16], %s6424_s22 }
 0x209   : > { %s6456_s16 = scalar_lea.vmem [#allocation15], %s4478_s27 }
 0x20a   : > { %5618 = dma.done.wait (%p7153_p8), %s1106_s4, 528  }
 0x20b   : > { %5620 = vsyncadd (%p7153_p8), %s1106_s4, 4294966768  ;;  %s1123_s18 = scalar_lea.sflag [#allocation19], %s6424_s22  ;;  %s6464_s26 = scalar_lea.vmem [#allocation18], %s4478_s27 }
 0x20c   : > { %5622 = dma.done.wait (%p7153_p8), %s1123_s18, 528  }
 0x20d   : > { %5624 = vsyncadd (%p7153_p8), %s1123_s18, 4294966768  ;;  %s1140_s1 = scalar_lea.sflag [#allocation22], %s6424_s22  ;;  %s6472_s5 = scalar_lea.vmem [#allocation21], %s4478_s27 }
 0x20e   : > { %5626 = dma.done.wait (%p7153_p8), %s1140_s1, 528  }
 0x20f   : > { %5628 = vsyncadd (%p7153_p8), %s1140_s1, 4294966768  ;;  %s1157_s24 = scalar_lea.sflag [#allocation25], %s6440_s10 }
 0x210   : > { %5630 = dma.done.wait (%p7153_p8), %s1157_s24, 16  }
 0x211   : > { %5632 = vsyncadd (%p7153_p8), %s1157_s24, 4294967280  ;;  %s7154_s27 = sld [smem:[#allocation46_spill]]  ;;  %s4482_s18 = sshll.u32 %s6412_s30, 5 }
 0x212   : > { %s7155_s9 = sld [smem:[#allocation65_spill]]  ;;  %s7156_s12 = sld [smem:[#allocation67_spill]] }
 0x213   : > { %s7157_s14 = sld [smem:[#allocation69_spill]]  ;;  %s7159_s19 = sld [smem:[#allocation79_spill]] }
 0x214   : > { %s7158_s25 = sld [smem:[#allocation77_spill]]  ;;  %s1305_s30 = scalar_lea.vmem [#allocation26], %s6415_s8 }
 0x215   : > { %s6517_s21 = scalar_lea.vmem [#allocation27], %s4482_s18 }
 0x217   : > { %p1320_p9 = scmp.lt.s32.totalorder %s7154_s27, 1  ;;  %p4494_p10 = scmp.ne.s32.totalorder %s7154_s27, 0 }
 0x218   : > { %s7161_s17 = scalar_lea.vmem (!%p4494_p10), [#allocation3], %s6415_s8  ;;  %vm1353_vm0 = vcmask (!%p4494_p10), 261120  }
 0x219   : > { %s1321_s23 = scalar_select %p1320_p9, %s7154_s27, 1 }
 0x21a   : > { %v1352_v0 = vld [vmem:[%s7161_s17] sm:$0xff] (!%p4494_p10) }
 0x21b   : > { %s4561_s1 = sshll.u32 %s1321_s23, 5  ;;  %s4564_s28 = sshll.u32 %s1321_s23, 6  ;;  %1354 = vst.msk [vmem:[#allocation2] sm:$0xff] (!%p4494_p10), %vm1353_vm0, %v1352_v0 }
 0x21c   : > { %s1324_s4 = scalar_lea.vmem %s7155_s9, %s4561_s1  ;;  %s6494_s13 = scalar_lea.vmem %s7156_s12, %s4561_s1 }
 0x21d   : > { %s6499_s15 = scalar_lea.vmem %s7157_s14, %s4561_s1  ;;  %s6504_s29 = scalar_lea.vmem %s7158_s25, %s4564_s28 }
 0x21e   : > { %s4492_s7 = sshll.u32 %s1321_s23, 2  ;;  %s7160_s12 = sld [smem:[#allocation80_spill]] }
 0x21f   : > { %s6509_s9 = scalar_lea.vmem %s7159_s19, %s4492_s7  ;;  %s6519_s14 = scalar_lea.vmem [#allocation29], %s4482_s18 }
 0x220   : > { %1351 = sbr.rel (%p4494_p10) target bundleno = 551 (0x227), region = 168 }
 0x224   : > { %s6514_s0 = scalar_lea.vmem %s7160_s12, %s4492_s7 }
 0x227 PF: > { %v1363_v1 = vld [vmem:[%s1324_s4] sm:$0xff]  ;;  %v1364_v2 = vld [vmem:[%s1324_s4 + $0x8] sm:$0xff]  ;;  %v1365_v3 = vld [vmem:[%s1324_s4 + $0x10] sm:$0xff]  ;;  %v5701_v4 = vmov 0.0|0.0   ;;  %vm5702_vm1 = vmmov 0   ;;  %v5703_v7 = vmov 0.0  }
 0x228   : > { %4843 = vmatprep.subr.bf16.mxu0 %v5701_v4  ;;  %v4844_v5 = vpack.c.bf16 %v1364_v2, %v1363_v1  ;;  %v1366_v6 = vld [vmem:[%s1324_s4 + $0x18] sm:$0xff]  ;;  %4657 = vmatprep.mubr.msk.f32.mxu0 %vm5702_vm1, %v5703_v7  ;;  %v6531_v9 = vld [vmem:[#allocation2] sm:$0xff]  ;;  %vm1374_vm2 = vcmask 261120   ;;  %s7162_s2 = scalar_lea.vmem [#allocation11], %s6440_s10  ;;  %s5704_s7 = smov 64   ;;  %vm1462_vm3 = vcmask 64512  }
 0x229   : > { %4665 = vmatprep.subr.mxu1 %v5703_v7  ;;  %4667 = vmatprep.mubr.msk.f32.mxu1 %vm5702_vm1, %v5703_v7  ;;  %v4847_v8 = vpack.c.bf16 %v1366_v6, %v1365_v3  ;;  %v4495_v10 = vld [vmem:[%s7162_s2] ss:$0 sm:$0xff]  ;;  %s5705_s3 = smov 96   ;;  %s5706_s25 = smov 88   ;;  %v1449_v54 = vld [vmem:[%s6494_s13 + $0x8] sm:$0xff]  ;;  %vm3727_vm4 = vcmask 523264  }
 0x22a   : > { %4845 = vmatpush3.bf16.msra.mxu0 %v4844_v5  ;;  %s7163_s20 = scalar_lea.vmem [#allocation8], %s6415_s8  ;;  %s5707_s28 = smov 56   ;;  %v1448_v28 = vld [vmem:[%s6494_s13] sm:$0xff] }
 0x22b   : > { %4846 = vmatprep.subr.bf16.mxu0 %v5701_v4  ;;  %v1357_v16 = vld [vmem:[%s7163_s20] sm:$0xff]  ;;  %s5708_s23 = smov 80   ;;  %s5709_s4 = smov 120  }
 0x22c   : > { %v6556_v17 = vmul.f32 -1e+09, %v1357_v16  ;;  %s5710_s27 = smov 112   ;;  %s5711_s18 = smov 48  }
 0x22d   : > { %s5712_s1 = smov 72   ;;  %s5713_s24 = smov 104  }
 0x22e   : > { %4848 = vmatpush3.bf16.msra.mxu0 %v4847_v8  ;;  %s7164_s19 = scalar_lea.vmem [#allocation12], %s6440_s10  ;;  %s5714_s6 = smov 40  }
 0x22f   : > { %4660 = vmatprep.subr.mxu0 %v5703_v7  ;;  %v4497_v5 = vld [vmem:[%s7164_s19] ss:$0 sm:$0xff]  ;;  %s7169_s11 = scalar_lea.vmem [#allocation20], %s6440_s10 }
 0x231   : > { %4658 = vmatmul.mubr.msk.f32.vlgmr.msra.gmra.mrb[0].mxu0 %vm1374_vm2, %v6531_v9 }
 0x232   : > { %4662 = vmatprep.mubr.msk.f32.mxu0 %vm5702_vm1, %v5703_v7 }
 0x304   : > { %v1444_v11 = vpop.f32.mrb[0].mxu0 }
 0x305   : > { %v6540_v12 = vadd.f32 %v4495_v10, %v1444_v11  ;;  %v4659_v13 = vpop.f32.mrb[1].mxu0 }
 0x307   : > { %1551 = vrot.lane.b32.xlu1 %v6540_v12, %s5704_s7  ;;  %1460 = vrot.lane.b32.xlu0 %v6540_v12, %s5705_s3 }
 0x30b   : > { %1703 = vrot.lane.b32.xlu1 %v6540_v12, %s5706_s25 }
 0x379   : > { %v1552_v14 = vpop.permute.xlu1 %1551  ;;  %v1461_v15 = vpop.permute.xlu0 %1460 }
 0x37a   : > { %4661 = vmatpush3.xpose.msk.msra.mxu0 %vm1462_vm3, %v1461_v15  ;;  %4666 = vmatpush3.msra.mxu1 %v1552_v14 }
 0x37b   : > { %4675 = vmatprep.subr.mxu1 %v5703_v7  ;;  %4670 = vmatprep.subr.mxu0 %v5703_v7 }
 0x37d   : > { %4663 = vmatmul.mubr.msk.f32.vlgmr.msra.gmra.mrb[2].mxu0 %vm1462_vm3, %v6540_v12  ;;  %v1704_v29 = vpop.permute.xlu1 %1703 }
 0x37e   : > { %4672 = vmatprep.mubr.msk.f32.mxu0 %vm5702_vm1, %v5703_v7  ;;  %4671 = vmatpush3.msra.mxu0 %v1448_v28 }
 0x37f   : > { %4680 = vmatprep.subr.mxu0 %v5703_v7 }
 0x450   : > { %v1533_v18 = vpop.f32.mrb[2].mxu0 }
 0x451   : > { %v1537_v19 = vmul.f32 0.35355338, %v1533_v18  ;;  %v4664_v20 = vpop.f32.mrb[3].mxu0 }
 0x453   : > { %v1538_v21 = vadd.f32 %v1537_v19, %v6556_v17  ;;  %v1450_v19 = vld [vmem:[%s6494_s13 + $0x10] sm:$0xff] }
 0x455   : > { %v1539_v22 = vsel %vm1462_vm3, %v1538_v21, -inf }
 0x456   : > { %1540 = vmax.xlane.f32.xlu0 %v1539_v22 }
 0x46c   : > { %1794 = vrot.lane.b32.xlu0 %v6540_v12, %s5707_s28 }
 0x470   : > { %1946 = vrot.lane.b32.xlu0 %v6540_v12, %s5708_s23 }
 0x4e3   : > { %v1541_v23 = vpop.xlane.xlu0 %1540 }
 0x4e4   : > { %v1542_v24 = vsub.f32 %v1538_v21, %v1541_v23 }
 0x4e6   : > { %v1543_v25 = vmul.f32 1.442695, %v1542_v24 }
 0x4e7   : > { %v1795_v35 = vpop.permute.xlu0 %1794 }
 0x4e8   : > { %5039 = vpow2.f32 %v1543_v25 }
 0x4eb   : > { %v1947_v49 = vpop.permute.xlu0 %1946 }
 0x4f2   : > { %v5040_v26 = vpop.eup %5039 }
 0x4f3   : > { %v1545_v27 = vsel %vm1462_vm3, %v5040_v26, 0.0 }
 0x4f4   : > { %1546 = vadd.xlane.f32.xlu1 %v1545_v27 }
 0x505   : > { %1701 = vrot.lane.b32.xlu1 %v6540_v12, %s5709_s4 }
 0x581   : > { %v1547_v30 = vpop.xlane.xlu1 %1546 }
 0x582   : > { %5041 = vrcp.f32 %v1547_v30 }
 0x585   : > { %v1702_v33 = vpop.permute.xlu1 %1701 }
 0x58c   : > { %v5042_v31 = vpop.eup %5041 }
 0x58d   : > { %v1549_v32 = vmul.f32 %v5042_v31, %v5040_v26 }
 0x58f   : > { %1550 = vst.msk [vmem:[%s6517_s21] sm:$0xff] %vm1462_vm3, %v1549_v32  ;;  %4668 = vmatmul.mubr.msk.f32.vlgmr.msra.gmra.mrb[0].mxu1 %vm1462_vm3, %v1549_v32  ;;  %v1451_v32 = vld [vmem:[%s6494_s13 + $0x18] sm:$0xff]  ;;  %s7165_s13 = scalar_lea.vmem [#allocation6], %s6415_s8 }
 0x590   : > { %4676 = vmatpush3.xpose.msk.msra.mxu1 %vm1462_vm3, %v1704_v29  ;;  %4677 = vmatprep.mubr.msk.f32.mxu1 %vm5702_vm1, %v5703_v7 }
 0x591   : > { %4685 = vmatprep.subr.mxu1 %v5703_v7 }
 0x593   : > { %4678 = vmatmul.mubr.msk.f32.vlgmr.msra.gmra.mrb[2].mxu1 %vm1462_vm3, %v1702_v33 }
 0x594   : > { %4687 = vmatprep.mubr.msk.f32.mxu1 %vm5702_vm1, %v5703_v7  ;;  %4686 = vmatpush3.msra.mxu1 %v1449_v54  ;;  %v2541_v54 = vld [vmem:[%s6456_s16 + $0x10] sm:$0xff] }
 0x595   : > { %4695 = vmatprep.subr.mxu1 %v5703_v7 }
 0x662   : > { %v1623_v34 = vpop.f32.mrb[0].mxu1 }
 0x663   : > { %v4669_v36 = vpop.f32.mrb[1].mxu1  ;;  %4673 = vmatmul.mubr.msk.f32.vlgmr.msra.gmra.mrb[4].mxu0 %vm1462_vm3, %v1623_v34 }
 0x664   : > { %4681 = vmatpush3.msra.mxu0 %v1795_v35  ;;  %4682 = vmatprep.mubr.msk.f32.mxu0 %vm5702_vm1, %v5703_v7 }
 0x665   : > { %4690 = vmatprep.subr.mxu0 %v5703_v7 }
 0x666   : > { %v1775_v37 = vpop.f32.mrb[2].mxu1 }
 0x667   : > { %v1779_v38 = vmul.f32 0.35355338, %v1775_v37  ;;  %v4679_v39 = vpop.f32.mrb[3].mxu1 }
 0x669   : > { %v1780_v40 = vadd.f32 %v1779_v38, %v6556_v17 }
 0x66b   : > { %v1781_v41 = vsel %vm1462_vm3, %v1780_v40, -inf }
 0x66c   : > { %1782 = vmax.xlane.f32.xlu1 %v1781_v41 }
 0x6f9   : > { %v1783_v42 = vpop.xlane.xlu1 %1782 }
 0x6fa   : > { %v1784_v43 = vsub.f32 %v1780_v40, %v1783_v42 }
 0x6fc   : > { %v1785_v44 = vmul.f32 1.442695, %v1784_v43 }
 0x6fe   : > { %5043 = vpow2.f32 %v1785_v44 }
 0x708   : > { %v5044_v45 = vpop.eup %5043 }
 0x709   : > { %v1787_v46 = vsel %vm1462_vm3, %v5044_v45, 0.0 }
 0x70a   : > { %1788 = vadd.xlane.f32.xlu0 %v1787_v46 }
 0x720   : > { %1944 = vrot.lane.b32.xlu0 %v6540_v12, %s5710_s27 }
 0x736   : > { %v1696_v47 = vpop.f32.mrb[4].mxu0 }
 0x737   : > { %v4674_v48 = vpop.f32.mrb[5].mxu0  ;;  %v1700_v6 = vadd.f32 %v4497_v5, %v1696_v47  ;;  %v6667_v5 = vld [vmem:[%s6509_s9] sm:$0x7]  ;;  %s7168_s9 = scalar_lea.vmem [#allocation9], %s6415_s8 }
 0x797   : > { %v1789_v50 = vpop.xlane.xlu0 %1788 }
 0x798   : > { %5045 = vrcp.f32 %v1789_v50  ;;  %v2539_v50 = vld [vmem:[%s6456_s16] sm:$0xff] }
 0x79b   : > { %v1945_v53 = vpop.permute.xlu0 %1944 }
 0x7a2   : > { %v5046_v51 = vpop.eup %5045 }
 0x7a3   : > { %v1791_v52 = vmul.f32 %v5046_v51, %v5044_v45  ;;  %v2540_v51 = vld [vmem:[%s6456_s16 + $0x8] sm:$0xff] }
 0x7a5   : > { %4504 = vst.msk [vmem:[%s6517_s21 + $0x8] sm:$0xff] %vm1462_vm3, %v1791_v52  ;;  %4683 = vmatmul.mubr.msk.f32.vlgmr.msra.gmra.mrb[6].mxu0 %vm1462_vm3, %v1791_v52  ;;  %v4856_v52 = vpack.c.bf16 %v2540_v51, %v2539_v50 }
 0x7a6   : > { %4691 = vmatpush3.xpose.msk.msra.mxu0 %vm1462_vm3, %v1947_v49  ;;  %4692 = vmatprep.mubr.msk.f32.mxu0 %vm5702_vm1, %v5703_v7 }
 0x7a7   : > { %4700 = vmatprep.subr.mxu0 %v5703_v7 }
 0x7a9   : > { %4693 = vmatmul.mubr.msk.f32.vlgmr.msra.gmra.mrb[8].mxu0 %vm1462_vm3, %v1945_v53  ;;  %v2456_v53 = vld [vmem:[%s6499_s15 + $0x8] sm:$0xff] }
 0x7aa   : > { %4702 = vmatprep.mubr.msk.f32.mxu0 %vm5702_vm1, %v5703_v7  ;;  %4701 = vmatpush3.msra.mxu0 %v1450_v19 }
 0x7ab   : > { %4710 = vmatprep.subr.mxu0 %v5703_v7 }
 0x878   : > { %v1866_v55 = vpop.f32.mrb[6].mxu0 }
 0x879   : > { %v4684_v56 = vpop.f32.mrb[7].mxu0  ;;  %4688 = vmatmul.mubr.msk.f32.vlgmr.msra.gmra.mrb[4].mxu1 %vm1462_vm3, %v1866_v55 }
 0x87a   : > { %4697 = vmatprep.mubr.msk.f32.mxu1 %vm5702_vm1, %v5703_v7  ;;  %v2542_v56 = vld [vmem:[%s6456_s16 + $0x18] sm:$0xff]  ;;  %s7167_s16 = scalar_lea.vmem [#allocation14], %s6440_s10 }
 0x87c   : > { %v2018_v57 = vpop.f32.mrb[8].mxu0 }
 0x87d   : > { %v2022_v58 = vmul.f32 0.35355338, %v2018_v57  ;;  %v4694_v59 = vpop.f32.mrb[9].mxu0  ;;  %v4859_v57 = vpack.c.bf16 %v2542_v56, %v2541_v54 }
 0x87e   : > { %v2458_v59 = vld [vmem:[%s6499_s15 + $0x18] sm:$0xff] }
 0x87f   : > { %v2023_v60 = vadd.f32 %v2022_v58, %v6556_v17  ;;  %v2457_v58 = vld [vmem:[%s6499_s15 + $0x10] sm:$0xff] }
 0x881   : > { %v2024_v61 = vsel %vm1462_vm3, %v2023_v60, -inf }
 0x882   : > { %2025 = vmax.xlane.f32.xlu1 %v2024_v61  ;;  %v4853_v61 = vpack.c.bf16 %v2458_v59, %v2457_v58 }
 0x893   : > { %2037 = vrot.lane.b32.xlu1 %v6540_v12, %s5711_s18 }
 0x897   : > { %2189 = vrot.lane.b32.xlu1 %v6540_v12, %s5712_s1 }
 0x89b   : > { %2187 = vrot.lane.b32.xlu1 %v6540_v12, %s5713_s24 }
 0x90f   : > { %v2026_v62 = vpop.xlane.xlu1 %2025 }
 0x910   : > { %v2027_v63 = vsub.f32 %v2023_v60, %v2026_v62  ;;  %v1356_v60 = vld [vmem:[%s7165_s13] sm:$0xff]  ;;  %v2442_v62 = vlaneseq }
 0x912   : > { %v2028_v0 = vmul.f32 1.442695, %v2027_v63 }
 0x913   : > { %v2038_v1 = vpop.permute.xlu1 %2037 }
 0x914   : > { %5047 = vpow2.f32 %v2028_v0  ;;  %4696 = vmatpush3.msra.mxu1 %v2038_v1  ;;  %v6663_v1 = vshrl.u32 %v2442_v62, 7 }
 0x915   : > { %4705 = vmatprep.subr.mxu1 %v5703_v7 }
 0x917   : > { %v2190_v15 = vpop.permute.xlu1 %2189 }
 0x91b   : > { %v2188_v18 = vpop.permute.xlu1 %2187 }
 0x91e   : > { %v5048_v2 = vpop.eup %5047 }
 0x91f   : > { %v2030_v3 = vsel %vm1462_vm3, %v5048_v2, 0.0 }
 0x920   : > { %2031 = vadd.xlane.f32.xlu0 %v2030_v3  ;;  %v2444_v3 = vsub.s32 0, %v6663_v1 }
 0x94c   : > { %v1939_v8 = vpop.f32.mrb[4].mxu1 }
 0x94d   : > { %v1943_v10 = vadd.f32 %v1939_v8, %v1700_v6  ;;  %v4689_v11 = vpop.f32.mrb[5].mxu1  ;;  %v2445_v6 = vrot.slane %v6667_v5, %v2444_v3  ;;  %v6671_v8 = vld [vmem:[%s6514_s0] sm:$0x7] }
 0x9ad   : > { %v2032_v13 = vpop.xlane.xlu0 %2031 }
 0x9ae   : > { %5049 = vrcp.f32 %v2032_v13 }
 0x9b8   : > { %v5050_v14 = vpop.eup %5049 }
 0x9b9   : > { %v2034_v16 = vmul.f32 %v5050_v14, %v5048_v2 }
 0x9bb   : > { %4509 = vst.msk [vmem:[%s6517_s21 + $0x10] sm:$0xff] %vm1462_vm3, %v2034_v16  ;;  %4698 = vmatmul.mubr.msk.f32.vlgmr.msra.gmra.mrb[6].mxu1 %vm1462_vm3, %v2034_v16 }
 0x9bc   : > { %4706 = vmatpush3.xpose.msk.msra.mxu1 %vm1462_vm3, %v2190_v15  ;;  %4707 = vmatprep.mubr.msk.f32.mxu1 %vm5702_vm1, %v5703_v7 }
 0x9bd   : > { %4715 = vmatprep.subr.mxu1 %v5703_v7 }
 0x9bf   : > { %4708 = vmatmul.mubr.msk.f32.vlgmr.msra.gmra.mrb[8].mxu1 %vm1462_vm3, %v2188_v18 }
 0x9c0   : > { %4717 = vmatprep.mubr.msk.f32.mxu1 %vm5702_vm1, %v5703_v7  ;;  %4716 = vmatpush3.msra.mxu1 %v1451_v32 }
 0x9c1   : > { %4855 = vmatprep.subr.bf16.mxu1 %v5701_v4 }
 0xa8e   : > { %v2109_v20 = vpop.f32.mrb[6].mxu1 }
 0xa8f   : > { %v4699_v21 = vpop.f32.mrb[7].mxu1  ;;  %4703 = vmatmul.mubr.msk.f32.vlgmr.msra.gmra.mrb[10].mxu0 %vm1462_vm3, %v2109_v20 }
 0xa90   : > { %4712 = vmatprep.mubr.msk.f32.mxu0 %vm5702_vm1, %v5703_v7  ;;  %v4517_v21 = vld [vmem:[%s7167_s16] ss:$0 sm:$0xff] }
 0xa92   : > { %v2261_v22 = vpop.f32.mrb[8].mxu1 }
 0xa93   : > { %v2265_v23 = vmul.f32 0.35355338, %v2261_v22  ;;  %v4709_v24 = vpop.f32.mrb[9].mxu1 }
 0xa95   : > { %v2266_v25 = vadd.f32 %v2265_v23, %v6556_v17 }
 0xa97   : > { %v2267_v26 = vsel %vm1462_vm3, %v2266_v25, -inf }
 0xa98   : > { %2268 = vmax.xlane.f32.xlu1 %v2267_v26 }
 0xb25   : > { %v2269_v27 = vpop.xlane.xlu1 %2268 }
 0xb26   : > { %v2270_v28 = vsub.f32 %v2266_v25, %v2269_v27  ;;  %v1359_v25 = vld [vmem:[%s7168_s9] sm:$0xff] }
 0xb27   : > { %v6699_v26 = vmul.f32 -1e+09, %v1359_v25 }
 0xb28   : > { %v2271_v29 = vmul.f32 1.442695, %v2270_v28 }
 0xb2a   : > { %5051 = vpow2.f32 %v2271_v29 }
 0xb34   : > { %v5052_v30 = vpop.eup %5051 }
 0xb35   : > { %v2273_v31 = vsel %vm1462_vm3, %v5052_v30, 0.0 }
 0xb36   : > { %2274 = vadd.xlane.f32.xlu0 %v2273_v31 }
 0xb4c   : > { %2280 = vrot.lane.b32.xlu0 %v6540_v12, %s5714_s6 }
 0xb62   : > { %v2182_v17 = vpop.f32.mrb[10].mxu0 }
 0xb63   : > { %v2186_v33 = vadd.f32 %v2182_v17, %v1943_v10  ;;  %v4704_v34 = vpop.f32.mrb[11].mxu0  ;;  %v2453_v10 = vrot.slane %v6671_v8, %v2444_v3 }
 0xbc3   : > { %v2275_v35 = vpop.xlane.xlu0 %2274 }
 0xbc4   : > { %5053 = vrcp.f32 %v2275_v35 }
 0xbc7   : > { %v2281_v36 = vpop.permute.xlu0 %2280 }
 0xbc8   : > { %4711 = vmatpush3.msra.mxu0 %v2281_v36 }
 0xbc9   : > { %4849 = vmatprep.subr.bf16.mxu0 %v5701_v4 }
 0xbce   : > { %v5054_v37 = vpop.eup %5053 }
 0xbcf   : > { %v2277_v38 = vmul.f32 %v5054_v37, %v5052_v30 }
 0xbd1   : > { %4514 = vst.msk [vmem:[%s6517_s21 + $0x18] sm:$0xff] %vm1462_vm3, %v2277_v38  ;;  %4713 = vmatmul.mubr.msk.f32.vlgmr.msra.gmra.mrb[12].mxu0 %vm1462_vm3, %v2277_v38 }
 0xbd2   : > { %4728 = vmatprep.mubr.msk.f32.mxu0 %vm5702_vm1, %v5703_v7 }
 0xca4   : > { %v2352_v12 = vpop.f32.mrb[12].mxu0 }
 0xca5   : > { %v4714_v39 = vpop.f32.mrb[13].mxu0  ;;  %4718 = vmatmul.mubr.msk.f32.vlgmr.msra.gmra.mrb[10].mxu1 %vm1462_vm3, %v2352_v12 }
 0xca6   : > { %4739 = vmatprep.mubr.msk.f32.mxu1 %vm5702_vm1, %v5703_v7  ;;  %4857 = vmatpush3.bf16.msra.mxu1 %v4856_v52 }
 0xca7   : > { %4858 = vmatprep.subr.bf16.mxu1 %v5701_v4 }
 0xcaa   : > { %4860 = vmatpush3.bf16.msra.mxu1 %v4859_v57 }
 0xcab   : > { %4747 = vmatprep.subr.mxu1 %v5703_v7 }
 0xcad   : > { %4740 = vmatmul.mubr.msk.f32.vlgmr.msra.gmra.mrb[12].mxu1 %vm1374_vm2, %v1356_v60 }
 0xcae   : > { %4749 = vmatprep.mubr.msk.f32.mxu1 %vm5702_vm1, %v5703_v7 }
 0xd78   : > { %v2425_v40 = vpop.f32.mrb[10].mxu1 }
 0xd79   : > { %v2429_v41 = vadd.f32 %v2425_v40, %v2186_v33  ;;  %v4719_v42 = vpop.f32.mrb[11].mxu1 }
 0xd7b   : > { %v2430_v43 = vadd.f32 %v2429_v41, %v6531_v9  ;;  %v2455_v9 = vld [vmem:[%s6499_s15] sm:$0xff]  ;;  %s7166_s15 = scalar_lea.vmem [#allocation17], %s6440_s10  ;;  %v2623_v41 = vld [vmem:[%s6464_s26] sm:$0xff] }
 0xd7c   : > { %v4850_v55 = vpack.c.bf16 %v2456_v53, %v2455_v9  ;;  %v4519_v16 = vld [vmem:[%s7166_s15] ss:$0 sm:$0xff] }
 0xd7d   : > { %v2431_v44 = vsel %vm1374_vm2, %v2430_v43, 0.0 }
 0xd7e   : > { %2432 = vadd.xlane.f32.xlu0 %v2431_v44  ;;  %4851 = vmatpush3.bf16.msra.mxu0 %v4850_v55 }
 0xd7f   : > { %4852 = vmatprep.subr.bf16.mxu0 %v5701_v4 }
 0xd80   : > { %v2619_v18 = vpop.f32.mrb[12].mxu1 }
 0xd81   : > { %v6682_v19 = vadd.f32 %v4519_v16, %v2619_v18  ;;  %v4741_v20 = vpop.f32.mrb[13].mxu1 }
 0xd82   : > { %4854 = vmatpush3.bf16.msra.mxu0 %v4853_v61  ;;  %v2624_v61 = vld [vmem:[%s6464_s26 + $0x8] sm:$0xff] }
 0xd83   : > { %4742 = vmatprep.subr.mxu0 %v5703_v7 }
 0xd94   : > { %2876 = vrot.lane.b32.xlu0 %v6682_v19, %s5709_s4 }
 0xe0b   : > { %v2433_v45 = vpop.xlane.xlu0 %2432 }
 0xe0c   : > { %v2435_v46 = vmul.f32 0.03125, %v2433_v45 }
 0xe0e   : > { %v2436_v47 = vsub.f32 %v2430_v43, %v2435_v46 }
 0xe0f   : > { %v2877_v39 = vpop.permute.xlu0 %2876 }
 0xe10   : > { %v2437_v48 = vmul.f32 %v2436_v47, %v2436_v47  ;;  %v2446_v11 = vmul.f32 %v2445_v6, %v2436_v47 }
 0xe12   : > { %v2438_v49 = vsel %vm1374_vm2, %v2437_v48, 0.0 }
 0xe13   : > { %2439 = vadd.xlane.f32.xlu1 %v2438_v49 }
 0xea0   : > { %v2440_v63 = vpop.xlane.xlu1 %2439 }
 0xea1   : > { %v2441_v0 = vmul.f32 0.03125, %v2440_v63 }
 0xea3   : > { %v2447_v2 = vadd.f32 1e-06, %v2441_v0 }
 0xea5   : > { %5055 = vrsqrt.f32 %v2447_v2 }
 0xeaf   : > { %v5056_v13 = vpop.eup %5055 }
 0xeb0   : > { %v2449_v14 = vmul.f32 %v5056_v13, %v2446_v11 }
 0xeb2   : > { %v6674_v15 = vadd.f32 %v2453_v10, %v2449_v14 }
 0xeb4   : > { %4729 = vmatmul.mubr.msk.f32.vlgmr.msra.gmra.mrb[14].mxu0 %vm1374_vm2, %v6674_v15 }
 0xeb5   : > { %4744 = vmatprep.mubr.msk.f32.mxu0 %vm5702_vm1, %v5703_v7  ;;  %4743 = vmatpush3.xpose.msk.msra.mxu0 %vm1462_vm3, %v6682_v19 }
 0xeb6   : > { %4752 = vmatprep.subr.mxu0 %v5703_v7 }
 0xf87   : > { %v2535_v22 = vpop.f32.mrb[14].mxu0 }
 0xf88   : > { %v6691_v23 = vadd.f32 %v4517_v21, %v2535_v22  ;;  %v4730_v24 = vpop.f32.mrb[15].mxu0  ;;  %v4521_v21 = vld [vmem:[%s7169_s11] ss:$0 sm:$0xff] }
 0xf8a   : > { %4745 = vmatmul.mubr.msk.f32.vlgmr.msra.gmra.mrb[16].mxu0 %vm1462_vm3, %v6691_v23 }
 0xf8b   : > { %4754 = vmatprep.mubr.msk.f32.mxu0 %vm5702_vm1, %v5703_v7  ;;  %4753 = vmatpush3.msra.mxu0 %v2623_v41 }
 0xf8c   : > { %4762 = vmatprep.subr.mxu0 %v5703_v7 }
0x105d   : > { %v2706_v27 = vpop.f32.mrb[16].mxu0 }
0x105e   : > { %v2710_v28 = vmul.f32 0.35355338, %v2706_v27  ;;  %v4746_v29 = vpop.f32.mrb[17].mxu0 }
0x1060   : > { %v2711_v30 = vadd.f32 %v2710_v28, %v6699_v26 }
0x1062   : > { %v2712_v31 = vsel %vm1462_vm3, %v2711_v30, -inf }
0x1063   : > { %2713 = vmax.xlane.f32.xlu1 %v2712_v31 }
0x1074   : > { %2724 = vrot.lane.b32.xlu1 %v6682_v19, %s5705_s3 }
0x10f0   : > { %v2714_v32 = vpop.xlane.xlu1 %2713 }
0x10f1   : > { %v2715_v17 = vsub.f32 %v2711_v30, %v2714_v32  ;;  %v2625_v32 = vld [vmem:[%s6464_s26 + $0x10] sm:$0xff] }
0x10f3   : > { %v2716_v33 = vmul.f32 1.442695, %v2715_v17 }
0x10f4   : > { %v2725_v34 = vpop.permute.xlu1 %2724 }
0x10f5   : > { %5057 = vpow2.f32 %v2716_v33  ;;  %4748 = vmatpush3.msra.mxu1 %v2725_v34 }
0x10f6   : > { %4757 = vmatprep.subr.mxu1 %v5703_v7 }
0x10ff   : > { %v5058_v35 = vpop.eup %5057 }
0x1100   : > { %v2718_v36 = vsel %vm1462_vm3, %v5058_v35, 0.0 }
0x1101   : > { %2719 = vadd.xlane.f32.xlu1 %v2718_v36 }
0x1112   : > { %2874 = vrot.lane.b32.xlu1 %v6691_v23, %s5709_s4 }
0x118e   : > { %v2720_v37 = vpop.xlane.xlu1 %2719 }
0x118f   : > { %5059 = vrcp.f32 %v2720_v37 }
0x1192   : > { %v2875_v40 = vpop.permute.xlu1 %2874 }
0x1199   : > { %v5060_v38 = vpop.eup %5059 }
0x119a   : > { %v2722_v12 = vmul.f32 %v5060_v38, %v5058_v35 }
0x119c   : > { %2723 = vst.msk [vmem:[%s6519_s14] sm:$0xff] %vm1462_vm3, %v2722_v12  ;;  %4750 = vmatmul.mubr.msk.f32.vlgmr.msra.gmra.mrb[14].mxu1 %vm1462_vm3, %v2722_v12 }
0x119d   : > { %4758 = vmatpush3.xpose.msk.msra.mxu1 %vm1462_vm3, %v2877_v39  ;;  %4759 = vmatprep.mubr.msk.f32.mxu1 %vm5702_vm1, %v5703_v7 }
0x119e   : > { %4767 = vmatprep.subr.mxu1 %v5703_v7 }
0x11a0   : > { %4760 = vmatmul.mubr.msk.f32.vlgmr.msra.gmra.mrb[16].mxu1 %vm1462_vm3, %v2875_v40 }
0x11a1   : > { %4769 = vmatprep.mubr.msk.f32.mxu1 %vm5702_vm1, %v5703_v7  ;;  %4768 = vmatpush3.msra.mxu1 %v2624_v61 }
0x11a2   : > { %4777 = vmatprep.subr.mxu1 %v5703_v7 }
0x126f   : > { %v2796_v42 = vpop.f32.mrb[14].mxu1 }
0x1270   : > { %v4751_v43 = vpop.f32.mrb[15].mxu1  ;;  %4755 = vmatmul.mubr.msk.f32.vlgmr.msra.gmra.mrb[18].mxu0 %vm1462_vm3, %v2796_v42 }
0x1271   : > { %4764 = vmatprep.mubr.msk.f32.mxu0 %vm5702_vm1, %v5703_v7 }
0x1273   : > { %v2948_v44 = vpop.f32.mrb[16].mxu1 }
0x1274   : > { %v2952_v45 = vmul.f32 0.35355338, %v2948_v44  ;;  %v4761_v46 = vpop.f32.mrb[17].mxu1 }
0x1276   : > { %v2953_v47 = vadd.f32 %v2952_v45, %v6699_v26 }
0x1278   : > { %v2954_v48 = vsel %vm1462_vm3, %v2953_v47, -inf }
0x1279   : > { %2955 = vmax.xlane.f32.xlu1 %v2954_v48 }
0x128a   : > { %2967 = vrot.lane.b32.xlu1 %v6682_v19, %s5706_s25 }
0x128e   : > { %3117 = vrot.lane.b32.xlu1 %v6691_v23, %s5710_s27 }
0x1306   : > { %v2956_v49 = vpop.xlane.xlu1 %2955 }
0x1307   : > { %v2957_v50 = vsub.f32 %v2953_v47, %v2956_v49 }
0x1309   : > { %v2958_v51 = vmul.f32 1.442695, %v2957_v50 }
0x130a   : > { %v2968_v52 = vpop.permute.xlu1 %2967 }
0x130b   : > { %5061 = vpow2.f32 %v2958_v51  ;;  %4763 = vmatpush3.msra.mxu0 %v2968_v52 }
0x130c   : > { %4772 = vmatprep.subr.mxu0 %v5703_v7 }
0x130e   : > { %v3118_v60 = vpop.permute.xlu1 %3117 }
0x1315   : > { %v5062_v9 = vpop.eup %5061 }
0x1316   : > { %v2960_v53 = vsel %vm1462_vm3, %v5062_v9, 0.0 }
0x1317   : > { %2961 = vadd.xlane.f32.xlu0 %v2960_v53 }
0x132d   : > { %3119 = vrot.lane.b32.xlu0 %v6682_v19, %s5710_s27 }
0x1343   : > { %v2869_v54 = vpop.f32.mrb[18].mxu0 }
0x1344   : > { %v4756_v55 = vpop.f32.mrb[19].mxu0  ;;  %v2873_v22 = vadd.f32 %v4521_v21, %v2869_v54 }
0x13a4   : > { %v2962_v56 = vpop.xlane.xlu0 %2961 }
0x13a5   : > { %5063 = vrcp.f32 %v2962_v56 }
0x13a8   : > { %v3120_v59 = vpop.permute.xlu0 %3119 }
0x13af   : > { %v5064_v57 = vpop.eup %5063 }
0x13b0   : > { %v2964_v58 = vmul.f32 %v5064_v57, %v5062_v9 }
0x13b2   : > { %4528 = vst.msk [vmem:[%s6519_s14 + $0x8] sm:$0xff] %vm1462_vm3, %v2964_v58  ;;  %4765 = vmatmul.mubr.msk.f32.vlgmr.msra.gmra.mrb[20].mxu0 %vm1462_vm3, %v2964_v58 }
0x13b3   : > { %4773 = vmatpush3.xpose.msk.msra.mxu0 %vm1462_vm3, %v3120_v59  ;;  %4774 = vmatprep.mubr.msk.f32.mxu0 %vm5702_vm1, %v5703_v7  ;;  %v3627_v59 = vld [vmem:[%s6472_s5] sm:$0xff] }
0x13b4   : > { %4782 = vmatprep.subr.mxu0 %v5703_v7 }
0x13b6   : > { %4775 = vmatmul.mubr.msk.f32.vlgmr.msra.gmra.mrb[22].mxu0 %vm1462_vm3, %v3118_v60  ;;  %v3628_v60 = vld [vmem:[%s6472_s5 + $0x8] sm:$0xff] }
0x13b7   : > { %4784 = vmatprep.mubr.msk.f32.mxu0 %vm5702_vm1, %v5703_v7  ;;  %4783 = vmatpush3.msra.mxu0 %v2625_v32  ;;  %v4862_v61 = vpack.c.bf16 %v3628_v60, %v3627_v59 }
0x13b8   : > { %4792 = vmatprep.subr.mxu0 %v5703_v7 }
0x1485   : > { %v3039_v62 = vpop.f32.mrb[20].mxu0 }
0x1486   : > { %v4766_v63 = vpop.f32.mrb[21].mxu0  ;;  %4770 = vmatmul.mubr.msk.f32.vlgmr.msra.gmra.mrb[18].mxu1 %vm1462_vm3, %v3039_v62  ;;  %v3630_v62 = vld [vmem:[%s6472_s5 + $0x18] sm:$0xff] }
0x1487   : > { %4779 = vmatprep.mubr.msk.f32.mxu1 %vm5702_vm1, %v5703_v7 }
0x1489   : > { %v3191_v0 = vpop.f32.mrb[22].mxu0 }
0x148a   : > { %v3195_v2 = vmul.f32 0.35355338, %v3191_v0  ;;  %v4776_v3 = vpop.f32.mrb[23].mxu0  ;;  %v3712_v0 = vld [vmem:[%s6504_s29] sm:$0xff] }
0x148b   : > { %v3714_v3 = vld [vmem:[%s6504_s29 + $0x10] sm:$0xff] }
0x148c   : > { %v3196_v6 = vadd.f32 %v3195_v2, %v6699_v26  ;;  %v3713_v2 = vld [vmem:[%s6504_s29 + $0x8] sm:$0xff] }
0x148e   : > { %v3197_v10 = vsel %vm1462_vm3, %v3196_v6, -inf }
0x148f   : > { %3198 = vmax.xlane.f32.xlu1 %v3197_v10  ;;  %v3715_v10 = vld [vmem:[%s6504_s29 + $0x18] sm:$0xff] }
0x14a0   : > { %3210 = vrot.lane.b32.xlu1 %v6682_v19, %s5708_s23 }
0x14a4   : > { %3360 = vrot.lane.b32.xlu1 %v6691_v23, %s5713_s24 }
0x151c   : > { %v3199_v11 = vpop.xlane.xlu1 %3198 }
0x151d   : > { %v3200_v13 = vsub.f32 %v3196_v6, %v3199_v11  ;;  %v4868_v6 = vpack.c.bf16 %v3713_v2, %v3712_v0  ;;  %v4871_v11 = vpack.c.bf16 %v3715_v10, %v3714_v3 }
0x151f   : > { %v3201_v14 = vmul.f32 1.442695, %v3200_v13  ;;  %v3716_v13 = vld [vmem:[%s6504_s29 + $0x20] sm:$0xff] }
0x1520   : > { %v3211_v16 = vpop.permute.xlu1 %3210 }
0x1521   : > { %5065 = vpow2.f32 %v3201_v14  ;;  %4778 = vmatpush3.msra.mxu1 %v3211_v16  ;;  %v3717_v14 = vld [vmem:[%s6504_s29 + $0x28] sm:$0xff] }
0x1522   : > { %4787 = vmatprep.subr.mxu1 %v5703_v7  ;;  %v4874_v16 = vpack.c.bf16 %v3717_v14, %v3716_v13 }
0x1524   : > { %v3361_v31 = vpop.permute.xlu1 %3360 }
0x152b   : > { %v5066_v18 = vpop.eup %5065 }
0x152c   : > { %v3203_v20 = vsel %vm1462_vm3, %v5066_v18, 0.0 }
0x152d   : > { %3204 = vadd.xlane.f32.xlu0 %v3203_v20 }
0x1543   : > { %3362 = vrot.lane.b32.xlu0 %v6682_v19, %s5713_s24 }
0x1559   : > { %v3112_v23 = vpop.f32.mrb[18].mxu1 }
0x155a   : > { %v3116_v24 = vadd.f32 %v3112_v23, %v2873_v22  ;;  %v4771_v25 = vpop.f32.mrb[19].mxu1  ;;  %v3616_v22 = vsub.s32 1, %v6663_v1 }
0x155c   : > { %v3617_v23 = vrot.slane %v6667_v5, %v3616_v22 }
0x15ba   : > { %v3205_v27 = vpop.xlane.xlu0 %3204 }
0x15bb   : > { %5067 = vrcp.f32 %v3205_v27 }
0x15be   : > { %v3363_v30 = vpop.permute.xlu0 %3362 }
0x15c5   : > { %v5068_v28 = vpop.eup %5067 }
0x15c6   : > { %v3207_v29 = vmul.f32 %v5068_v28, %v5066_v18 }
0x15c8   : > { %4533 = vst.msk [vmem:[%s6519_s14 + $0x10] sm:$0xff] %vm1462_vm3, %v3207_v29  ;;  %4780 = vmatmul.mubr.msk.f32.vlgmr.msra.gmra.mrb[20].mxu1 %vm1462_vm3, %v3207_v29 }
0x15c9   : > { %4788 = vmatpush3.xpose.msk.msra.mxu1 %vm1462_vm3, %v3363_v30  ;;  %4789 = vmatprep.mubr.msk.f32.mxu1 %vm5702_vm1, %v5703_v7  ;;  %v3718_v30 = vld [vmem:[%s6504_s29 + $0x30] sm:$0xff] }
0x15ca   : > { %4797 = vmatprep.subr.mxu1 %v5703_v7 }
0x15cc   : > { %4790 = vmatmul.mubr.msk.f32.vlgmr.msra.gmra.mrb[22].mxu1 %vm1462_vm3, %v3361_v31 }
0x15cd   : > { %4799 = vmatprep.mubr.msk.f32.mxu1 %vm5702_vm1, %v5703_v7 }
0x169b   : > { %v3282_v17 = vpop.f32.mrb[20].mxu1 }
0x169c   : > { %v4781_v33 = vpop.f32.mrb[21].mxu1  ;;  %4785 = vmatmul.mubr.msk.f32.vlgmr.msra.gmra.mrb[24].mxu0 %vm1462_vm3, %v3282_v17 }
0x169d   : > { %4794 = vmatprep.mubr.msk.f32.mxu0 %vm5702_vm1, %v5703_v7 }
0x169f   : > { %v3434_v34 = vpop.f32.mrb[22].mxu1 }
0x16a0   : > { %v3438_v35 = vmul.f32 0.35355338, %v3434_v34  ;;  %v4791_v36 = vpop.f32.mrb[23].mxu1 }
0x16a2   : > { %v3439_v37 = vadd.f32 %v3438_v35, %v6699_v26  ;;  %v2626_v26 = vld [vmem:[%s6464_s26 + $0x18] sm:$0xff]  ;;  %s7171_s26 = scalar_lea.vmem [#allocation24], %s6440_s10 }
0x16a3   : > { %4798 = vmatpush3.msra.mxu1 %v2626_v26  ;;  %v4543_v36 = vld [vmem:[%s7171_s26] ss:$0 sm:$0xff] }
0x16a4   : > { %v3440_v38 = vsel %vm1462_vm3, %v3439_v37, -inf  ;;  %4867 = vmatprep.subr.bf16.mxu1 %v5701_v4 }
0x16a5   : > { %3441 = vmax.xlane.f32.xlu1 %v3440_v38 }
0x16b6   : > { %3453 = vrot.lane.b32.xlu1 %v6682_v19, %s5712_s1 }
0x1732   : > { %v3442_v12 = vpop.xlane.xlu1 %3441 }
0x1733   : > { %v3443_v39 = vsub.f32 %v3439_v37, %v3442_v12 }
0x1735   : > { %v3444_v40 = vmul.f32 1.442695, %v3443_v39 }
0x1736   : > { %v3454_v41 = vpop.permute.xlu1 %3453 }
0x1737   : > { %5069 = vpow2.f32 %v3444_v40  ;;  %4793 = vmatpush3.msra.mxu0 %v3454_v41 }
0x1738   : > { %4861 = vmatprep.subr.bf16.mxu0 %v5701_v4 }
0x1741   : > { %v5070_v42 = vpop.eup %5069 }
0x1742   : > { %v3446_v43 = vsel %vm1462_vm3, %v5070_v42, 0.0 }
0x1743   : > { %3447 = vadd.xlane.f32.xlu0 %v3446_v43 }
0x176f   : > { %v3355_v44 = vpop.f32.mrb[24].mxu0 }
0x1770   : > { %v3359_v45 = vadd.f32 %v3355_v44, %v3116_v24  ;;  %v4786_v19 = vpop.f32.mrb[25].mxu0  ;;  %v3625_v24 = vrot.slane %v6671_v8, %v3616_v22 }
0x17d0   : > { %v3448_v46 = vpop.xlane.xlu0 %3447 }
0x17d1   : > { %5071 = vrcp.f32 %v3448_v46 }
0x17db   : > { %v5072_v47 = vpop.eup %5071 }
0x17dc   : > { %v3450_v48 = vmul.f32 %v5072_v47, %v5070_v42  ;;  %v3814_v47 = vsub.s32 2, %v6663_v1 }
0x17de   : > { %4538 = vst.msk [vmem:[%s6519_s14 + $0x18] sm:$0xff] %vm1462_vm3, %v3450_v48  ;;  %4795 = vmatmul.mubr.msk.f32.vlgmr.msra.gmra.mrb[26].mxu0 %vm1462_vm3, %v3450_v48  ;;  %v3815_v48 = vrot.slane %v6667_v5, %v3814_v47 }
0x17df   : > { %4810 = vmatprep.mubr.msk.f32.mxu0 %vm5702_vm1, %v5703_v7  ;;  %4863 = vmatpush3.bf16.msra.mxu0 %v4862_v61 }
0x17e0   : > { %4864 = vmatprep.subr.bf16.mxu0 %v5701_v4 }
0x18b1   : > { %v3525_v49 = vpop.f32.mrb[26].mxu0 }
0x18b2   : > { %v4796_v50 = vpop.f32.mrb[27].mxu0  ;;  %4800 = vmatmul.mubr.msk.f32.vlgmr.msra.gmra.mrb[24].mxu1 %vm1462_vm3, %v3525_v49  ;;  %v3823_v49 = vrot.slane %v6671_v8, %v3814_v47 }
0x18b3   : > { %4829 = vmatprep.mubr.msk.f32.mxu1 %vm5702_vm1, %v5703_v7  ;;  %4869 = vmatpush3.bf16.msra.mxu1 %v4868_v6 }
0x18b4   : > { %4870 = vmatprep.subr.bf16.mxu1 %v5701_v4 }
0x18b7   : > { %4872 = vmatpush3.bf16.msra.mxu1 %v4871_v11 }
0x18b8   : > { %4873 = vmatprep.subr.bf16.mxu1 %v5701_v4 }
0x18bb   : > { %4875 = vmatpush3.bf16.msra.mxu1 %v4874_v16 }
0x18bc   : > { %4876 = vmatprep.subr.bf16.mxu1 %v5701_v4  ;;  %v3719_v4 = vld [vmem:[%s6504_s29 + $0x38] sm:$0xff]  ;;  %s7172_s29 = sld [smem:[#allocation46_spill]] }
0x18bd   : > { %v4877_v31 = vpack.c.bf16 %v3719_v4, %v3718_v30 }
0x18bf   : > { %4878 = vmatpush3.bf16.msra.mxu1 %v4877_v31 }
0x18c2   : > { %p4545_p2 = scmp.ne.s32.totalorder %s7172_s29, 1 }
0x18c3   : > { %s7173_s0 = sld [smem:[#allocation81_spill]] (!%p4545_p2)  ;;  %v5715_v8 = vmov (!%p4545_p2), 0.0|0.0   ;;  %vm5716_vm5 = vmmov (!%p4545_p2), 0   ;;  %s7175_s27 = sld [smem:[#allocation82_spill]] (!%p4545_p2) }
0x18c9   : > { %s7174_s17 = smov (!%p4545_p2), %s7173_s0 }
0x18ca   : > { %v3831_v1 = vld [vmem:[%s7174_s17 + $0x8] sm:$0xff] (!%p4545_p2)  ;;  %v3832_v5 = vld [vmem:[%s7174_s17 + $0x10] sm:$0xff] (!%p4545_p2) }
0x1985   : > { %v3598_v51 = vpop.f32.mrb[24].mxu1 }
0x1986   : > { %v3602_v52 = vadd.f32 %v3598_v51, %v3359_v45  ;;  %v4801_v9 = vpop.f32.mrb[25].mxu1 }
0x1988   : > { %v3603_v53 = vadd.f32 %v3602_v52, %v6674_v15  ;;  %v3629_v15 = vld [vmem:[%s6472_s5 + $0x10] sm:$0xff]  ;;  %s7170_s5 = scalar_lea.vmem [#allocation23], %s6440_s10 }
0x1989   : > { %v4865_v63 = vpack.c.bf16 %v3630_v62, %v3629_v15  ;;  %v4541_v32 = vld [vmem:[%s7170_s5] ss:$0 sm:$0xff] }
0x198a   : > { %v3604_v54 = vsel %vm1374_vm2, %v3603_v53, 0.0 }
0x198b   : > { %3605 = vadd.xlane.f32.xlu0 %v3604_v54  ;;  %4866 = vmatpush3.bf16.msra.mxu0 %v4865_v63 }
0x198c   : > { %4879 = vmatprep.subr.bf16.mxu0 (!%p4545_p2), %v5715_v8 }
0x1a18   : > { %v3606_v55 = vpop.xlane.xlu0 %3605 }
0x1a19   : > { %v3607_v56 = vmul.f32 0.03125, %v3606_v55  ;;  %v3833_v55 = vld [vmem:[%s7174_s17 + $0x18] sm:$0xff] (!%p4545_p2) }
0x1a1b   : > { %v3608_v57 = vsub.f32 %v3603_v53, %v3607_v56  ;;  %v3830_v53 = vld [vmem:[%s7173_s0] sm:$0xff] (!%p4545_p2)  ;;  %v5717_v56 = vmov (!%p4545_p2), 0.0  }
0x1a1c   : > { %v4880_v54 = vpack.c.bf16 (!%p4545_p2), %v3831_v1, %v3830_v53 }
0x1a1d   : > { %v3609_v58 = vmul.f32 %v3608_v57, %v3608_v57  ;;  %v3618_v25 = vmul.f32 %v3617_v23, %v3608_v57  ;;  %v4883_v57 = vpack.c.bf16 (!%p4545_p2), %v3833_v55, %v3832_v5 }
0x1a1f   : > { %v3610_v7 = vsel %vm1374_vm2, %v3609_v58, 0.0  ;;  %v4546_v58 = vld [vmem:[%s7175_s27] ss:$0 sm:$0xff] (!%p4545_p2) }
0x1a20   : > { %3611 = vadd.xlane.f32.xlu0 %v3610_v7 }
0x1aad   : > { %v3612_v18 = vpop.xlane.xlu0 %3611 }
0x1aae   : > { %v3613_v20 = vmul.f32 0.03125, %v3612_v18 }
0x1ab0   : > { %v3619_v21 = vadd.f32 1e-06, %v3613_v20 }
0x1ab2   : > { %5073 = vrsqrt.f32 %v3619_v21 }
0x1abc   : > { %v5074_v27 = vpop.eup %5073 }
0x1abd   : > { %v3621_v28 = vmul.f32 %v5074_v27, %v3618_v25 }
0x1abf   : > { %v3626_v29 = vadd.f32 %v3625_v24, %v3621_v28 }
0x1ac1   : > { %4811 = vmatmul.mubr.msk.f32.vlgmr.msra.gmra.mrb[28].mxu0 %vm1374_vm2, %v3626_v29 }
0x1ac2   : > { %4840 = vmatprep.mubr.msk.f32.mxu0 (!%p4545_p2), %vm5716_vm5, %v5717_v56  ;;  %4881 = vmatpush3.bf16.msra.mxu0 (!%p4545_p2), %v4880_v54 }
0x1ac3   : > { %4882 = vmatprep.subr.bf16.mxu0 (!%p4545_p2), %v5715_v8 }
0x1ac6   : > { %4884 = vmatpush3.bf16.msra.mxu0 (!%p4545_p2), %v4883_v57 }
0x1b94   : > { %v3707_v17 = vpop.f32.mrb[28].mxu0 }
0x1b95   : > { %v3708_v33 = vadd.f32 %v4541_v32, %v3707_v17  ;;  %v4812_v34 = vpop.f32.mrb[29].mxu0 }
0x1b97   : > { %v3711_v35 = vmax.f32 %v3708_v33, 0.0 }
0x1b99   : > { %4830 = vmatmul.mubr.msk.f32.vlgmr.msra.gmra.mrb[26].mxu1 %vm3727_vm4, %v3711_v35 }
0x1c6c   : > { %v3797_v37 = vpop.f32.mrb[26].mxu1 }
0x1c6d   : > { %v3798_v38 = vadd.f32 %v4543_v36, %v3797_v37  ;;  %v4831_v12 = vpop.f32.mrb[27].mxu1 }
0x1c6f   : > { %v3801_v39 = vadd.f32 %v3798_v38, %v3626_v29 }
0x1c71   : > { %v3802_v40 = vsel %vm1374_vm2, %v3801_v39, 0.0 }
0x1c72   : > { %3803 = vadd.xlane.f32.xlu0 %v3802_v40 }
0x1cff   : > { %v3804_v41 = vpop.xlane.xlu0 %3803 }
0x1d00   : > { %v3805_v42 = vmul.f32 0.03125, %v3804_v41 }
0x1d02   : > { %v3806_v43 = vsub.f32 %v3801_v39, %v3805_v42 }
0x1d04   : > { %v3807_v26 = vmul.f32 %v3806_v43, %v3806_v43  ;;  %v3816_v50 = vmul.f32 %v3815_v48, %v3806_v43 }
0x1d06   : > { %v3808_v44 = vsel %vm1374_vm2, %v3807_v26, 0.0 }
0x1d07   : > { %3809 = vadd.xlane.f32.xlu0 %v3808_v44 }
0x1d94   : > { %v3810_v45 = vpop.xlane.xlu0 %3809 }
0x1d95   : > { %v3811_v19 = vmul.f32 0.03125, %v3810_v45 }
0x1d97   : > { %v3817_v46 = vadd.f32 1e-06, %v3811_v19 }
0x1d99   : > { %5075 = vrsqrt.f32 %v3817_v46 }
0x1da2   : > { %3829 = sbr.rel (%p4545_p2) target bundleno = 7807 (0x1e7f), region = 172 }
0x1da3   : > { %v5076_v51 = vpop.eup %5075 }
0x1da4   : > { %v3819_v52 = vmul.f32 %v5076_v51, %v3816_v50 }
0x1da6   : > { %v3824_v9 = vadd.f32 %v3823_v49, %v3819_v52 }
0x1da8   : > { %3825 = vst.msk [vmem:[#allocation2] sm:$0xff] %vm1374_vm2, %v3824_v9  ;;  %4841 = vmatmul.mubr.msk.f32.vlgmr.msra.gmra.mrb[0].mxu0 (!%p4545_p2), %vm1374_vm2, %v3824_v9 }
0x1e7b   : > { %v3910_v7 = vpop.f32.mrb[0].mxu0 }
0x1e7c   : > { %v3911_v59 = vadd.f32 %v4546_v58, %v3910_v7  ;;  %v4842_v60 = vpop.f32.mrb[1].mxu0 }
0x1e7e   : > { %3914 = vst [vmem:[%s1305_s30] sm:$0xff] %v3911_v59 }
0x1e7f PF: > { %s7176_s18 = sld [smem:[#allocation47_spill]]  ;;  %s7177_s1 = sld [smem:[#allocation58_spill]] }
0x1e80   : > { %s7178_s13 = sld [smem:[#allocation84_spill]]  ;;  %s3952_s16 = sshll.u32 %s6517_s21, 4  ;;  %s6851_s16 = int_to_ptr.vmem [resolvable:$true] %s3952_s16 }
0x1e81   : > { %s7179_s5 = sld [smem:[#allocation85_spill]]  ;;  %s3921_s10 = scalar_lea.sflag [#allocation28], %s6424_s22 }
0x1e82   : > { %s5469_s12 = scalar_lea.vmem %s6851_s16, 512  ;;  %s5718_s0 = smov [#allocation27]  }
0x1e83   : > { %p5470_p5 = scmp.ne.s32.totalorder %s6851_s16, %s5469_s12  ;;  %s5473_s2 = sshll.u32 %s5718_s0, 4  ;;  %s5474_s2 = int_to_ptr.vmem [resolvable:$false] %s5473_s2 }
0x1e84   : > { %s5475_s21 = scalar_lea.vmem %s5474_s2, 1024  ;;  %p5476_p6 = scmp.lt.s32.totalorder %s6851_s16, %s5474_s2 }
0x1e85   : > { %s4565_s24 = sshll.u32 %s7176_s18, 9  ;;  %p7181_p11 = scmp.ne.s32.totalorder %s7177_s1, 0 }
0x1e86   : > { %s6848_s15 = scalar_lea.hbm %s7178_s13, %s4565_s24  ;;  %p5477_p4 = scmp.lt.s32.totalorder %s5475_s21, %s5469_s12 }
0x1e87   : > { %s7180_s29 = smov %s7179_s5  ;;  %s6856_s26 = scalar_lea.hbm %s7179_s5, %s4565_s24 }
0x1e88   : > { %p5471_p0 = pnand %p5470_p5, %p7181_p11  ;;  %p5478_p12 = por %p5477_p4, %p5476_p6 }
0x1e8a   : > { %p5472_p1 = pneg %p5471_p0 }
0x1e8c   : > { %p5479_p7 = pnand %p5478_p12, %p5472_p1 }
0x1e8e   : > { %5482 = shalt.err (!%p5479_p7)
}
0x1e8f   : > { %s5483_s7 = scalar_lea.hbm %s6848_s15, 512  ;;  %s5487_s20 = scalar_lea.hbm %s7178_s13, 1024 }
0x1e90   : > { %p5484_p13 = scmp.ne.s32.totalorder %s6848_s15, %s5483_s7  ;;  %p5488_p9 = scmp.lt.u32.totalorder %s6848_s15, %s7178_s13 }
0x1e91   : > { %p5489_p10 = scmp.lt.u32.totalorder %s5487_s20, %s5483_s7  ;;  %p5491_p5 = scmp.lt.u32.totalorder %s5483_s7, %s6848_s15 }
0x1e92   : > { %p5485_p3 = pnand %p5484_p13, %p7181_p11 }
0x1e93   : > { %p5490_p2 = por %p5489_p10, %p5488_p9 }
0x1e94   : > { %p5486_p8 = pneg %p5485_p3 }
0x1e95   : > { %p5492_p0 = por %p5491_p5, %p5490_p2 }
0x1e97   : > { %p5493_p1 = pnand %p5492_p0, %p5486_p8 }
0x1e99   : > { %5496 = shalt.err (!%p5493_p1)
}
0x1e9a   : > { %s5719_s4 = smov 128   ;;  %s7182_s27 = sld [smem:[#allocation60_spill]] }
0x1e9b   : > { %s5720_s24 = smov 8   ;;  %s4551_s19 = sshll.u32 %s7176_s18, 7 }
0x1e9c   : > { %4914 = dma.vmem_to_hbm [thread:$0]  (%p7181_p11), %s6851_s16, 512, %s6848_s15, %s3921_s10, %s5719_s4, %s5719_s4, %s5720_s24  }
0x1e9d   : > { %s7183_s11 = sld [smem:[#allocation83_spill]]  ;;  %s3939_s12 = sshll.u32 %s1305_s30, 4  ;;  %s6893_s12 = int_to_ptr.vmem [resolvable:$true] %s3939_s12 }
0x1e9e   : > { %s3968_s0 = sshll.u32 %s6519_s14, 4  ;;  %s5497_s21 = scalar_lea.vmem %s6893_s12, 128  ;;  %s6920_s0 = int_to_ptr.vmem [resolvable:$true] %s3968_s0 }
0x1e9f   : > { %p5498_p6 = scmp.ne.s32.totalorder %s6893_s12, %s5497_s21  ;;  %s5721_s18 = smov [#allocation26]  }
0x1ea0   : > { %s3916_s2 = scalar_lea.sflag [#allocation5], %s7182_s27  ;;  %s5501_s15 = sshll.u32 %s5721_s18, 4  ;;  %s5502_s15 = int_to_ptr.vmem [resolvable:$false] %s5501_s15 }
0x1ea1   : > { %p5499_p4 = pnand %p5498_p6, %p7181_p11  ;;  %s5503_s16 = scalar_lea.vmem %s5502_s15, 256 }
0x1ea2   : > { %p5504_p7 = scmp.lt.s32.totalorder %s6893_s12, %s5502_s15  ;;  %p5505_p13 = scmp.lt.s32.totalorder %s5503_s16, %s5497_s21 }
0x1ea3   : > { %s6889_s5 = scalar_lea.hbm %s7183_s11, %s4551_s19  ;;  %p5500_p12 = pneg %p5499_p4 }
0x1ea4   : > { %p5506_p3 = por %p5505_p13, %p5504_p7 }
0x1ea6   : > { %p5507_p8 = pnand %p5506_p3, %p5500_p12 }
0x1ea8   : > { %5510 = shalt.err (!%p5507_p8)
}
0x1ea9   : > { %s5511_s30 = scalar_lea.hbm %s6889_s5, 128  ;;  %s5515_s3 = scalar_lea.hbm %s7183_s11, 256 }
0x1eaa   : > { %p5512_p9 = scmp.ne.s32.totalorder %s6889_s5, %s5511_s30  ;;  %p5516_p5 = scmp.lt.u32.totalorder %s6889_s5, %s7183_s11 }
0x1eab   : > { %p5517_p0 = scmp.lt.u32.totalorder %s5515_s3, %s5511_s30  ;;  %p5519_p6 = scmp.lt.u32.totalorder %s5511_s30, %s6889_s5 }
0x1eac   : > { %p5513_p10 = pnand %p5512_p9, %p7181_p11 }
0x1ead   : > { %p5518_p1 = por %p5517_p0, %p5516_p5 }
0x1eae   : > { %p5514_p2 = pneg %p5513_p10 }
0x1eaf   : > { %p5520_p4 = por %p5519_p6, %p5518_p1 }
0x1eb1   : > { %p5521_p12 = pnand %p5520_p4, %p5514_p2 }
0x1eb3   : > { %5524 = shalt.err (!%p5521_p12)
}
0x1eb4   : > { %4913 = dma.vmem_to_hbm [thread:$0]  (%p7181_p11), %s6893_s12, 128, %s6889_s5, %s3916_s2  }
0x1eb5   : > { %s5525_s28 = scalar_lea.vmem %s6920_s0, 512  ;;  %s5722_s23 = smov [#allocation29]  }
0x1eb6   : > { %p5526_p7 = scmp.ne.s32.totalorder %s6920_s0, %s5525_s28  ;;  %s5529_s27 = sshll.u32 %s5722_s23, 4  ;;  %s5530_s27 = int_to_ptr.vmem [resolvable:$false] %s5529_s27 }
0x1eb7   : > { %s5531_s19 = scalar_lea.vmem %s5530_s27, 1024  ;;  %p5532_p8 = scmp.lt.s32.totalorder %s6920_s0, %s5530_s27 }
0x1eb8   : > { %p5527_p13 = pnand %p5526_p7, %p7181_p11  ;;  %p5533_p9 = scmp.lt.s32.totalorder %s5531_s19, %s5525_s28 }
0x1eba   : > { %p5528_p3 = pneg %p5527_p13  ;;  %p5534_p10 = por %p5533_p9, %p5532_p8 }
0x1ebc   : > { %p5535_p2 = pnand %p5534_p10, %p5528_p3 }
0x1ebe   : > { %5538 = shalt.err (!%p5535_p2)
}
0x1ebf   : > { %s5539_s14 = scalar_lea.hbm %s6856_s26, 512  ;;  %s5543_s5 = scalar_lea.hbm %s7180_s29, 1024 }
0x1ec0   : > { %p5540_p5 = scmp.ne.s32.totalorder %s6856_s26, %s5539_s14  ;;  %p5544_p6 = scmp.lt.u32.totalorder %s6856_s26, %s7180_s29 }
0x1ec1   : > { %p5545_p4 = scmp.lt.u32.totalorder %s5543_s5, %s5539_s14  ;;  %p5547_p7 = scmp.lt.u32.totalorder %s5539_s14, %s6856_s26 }
0x1ec2   : > { %p5541_p0 = pnand %p5540_p5, %p7181_p11 }
0x1ec3   : > { %p5546_p12 = por %p5545_p4, %p5544_p6 }
0x1ec4   : > { %p5542_p1 = pneg %p5541_p0 }
0x1ec5   : > { %p5548_p13 = por %p5547_p7, %p5546_p12 }
0x1ec7   : > { %p5549_p3 = pnand %p5548_p13, %p5542_p1 }
0x1ec9   : > { %5552 = shalt.err (!%p5549_p3)
}
0x1eca   : > { %4915 = dma.vmem_to_hbm [thread:$0]  (%p7181_p11), %s6920_s0, 512, %s6856_s26, %s3921_s10, %s5719_s4, %s5719_s4, %s5720_s24  }
0x1ecb PF: > { %s7184_s21 = sld [smem:[#allocation50_spill]]  ;;  %s7185_s18 = sld [smem:[#allocation43_spill]] }
0x1ecc   : > { %s7186_s15 = sld [smem:[#allocation59_spill]] }
0x1ed1   : > { %p4929_p8 = scmp.ge.s32.totalorder %s7184_s21, 2  ;;  %s3983_s16 = sand.u32 1, %s7185_s18  }
0x1ed2   : > { %p7187_p9 = scmp.ne.s32.totalorder %s7186_s15, 0  ;;  %s3984_s30 = scalar_lea.sflag [#allocation5], %s3983_s16 }
0x1ed4   : > { %p4920_p10 = pnand %p4929_p8, %p7187_p9 }
0x1ed6   : > { %5634 = dma.done.wait (!%p4920_p10), %s3984_s30, 128  }
0x1ed7   : > { %5636 = vsyncadd (!%p4920_p10), %s3984_s30, 4294967168  ;;  %s7188_s1 = sadd.s32 4294967294, %s7184_s21  }
0x1ed8   : > { %s3992_s8 = sand.u32 1, %s7188_s1  }
0x1ed9   : > { %s3993_s7 = scalar_lea.sflag [#allocation28], %s3992_s8 }
0x1eda   : > { %5638 = dma.done.wait (!%p4920_p10), %s3993_s7, 1024  }
0x1edb   : > { %5640 = vsyncadd (!%p4920_p10), %s3993_s7, 4294966272  ;;  %s65_s3 = sadd.s32 1, %s7184_s21   ;;  %s7189_s5 = sld [smem:[#allocation41_spill]] }
0x1edc   : > { %p62_p11 = scmp.ge.s32.totalorder %s65_s3, 6   ;;  %s7190_s26 = sld [smem:[#allocation42_spill]] }
0x1edd   : > { %s7191_s27 = sld [smem:[#allocation55_spill]]  ;;  %s7192_s28 = sld [smem:[#allocation44_spill]] }
0x1ede   : > { %s7193_s6 = sld [smem:[#allocation45_spill]]  ;;  %s7194_s2 = sld [smem:[#allocation56_spill]] }
0x1edf   : > { %s7195_s22 = sld [smem:[#allocation48_spill]]  ;;  %s7196_s0 = sld [smem:[#allocation49_spill]] }
0x1ee0   : > { %s7197_s7 = sld [smem:[#allocation52_spill]]  ;;  %s7198_s30 = sld [smem:[#allocation53_spill]] }
0x1ee1   :  { %64 = sbr.rel (!%p62_p11) target bundleno = 51 (0x33), region = 374 }
0x1ee5   : > { %7199 = sst [smem:[#allocation41_spill]] %s7195_s22 }
0x1ee8   :  { %4007 = vsyncpa [#allocation4], 1 }
0x1ee9   :  { %4009 = vsyncpa [#allocation4 + $0x1], 1 }
0x1eea   :  { %4010 = vsyncpa [#allocation7], 1 }
0x1eeb   :  { %4012 = vsyncpa [#allocation7 + $0x1], 1 }
0x1eec   :  { %4013 = vsyncpa [#allocation10], 1 }
0x1eed   :  { %4015 = vsyncpa [#allocation10 + $0x1], 1 }
0x1eee   :  { %4016 = vsyncpa [#allocation13], 1 }
0x1eef   :  { %4018 = vsyncpa [#allocation13 + $0x1], 1 }
0x1ef0   :  { %4019 = vsyncpa [#allocation16], 1 }
0x1ef1   :  { %4021 = vsyncpa [#allocation16 + $0x1], 1 }
0x1ef2   :  { %4022 = vsyncpa [#allocation19], 1 }
0x1ef3   :  { %4024 = vsyncpa [#allocation19 + $0x1], 1 }
0x1ef4   :  { %4025 = vsyncpa [#allocation22], 1 }
0x1ef5   :  { %4027 = vsyncpa [#allocation22 + $0x1], 1 }
0x1ef6   :  { %4028 = vsyncpa [#allocation25], 1 }
0x1ef7   :  { %4030 = vsyncpa [#allocation25 + $0x1], 1 }
0x1ef8   :  { %4031 = vsyncpa [#allocation5], 1 }
0x1ef9   :  { %4033 = vsyncpa [#allocation5 + $0x1], 1 }
0x1efa   :  { %4034 = vsyncpa [#allocation28], 1 }
0x1efb   :  { %4036 = vsyncpa [#allocation28 + $0x1], 1 }

</bundles_post_ra>
